<compile_context>
chip_gen: v7x
topology: tpu7x:2x2x1
jax: 0.10.0
libtpu: 0.0.40
codegen_flags: <defaults>
</compile_context>

<pallas_src>
import functools

import jax
import jax.numpy as jnp
from jax.experimental import pallas as pl
from jax.experimental.pallas import tpu as pltpu


# ----------------------------------------------------------------------------
# Pallas kernels
# ----------------------------------------------------------------------------
def _conv_pool_kernel(p_ref, w_ref, b_ref, o_ref, *, n_win):
    """Fused Conv2d + ReLU + MaxPool2d.

    p_ref: (n_win, Mp, K)  pool-window-major im2col patches
    w_ref: (K, Cout)       conv weights
    b_ref: (1, Cout)       conv bias
    o_ref: (Mp, Cout)      pooled output (Mp = B*Hp*Wp, NHWC-flattened)
    """
    w = w_ref[...]
    acc = jnp.dot(p_ref[0], w, preferred_element_type=jnp.float32)
    for j in range(1, n_win):
        acc = jnp.maximum(acc, jnp.dot(p_ref[j], w,
                                       preferred_element_type=jnp.float32))
    # max(relu(z_j + b)) == relu(max(z_j) + b)  (bias/relu are monotonic)
    o_ref[...] = jnp.maximum(acc + b_ref[...], 0.0)


def _lstm_dense_kernel(*refs, num_layers, hidden, seq_len, batch):
    """Fused multi-layer LSTM (batch_first semantics) + Linear-ReLU-Linear head.

    refs layout:
      [0]                     xseq  (T*B, D0)  time-major flattened input
      [1 .. 3L]               per layer: wihT (D,4H), whhT (H,4H), b (1,4H)
      [3L+1 .. 3L+4]          fc1_wT (H,120), fc1_b (1,120), fc2_wT (120,C), fc2_b (1,C)
      [3L+5]                  out    (B, C)
      [3L+6]                  seq scratch (T*B, H)   inter-layer activations
    """
    n_w = 1 + 3 * num_layers
    xseq_ref = refs[0]
    lrefs = refs[1:n_w]
    fc1w_ref, fc1b_ref, fc2w_ref, fc2b_ref = refs[n_w:n_w + 4]
    out_ref = refs[n_w + 4]
    seq_ref = refs[n_w + 5]

    H = hidden
    B = batch

    h = jnp.zeros((B, H), jnp.float32)
    for layer in range(num_layers):
        wih_ref = lrefs[3 * layer + 0]
        whh_ref = lrefs[3 * layer + 1]
        b_ref = lrefs[3 * layer + 2]

        x_in = xseq_ref[...] if layer == 0 else seq_ref[...]   # (T*B, D)
        # Hoisted non-recurrent input projection over ALL timesteps at once,
        # with the (bih + bhh) bias folded in (hoisted out of the time loop).
        gx = jnp.dot(x_in, wih_ref[...],
                     preferred_element_type=jnp.float32) + b_ref[...]  # (T*B, 4H)
        whh = whh_ref[...]                                             # (H, 4H)

        h = jnp.zeros((B, H), jnp.float32)
        c = jnp.zeros((B, H), jnp.float32)
        for t in range(seq_len):
            g = gx[t * B:(t + 1) * B, :] + jnp.dot(
                h, whh, preferred_element_type=jnp.float32)            # (B, 4H)
            # PyTorch gate order: i, f, g, o
            i_g = jax.nn.sigmoid(g[:, 0 * H:1 * H])
            f_g = jax.nn.sigmoid(g[:, 1 * H:2 * H])
            g_g = jnp.tanh(g[:, 2 * H:3 * H])
            o_g = jax.nn.sigmoid(g[:, 3 * H:4 * H])
            c = f_g * c + i_g * g_g
            h = o_g * jnp.tanh(c)
            if layer < num_layers - 1:
                seq_ref[pl.ds(t * B, B), :] = h   # feed next layer
        # Inter-layer LSTM dropout: identity at inference.

    # Fused dense head on the last timestep's hidden state of the last layer.
    hid = jnp.maximum(
        jnp.dot(h, fc1w_ref[...], preferred_element_type=jnp.float32)
        + fc1b_ref[...], 0.0)
    out_ref[...] = jnp.dot(hid, fc2w_ref[...],
                           preferred_element_type=jnp.float32) + fc2b_ref[...]


# ----------------------------------------------------------------------------
# Wrappers (pallas_call plumbing + pure-JAX glue)
# ----------------------------------------------------------------------------
def _vmem_spec(shape):
    # Full-array block in VMEM (all operands here are tiny).
    return pl.BlockSpec(shape, lambda i, _s=shape: (0,) * len(_s))


_COMPILER_PARAMS = pltpu.CompilerParams(dimension_semantics=("arbitrary",))


def _build_stage_patches(x_nhwc, KH=2, KW=3, PH=2, PW=3):
    """x: (B, H, W, C) NHWC -> (PH*PW, B*Hp*Wp, KH*KW*C) pool-window-major patches.

    patch[j=(dh,dw)][b*Hp*Wp + hp*Wp + wp, (kh*KW+kw)*C + ci]
        = x[b, PH*hp + dh + kh, PW*wp + dw + kw, ci]
    """
    B, H, W, C = x_nhwc.shape
    Ho, Wo = H - KH + 1, W - KW + 1
    Hp, Wp = Ho // PH, Wo // PW
    pats = []
    for dh in range(PH):
        for dw in range(PW):
            cols = []
            for kh in range(KH):
                for kw in range(KW):
                    h0, w0 = dh + kh, dw + kw
                    sl = x_nhwc[:, h0:h0 + PH * Hp:PH, w0:w0 + PW * Wp:PW, :]
                    cols.append(sl)                       # (B, Hp, Wp, C)
            patch = jnp.concatenate(cols, axis=-1)        # (B, Hp, Wp, KH*KW*C)
            pats.append(patch.reshape(B * Hp * Wp, KH * KW * C))
    return jnp.stack(pats, axis=0), (B, Hp, Wp)


def conv_relu_pool(x_nhwc, w, b):
    """Fused Conv2d(k=(2,3)) -> ReLU -> MaxPool2d((2,3)), NHWC in / NHWC out."""
    patches, (B, Hp, Wp) = _build_stage_patches(x_nhwc)
    Cout = w.shape[0]
    n_win, Mp, K = patches.shape
    # Weight flat-K order must match patch order: (kh, kw, ci).
    wmat = jnp.transpose(w, (2, 3, 1, 0)).reshape(K, Cout)
    bias = b.reshape(1, Cout)

    out = pl.pallas_call(
        functools.partial(_conv_pool_kernel, n_win=n_win),
        out_shape=jax.ShapeDtypeStruct((Mp, Cout), jnp.float32),
        grid=(1,),
        in_specs=[_vmem_spec((n_win, Mp, K)),
                  _vmem_spec((K, Cout)),
                  _vmem_spec((1, Cout))],
        out_specs=_vmem_spec((Mp, Cout)),
        compiler_params=_COMPILER_PARAMS,
    )(patches, wmat, bias)
    return out.reshape(B, Hp, Wp, Cout)


def lstm_dense_head(xseq, layer_params, fc1_wT, fc1_b, fc2_wT, fc2_b,
                    *, hidden, seq_len, batch):
    """xseq: (T*B, D0) time-major. Returns logits (B, n_classes)."""
    n_classes = fc2_wT.shape[1]
    arrays = [xseq]
    for wihT, whhT, b in layer_params:
        arrays += [wihT, whhT, b]
    arrays += [fc1_wT, fc1_b, fc2_wT, fc2_b]
    in_specs = [_vmem_spec(a.shape) for a in arrays]

    kern = functools.partial(_lstm_dense_kernel,
                             num_layers=len(layer_params), hidden=hidden,
                             seq_len=seq_len, batch=batch)
    return pl.pallas_call(
        kern,
        out_shape=jax.ShapeDtypeStruct((batch, n_classes), jnp.float32),
        grid=(1,),
        in_specs=in_specs,
        out_specs=_vmem_spec((batch, n_classes)),
        scratch_shapes=[pltpu.VMEM((seq_len * batch, hidden), jnp.float32)],
        compiler_params=_COMPILER_PARAMS,
    )(*arrays)


# ----------------------------------------------------------------------------
# Model
# ----------------------------------------------------------------------------
def _cnn_out_dims(n_mfccs, time_size):
    h, w = n_mfccs, time_size
    for _ in range(3):
        h, w = h - 1, w - 2        # Conv2d kernel (2, 3), no padding
        h, w = h // 2, w // 3      # MaxPool2d (2, 3), floor
    return h, w


def init_params(key, n_mfccs, time_size, n_classes, lstm_hidden, lstm_layers):
    keys = jax.random.split(key, 32)
    kit = iter(keys)

    def wgen(shape, scale=0.05):
        return (scale * jax.random.normal(next(kit), shape)).astype(jnp.float32)

    params = {}
    cin = 1
    for i, cout in enumerate((32, 64, 96)):
        params[f"conv{i + 1}_w"] = wgen((cout, cin, 2, 3))   # PyTorch layout
        params[f"conv{i + 1}_b"] = wgen((cout,))
        cin = cout

    h_cnn, _ = _cnn_out_dims(n_mfccs, time_size)
    rnn_input = 96 * h_cnn
    params["rnn_input_size"] = rnn_input
    params["lstm_hidden"] = lstm_hidden
    params["lstm_num_layers"] = lstm_layers

    d = rnn_input
    for layer in range(lstm_layers):
        wih = wgen((4 * lstm_hidden, d))
        whh = wgen((4 * lstm_hidden, lstm_hidden))
        bih = wgen((4 * lstm_hidden,))
        bhh = wgen((4 * lstm_hidden,))
        params[f"lstm{layer}_wihT"] = wih.T
        params[f"lstm{layer}_whhT"] = whh.T
        params[f"lstm{layer}_b"] = (bih + bhh).reshape(1, 4 * lstm_hidden)
        d = lstm_hidden

    fw1 = wgen((120, lstm_hidden))
    fb1 = wgen((120,))
    fw2 = wgen((n_classes, 120))
    fb2 = wgen((n_classes,))
    params["fc1_wT"] = fw1.T
    params["fc1_b"] = fb1.reshape(1, 120)
    params["fc2_wT"] = fw2.T
    params["fc2_b"] = fb2.reshape(1, n_classes)
    return params


def cough_net_forward(mfccs, params):
    B = mfccs.shape[0]
    x = mfccs[..., None].astype(jnp.float32)        # NHWC (B, n_mfccs, time, 1)

    # CNN stack: 3 x fused (Conv2d -> ReLU -> MaxPool2d) [+ Dropout2d identity]
    for i in range(3):
        x = conv_relu_pool(x, params[f"conv{i + 1}_w"], params[f"conv{i + 1}_b"])

    Bc, Hc, T, C = x.shape
    # cnn_to_lstm: rnn_in[b, t, c*Hc + h] = cnn_out[b, c, h, t]; time-major flatten.
    xseq = jnp.transpose(x, (2, 0, 3, 1)).reshape(T * B, C * Hc)

    layer_params = [(params[f"lstm{l}_wihT"], params[f"lstm{l}_whhT"],
                     params[f"lstm{l}_b"])
                    for l in range(params["lstm_num_layers"])]

    # Dropout in dense head / between LSTM layers: identity at inference.
    return lstm_dense_head(xseq, layer_params,
                           params["fc1_wT"], params["fc1_b"],
                           params["fc2_wT"], params["fc2_b"],
                           hidden=params["lstm_hidden"], seq_len=T, batch=B)


# ----------------------------------------------------------------------------
if __name__ == "__main__":
    # Three conv(2,3)+pool(2,3) stages need n_mfccs >= 15 and time_size >= 53
    # to keep spatial dims >= 1.
    B, N_MFCCS, TIME = 2, 15, 80          # -> cnn_out (B, 96, 1, 2), seq_len = 2
    N_CLASSES = 4
    LSTM_HIDDEN = 32
    LSTM_LAYERS = 2

    key = jax.random.PRNGKey(0)
    kp, kx = jax.random.split(key)
    params = init_params(kp, N_MFCCS, TIME, N_CLASSES, LSTM_HIDDEN, LSTM_LAYERS)
    mfccs = jax.random.normal(kx, (B, N_MFCCS, TIME), dtype=jnp.float32)

    fwd = jax.jit(lambda m: cough_net_forward(m, params))
    out = fwd(mfccs)
    out = jax.block_until_ready(out)

    assert out.shape == (B, N_CLASSES), out.shape
    assert jnp.all(jnp.isfinite(out))
    print("KERNEL_OK")
</pallas_src>

<mosaic_0001>
module attributes {stable_mosaic.version = 11 : i64} {
  func.func @_conv_pool_kernel(%arg0: i32, %arg1: memref<6x364x6xf32, #tpu.memory_space<vmem>>, %arg2: memref<6x32xf32, #tpu.memory_space<vmem>>, %arg3: memref<1x32xf32, #tpu.memory_space<vmem>>, %arg4: memref<364x32xf32, #tpu.memory_space<vmem>>) attributes {dimension_semantics = [#tpu.dimension_semantics<arbitrary>], iteration_bounds = array<i64: 1>, scalar_prefetch = 0 : i64, scratch_operands = 0 : i64, tpu.core_type = #tpu.core_type<tc>, window_params = [{pipeline_mode = #tpu.pipeline_mode<synchronous>, transform_indices = @transform_0, window_bounds = array<i64: 6, 364, 6>}, {pipeline_mode = #tpu.pipeline_mode<synchronous>, transform_indices = @transform_1, window_bounds = array<i64: 6, 32>}, {pipeline_mode = #tpu.pipeline_mode<synchronous>, transform_indices = @transform_2, window_bounds = array<i64: 1, 32>}, {pipeline_mode = #tpu.pipeline_mode<synchronous>, transform_indices = @transform_3, window_bounds = array<i64: 364, 32>}]} {
    %c0 = arith.constant 0 : index
    %c0_0 = arith.constant 0 : index
    %0 = vector.load %arg2[%c0, %c0_0] : memref<6x32xf32, #tpu.memory_space<vmem>>, vector<6x32xf32>
    %c0_1 = arith.constant 0 : index
    %c0_2 = arith.constant 0 : index
    %c0_3 = arith.constant 0 : index
    %1 = vector.load %arg1[%c0_1, %c0_2, %c0_3] : memref<6x364x6xf32, #tpu.memory_space<vmem>>, vector<1x364x6xf32>
    %2 = vector.shape_cast %1 : vector<1x364x6xf32> to vector<364x6xf32>
    %cst = arith.constant dense<0.000000e+00> : vector<364x32xf32>
    %3 = tpu.matmul %2, %0, %cst {dimension_numbers = #tpu.dot_dimension_numbers<[1], [0], [0], [1], [0, 0, 1, 1], [], []>} : vector<364x6xf32>, vector<6x32xf32>, vector<364x32xf32> -> vector<364x32xf32>
    %c1 = arith.constant 1 : index
    %c0_4 = arith.constant 0 : index
    %c0_5 = arith.constant 0 : index
    %4 = vector.load %arg1[%c1, %c0_4, %c0_5] : memref<6x364x6xf32, #tpu.memory_space<vmem>>, vector<1x364x6xf32>
    %5 = vector.shape_cast %4 : vector<1x364x6xf32> to vector<364x6xf32>
    %cst_6 = arith.constant dense<0.000000e+00> : vector<364x32xf32>
    %6 = tpu.matmul %5, %0, %cst_6 {dimension_numbers = #tpu.dot_dimension_numbers<[1], [0], [0], [1], [0, 0, 1, 1], [], []>} : vector<364x6xf32>, vector<6x32xf32>, vector<364x32xf32> -> vector<364x32xf32>
    %7 = arith.maximumf %3, %6 : vector<364x32xf32>
    %c2 = arith.constant 2 : index
    %c0_7 = arith.constant 0 : index
    %c0_8 = arith.constant 0 : index
    %8 = vector.load %arg1[%c2, %c0_7, %c0_8] : memref<6x364x6xf32, #tpu.memory_space<vmem>>, vector<1x364x6xf32>
    %9 = vector.shape_cast %8 : vector<1x364x6xf32> to vector<364x6xf32>
    %cst_9 = arith.constant dense<0.000000e+00> : vector<364x32xf32>
    %10 = tpu.matmul %9, %0, %cst_9 {dimension_numbers = #tpu.dot_dimension_numbers<[1], [0], [0], [1], [0, 0, 1, 1], [], []>} : vector<364x6xf32>, vector<6x32xf32>, vector<364x32xf32> -> vector<364x32xf32>
    %11 = arith.maximumf %7, %10 : vector<364x32xf32>
    %c3 = arith.constant 3 : index
    %c0_10 = arith.constant 0 : index
    %c0_11 = arith.constant 0 : index
    %12 = vector.load %arg1[%c3, %c0_10, %c0_11] : memref<6x364x6xf32, #tpu.memory_space<vmem>>, vector<1x364x6xf32>
    %13 = vector.shape_cast %12 : vector<1x364x6xf32> to vector<364x6xf32>
    %cst_12 = arith.constant dense<0.000000e+00> : vector<364x32xf32>
    %14 = tpu.matmul %13, %0, %cst_12 {dimension_numbers = #tpu.dot_dimension_numbers<[1], [0], [0], [1], [0, 0, 1, 1], [], []>} : vector<364x6xf32>, vector<6x32xf32>, vector<364x32xf32> -> vector<364x32xf32>
    %15 = arith.maximumf %11, %14 : vector<364x32xf32>
    %c4 = arith.constant 4 : index
    %c0_13 = arith.constant 0 : index
    %c0_14 = arith.constant 0 : index
    %16 = vector.load %arg1[%c4, %c0_13, %c0_14] : memref<6x364x6xf32, #tpu.memory_space<vmem>>, vector<1x364x6xf32>
    %17 = vector.shape_cast %16 : vector<1x364x6xf32> to vector<364x6xf32>
    %cst_15 = arith.constant dense<0.000000e+00> : vector<364x32xf32>
    %18 = tpu.matmul %17, %0, %cst_15 {dimension_numbers = #tpu.dot_dimension_numbers<[1], [0], [0], [1], [0, 0, 1, 1], [], []>} : vector<364x6xf32>, vector<6x32xf32>, vector<364x32xf32> -> vector<364x32xf32>
    %19 = arith.maximumf %15, %18 : vector<364x32xf32>
    %c5 = arith.constant 5 : index
    %c0_16 = arith.constant 0 : index
    %c0_17 = arith.constant 0 : index
    %20 = vector.load %arg1[%c5, %c0_16, %c0_17] : memref<6x364x6xf32, #tpu.memory_space<vmem>>, vector<1x364x6xf32>
    %21 = vector.shape_cast %20 : vector<1x364x6xf32> to vector<364x6xf32>
    %cst_18 = arith.constant dense<0.000000e+00> : vector<364x32xf32>
    %22 = tpu.matmul %21, %0, %cst_18 {dimension_numbers = #tpu.dot_dimension_numbers<[1], [0], [0], [1], [0, 0, 1, 1], [], []>} : vector<364x6xf32>, vector<6x32xf32>, vector<364x32xf32> -> vector<364x32xf32>
    %23 = arith.maximumf %19, %22 : vector<364x32xf32>
    %c0_19 = arith.constant 0 : index
    %c0_20 = arith.constant 0 : index
    %24 = vector.load %arg3[%c0_19, %c0_20] : memref<1x32xf32, #tpu.memory_space<vmem>>, vector<1x32xf32>
    %25 = vector.broadcast %24 : vector<1x32xf32> to vector<364x32xf32>
    %26 = arith.addf %23, %25 : vector<364x32xf32>
    %cst_21 = arith.constant 0.000000e+00 : f32
    %27 = vector.broadcast %cst_21 : f32 to vector<364x32xf32>
    %28 = arith.maximumf %26, %27 : vector<364x32xf32>
    %c0_22 = arith.constant 0 : index
    %c0_23 = arith.constant 0 : index
    %29 = vector.load %arg4[%c0_22, %c0_23] : memref<364x32xf32, #tpu.memory_space<vmem>>, vector<364x32xf32>
    tpu.vector_store %arg4[%c0_22, %c0_23], %28 {strides = array<i32>} : memref<364x32xf32, #tpu.memory_space<vmem>>, vector<364x32xf32>,
    return
  }
  func.func @transform_0(%arg0: i32) -> (i32, i32, i32) {
    %c0_i32 = arith.constant 0 : i32
    %c0_i32_0 = arith.constant 0 : i32
    %c0_i32_1 = arith.constant 0 : i32
    %c0_i32_2 = arith.constant 0 : i32
    return %c0_i32, %c0_i32_0, %c0_i32_1 : i32, i32, i32
  }
  func.func @transform_1(%arg0: i32) -> (i32, i32) {
    %c0_i32 = arith.constant 0 : i32
    %c0_i32_0 = arith.constant 0 : i32
    %c0_i32_1 = arith.constant 0 : i32
    return %c0_i32, %c0_i32_0 : i32, i32
  }
  func.func @transform_2(%arg0: i32) -> (i32, i32) {
    %c0_i32 = arith.constant 0 : i32
    %c0_i32_0 = arith.constant 0 : i32
    %c0_i32_1 = arith.constant 0 : i32
    return %c0_i32, %c0_i32_0 : i32, i32
  }
  func.func @transform_3(%arg0: i32) -> (i32, i32) {
    %c0_i32 = arith.constant 0 : i32
    %c0_i32_0 = arith.constant 0 : i32
    %c0_i32_1 = arith.constant 0 : i32
    return %c0_i32, %c0_i32_0 : i32, i32
  }
}

module attributes {stable_mosaic.version = 11 : i64} {
  func.func @_conv_pool_kernel(%arg0: i32, %arg1: memref<6x48x192xf32, #tpu.memory_space<vmem>>, %arg2: memref<192x64xf32, #tpu.memory_space<vmem>>, %arg3: memref<1x64xf32, #tpu.memory_space<vmem>>, %arg4: memref<48x64xf32, #tpu.memory_space<vmem>>) attributes {dimension_semantics = [#tpu.dimension_semantics<arbitrary>], iteration_bounds = array<i64: 1>, scalar_prefetch = 0 : i64, scratch_operands = 0 : i64, tpu.core_type = #tpu.core_type<tc>, window_params = [{pipeline_mode = #tpu.pipeline_mode<synchronous>, transform_indices = @transform_0, window_bounds = array<i64: 6, 48, 192>}, {pipeline_mode = #tpu.pipeline_mode<synchronous>, transform_indices = @transform_1, window_bounds = array<i64: 192, 64>}, {pipeline_mode = #tpu.pipeline_mode<synchronous>, transform_indices = @transform_2, window_bounds = array<i64: 1, 64>}, {pipeline_mode = #tpu.pipeline_mode<synchronous>, transform_indices = @transform_3, window_bounds = array<i64: 48, 64>}]} {
    %c0 = arith.constant 0 : index
    %c0_0 = arith.constant 0 : index
    %0 = vector.load %arg2[%c0, %c0_0] : memref<192x64xf32, #tpu.memory_space<vmem>>, vector<192x64xf32>
    %c0_1 = arith.constant 0 : index
    %c0_2 = arith.constant 0 : index
    %c0_3 = arith.constant 0 : index
    %1 = vector.load %arg1[%c0_1, %c0_2, %c0_3] : memref<6x48x192xf32, #tpu.memory_space<vmem>>, vector<1x48x192xf32>
    %2 = vector.shape_cast %1 : vector<1x48x192xf32> to vector<48x192xf32>
    %cst = arith.constant dense<0.000000e+00> : vector<48x64xf32>
    %3 = tpu.matmul %2, %0, %cst {dimension_numbers = #tpu.dot_dimension_numbers<[1], [0], [0], [1], [0, 0, 1, 1], [], []>} : vector<48x192xf32>, vector<192x64xf32>, vector<48x64xf32> -> vector<48x64xf32>
    %c1 = arith.constant 1 : index
    %c0_4 = arith.constant 0 : index
    %c0_5 = arith.constant 0 : index
    %4 = vector.load %arg1[%c1, %c0_4, %c0_5] : memref<6x48x192xf32, #tpu.memory_space<vmem>>, vector<1x48x192xf32>
    %5 = vector.shape_cast %4 : vector<1x48x192xf32> to vector<48x192xf32>
    %cst_6 = arith.constant dense<0.000000e+00> : vector<48x64xf32>
    %6 = tpu.matmul %5, %0, %cst_6 {dimension_numbers = #tpu.dot_dimension_numbers<[1], [0], [0], [1], [0, 0, 1, 1], [], []>} : vector<48x192xf32>, vector<192x64xf32>, vector<48x64xf32> -> vector<48x64xf32>
    %7 = arith.maximumf %3, %6 : vector<48x64xf32>
    %c2 = arith.constant 2 : index
    %c0_7 = arith.constant 0 : index
    %c0_8 = arith.constant 0 : index
    %8 = vector.load %arg1[%c2, %c0_7, %c0_8] : memref<6x48x192xf32, #tpu.memory_space<vmem>>, vector<1x48x192xf32>
    %9 = vector.shape_cast %8 : vector<1x48x192xf32> to vector<48x192xf32>
    %cst_9 = arith.constant dense<0.000000e+00> : vector<48x64xf32>
    %10 = tpu.matmul %9, %0, %cst_9 {dimension_numbers = #tpu.dot_dimension_numbers<[1], [0], [0], [1], [0, 0, 1, 1], [], []>} : vector<48x192xf32>, vector<192x64xf32>, vector<48x64xf32> -> vector<48x64xf32>
    %11 = arith.maximumf %7, %10 : vector<48x64xf32>
    %c3 = arith.constant 3 : index
    %c0_10 = arith.constant 0 : index
    %c0_11 = arith.constant 0 : index
    %12 = vector.load %arg1[%c3, %c0_10, %c0_11] : memref<6x48x192xf32, #tpu.memory_space<vmem>>, vector<1x48x192xf32>
    %13 = vector.shape_cast %12 : vector<1x48x192xf32> to vector<48x192xf32>
    %cst_12 = arith.constant dense<0.000000e+00> : vector<48x64xf32>
    %14 = tpu.matmul %13, %0, %cst_12 {dimension_numbers = #tpu.dot_dimension_numbers<[1], [0], [0], [1], [0, 0, 1, 1], [], []>} : vector<48x192xf32>, vector<192x64xf32>, vector<48x64xf32> -> vector<48x64xf32>
    %15 = arith.maximumf %11, %14 : vector<48x64xf32>
    %c4 = arith.constant 4 : index
    %c0_13 = arith.constant 0 : index
    %c0_14 = arith.constant 0 : index
    %16 = vector.load %arg1[%c4, %c0_13, %c0_14] : memref<6x48x192xf32, #tpu.memory_space<vmem>>, vector<1x48x192xf32>
    %17 = vector.shape_cast %16 : vector<1x48x192xf32> to vector<48x192xf32>
    %cst_15 = arith.constant dense<0.000000e+00> : vector<48x64xf32>
    %18 = tpu.matmul %17, %0, %cst_15 {dimension_numbers = #tpu.dot_dimension_numbers<[1], [0], [0], [1], [0, 0, 1, 1], [], []>} : vector<48x192xf32>, vector<192x64xf32>, vector<48x64xf32> -> vector<48x64xf32>
    %19 = arith.maximumf %15, %18 : vector<48x64xf32>
    %c5 = arith.constant 5 : index
    %c0_16 = arith.constant 0 : index
    %c0_17 = arith.constant 0 : index
    %20 = vector.load %arg1[%c5, %c0_16, %c0_17] : memref<6x48x192xf32, #tpu.memory_space<vmem>>, vector<1x48x192xf32>
    %21 = vector.shape_cast %20 : vector<1x48x192xf32> to vector<48x192xf32>
    %cst_18 = arith.constant dense<0.000000e+00> : vector<48x64xf32>
    %22 = tpu.matmul %21, %0, %cst_18 {dimension_numbers = #tpu.dot_dimension_numbers<[1], [0], [0], [1], [0, 0, 1, 1], [], []>} : vector<48x192xf32>, vector<192x64xf32>, vector<48x64xf32> -> vector<48x64xf32>
    %23 = arith.maximumf %19, %22 : vector<48x64xf32>
    %c0_19 = arith.constant 0 : index
    %c0_20 = arith.constant 0 : index
    %24 = vector.load %arg3[%c0_19, %c0_20] : memref<1x64xf32, #tpu.memory_space<vmem>>, vector<1x64xf32>
    %25 = vector.broadcast %24 : vector<1x64xf32> to vector<48x64xf32>
    %26 = arith.addf %23, %25 : vector<48x64xf32>
    %cst_21 = arith.constant 0.000000e+00 : f32
    %27 = vector.broadcast %cst_21 : f32 to vector<48x64xf32>
    %28 = arith.maximumf %26, %27 : vector<48x64xf32>
    %c0_22 = arith.constant 0 : index
    %c0_23 = arith.constant 0 : index
    %29 = vector.load %arg4[%c0_22, %c0_23] : memref<48x64xf32, #tpu.memory_space<vmem>>, vector<48x64xf32>
    tpu.vector_store %arg4[%c0_22, %c0_23], %28 {strides = array<i32>} : memref<48x64xf32, #tpu.memory_space<vmem>>, vector<48x64xf32>,
    return
  }
  func.func @transform_0(%arg0: i32) -> (i32, i32, i32) {
    %c0_i32 = arith.constant 0 : i32
    %c0_i32_0 = arith.constant 0 : i32
    %c0_i32_1 = arith.constant 0 : i32
    %c0_i32_2 = arith.constant 0 : i32
    return %c0_i32, %c0_i32_0, %c0_i32_1 : i32, i32, i32
  }
  func.func @transform_1(%arg0: i32) -> (i32, i32) {
    %c0_i32 = arith.constant 0 : i32
    %c0_i32_0 = arith.constant 0 : i32
    %c0_i32_1 = arith.constant 0 : i32
    return %c0_i32, %c0_i32_0 : i32, i32
  }
  func.func @transform_2(%arg0: i32) -> (i32, i32) {
    %c0_i32 = arith.constant 0 : i32
    %c0_i32_0 = arith.constant 0 : i32
    %c0_i32_1 = arith.constant 0 : i32
    return %c0_i32, %c0_i32_0 : i32, i32
  }
  func.func @transform_3(%arg0: i32) -> (i32, i32) {
    %c0_i32 = arith.constant 0 : i32
    %c0_i32_0 = arith.constant 0 : i32
    %c0_i32_1 = arith.constant 0 : i32
    return %c0_i32, %c0_i32_0 : i32, i32
  }
}

module attributes {stable_mosaic.version = 11 : i64} {
  func.func @_conv_pool_kernel(%arg0: i32, %arg1: memref<6x4x384xf32, #tpu.memory_space<vmem>>, %arg2: memref<384x96xf32, #tpu.memory_space<vmem>>, %arg3: memref<1x96xf32, #tpu.memory_space<vmem>>, %arg4: memref<4x96xf32, #tpu.memory_space<vmem>>) attributes {dimension_semantics = [#tpu.dimension_semantics<arbitrary>], iteration_bounds = array<i64: 1>, scalar_prefetch = 0 : i64, scratch_operands = 0 : i64, tpu.core_type = #tpu.core_type<tc>, window_params = [{pipeline_mode = #tpu.pipeline_mode<synchronous>, transform_indices = @transform_0, window_bounds = array<i64: 6, 4, 384>}, {pipeline_mode = #tpu.pipeline_mode<synchronous>, transform_indices = @transform_1, window_bounds = array<i64: 384, 96>}, {pipeline_mode = #tpu.pipeline_mode<synchronous>, transform_indices = @transform_2, window_bounds = array<i64: 1, 96>}, {pipeline_mode = #tpu.pipeline_mode<synchronous>, transform_indices = @transform_3, window_bounds = array<i64: 4, 96>}]} {
    %c0 = arith.constant 0 : index
    %c0_0 = arith.constant 0 : index
    %0 = vector.load %arg2[%c0, %c0_0] : memref<384x96xf32, #tpu.memory_space<vmem>>, vector<384x96xf32>
    %c0_1 = arith.constant 0 : index
    %c0_2 = arith.constant 0 : index
    %c0_3 = arith.constant 0 : index
    %1 = vector.load %arg1[%c0_1, %c0_2, %c0_3] : memref<6x4x384xf32, #tpu.memory_space<vmem>>, vector<1x4x384xf32>
    %2 = vector.shape_cast %1 : vector<1x4x384xf32> to vector<4x384xf32>
    %cst = arith.constant dense<0.000000e+00> : vector<4x96xf32>
    %3 = tpu.matmul %2, %0, %cst {dimension_numbers = #tpu.dot_dimension_numbers<[1], [0], [0], [1], [0, 0, 1, 1], [], []>} : vector<4x384xf32>, vector<384x96xf32>, vector<4x96xf32> -> vector<4x96xf32>
    %c1 = arith.constant 1 : index
    %c0_4 = arith.constant 0 : index
    %c0_5 = arith.constant 0 : index
    %4 = vector.load %arg1[%c1, %c0_4, %c0_5] : memref<6x4x384xf32, #tpu.memory_space<vmem>>, vector<1x4x384xf32>
    %5 = vector.shape_cast %4 : vector<1x4x384xf32> to vector<4x384xf32>
    %cst_6 = arith.constant dense<0.000000e+00> : vector<4x96xf32>
    %6 = tpu.matmul %5, %0, %cst_6 {dimension_numbers = #tpu.dot_dimension_numbers<[1], [0], [0], [1], [0, 0, 1, 1], [], []>} : vector<4x384xf32>, vector<384x96xf32>, vector<4x96xf32> -> vector<4x96xf32>
    %7 = arith.maximumf %3, %6 : vector<4x96xf32>
    %c2 = arith.constant 2 : index
    %c0_7 = arith.constant 0 : index
    %c0_8 = arith.constant 0 : index
    %8 = vector.load %arg1[%c2, %c0_7, %c0_8] : memref<6x4x384xf32, #tpu.memory_space<vmem>>, vector<1x4x384xf32>
    %9 = vector.shape_cast %8 : vector<1x4x384xf32> to vector<4x384xf32>
    %cst_9 = arith.constant dense<0.000000e+00> : vector<4x96xf32>
    %10 = tpu.matmul %9, %0, %cst_9 {dimension_numbers = #tpu.dot_dimension_numbers<[1], [0], [0], [1], [0, 0, 1, 1], [], []>} : vector<4x384xf32>, vector<384x96xf32>, vector<4x96xf32> -> vector<4x96xf32>
    %11 = arith.maximumf %7, %10 : vector<4x96xf32>
    %c3 = arith.constant 3 : index
    %c0_10 = arith.constant 0 : index
    %c0_11 = arith.constant 0 : index
    %12 = vector.load %arg1[%c3, %c0_10, %c0_11] : memref<6x4x384xf32, #tpu.memory_space<vmem>>, vector<1x4x384xf32>
    %13 = vector.shape_cast %12 : vector<1x4x384xf32> to vector<4x384xf32>
    %cst_12 = arith.constant dense<0.000000e+00> : vector<4x96xf32>
    %14 = tpu.matmul %13, %0, %cst_12 {dimension_numbers = #tpu.dot_dimension_numbers<[1], [0], [0], [1], [0, 0, 1, 1], [], []>} : vector<4x384xf32>, vector<384x96xf32>, vector<4x96xf32> -> vector<4x96xf32>
    %15 = arith.maximumf %11, %14 : vector<4x96xf32>
    %c4 = arith.constant 4 : index
    %c0_13 = arith.constant 0 : index
    %c0_14 = arith.constant 0 : index
    %16 = vector.load %arg1[%c4, %c0_13, %c0_14] : memref<6x4x384xf32, #tpu.memory_space<vmem>>, vector<1x4x384xf32>
    %17 = vector.shape_cast %16 : vector<1x4x384xf32> to vector<4x384xf32>
    %cst_15 = arith.constant dense<0.000000e+00> : vector<4x96xf32>
    %18 = tpu.matmul %17, %0, %cst_15 {dimension_numbers = #tpu.dot_dimension_numbers<[1], [0], [0], [1], [0, 0, 1, 1], [], []>} : vector<4x384xf32>, vector<384x96xf32>, vector<4x96xf32> -> vector<4x96xf32>
    %19 = arith.maximumf %15, %18 : vector<4x96xf32>
    %c5 = arith.constant 5 : index
    %c0_16 = arith.constant 0 : index
    %c0_17 = arith.constant 0 : index
    %20 = vector.load %arg1[%c5, %c0_16, %c0_17] : memref<6x4x384xf32, #tpu.memory_space<vmem>>, vector<1x4x384xf32>
    %21 = vector.shape_cast %20 : vector<1x4x384xf32> to vector<4x384xf32>
    %cst_18 = arith.constant dense<0.000000e+00> : vector<4x96xf32>
    %22 = tpu.matmul %21, %0, %cst_18 {dimension_numbers = #tpu.dot_dimension_numbers<[1], [0], [0], [1], [0, 0, 1, 1], [], []>} : vector<4x384xf32>, vector<384x96xf32>, vector<4x96xf32> -> vector<4x96xf32>
    %23 = arith.maximumf %19, %22 : vector<4x96xf32>
    %c0_19 = arith.constant 0 : index
    %c0_20 = arith.constant 0 : index
    %24 = vector.load %arg3[%c0_19, %c0_20] : memref<1x96xf32, #tpu.memory_space<vmem>>, vector<1x96xf32>
    %25 = vector.broadcast %24 : vector<1x96xf32> to vector<4x96xf32>
    %26 = arith.addf %23, %25 : vector<4x96xf32>
    %cst_21 = arith.constant 0.000000e+00 : f32
    %27 = vector.broadcast %cst_21 : f32 to vector<4x96xf32>
    %28 = arith.maximumf %26, %27 : vector<4x96xf32>
    %c0_22 = arith.constant 0 : index
    %c0_23 = arith.constant 0 : index
    %29 = vector.load %arg4[%c0_22, %c0_23] : memref<4x96xf32, #tpu.memory_space<vmem>>, vector<4x96xf32>
    tpu.vector_store %arg4[%c0_22, %c0_23], %28 {strides = array<i32>} : memref<4x96xf32, #tpu.memory_space<vmem>>, vector<4x96xf32>,
    return
  }
  func.func @transform_0(%arg0: i32) -> (i32, i32, i32) {
    %c0_i32 = arith.constant 0 : i32
    %c0_i32_0 = arith.constant 0 : i32
    %c0_i32_1 = arith.constant 0 : i32
    %c0_i32_2 = arith.constant 0 : i32
    return %c0_i32, %c0_i32_0, %c0_i32_1 : i32, i32, i32
  }
  func.func @transform_1(%arg0: i32) -> (i32, i32) {
    %c0_i32 = arith.constant 0 : i32
    %c0_i32_0 = arith.constant 0 : i32
    %c0_i32_1 = arith.constant 0 : i32
    return %c0_i32, %c0_i32_0 : i32, i32
  }
  func.func @transform_2(%arg0: i32) -> (i32, i32) {
    %c0_i32 = arith.constant 0 : i32
    %c0_i32_0 = arith.constant 0 : i32
    %c0_i32_1 = arith.constant 0 : i32
    return %c0_i32, %c0_i32_0 : i32, i32
  }
  func.func @transform_3(%arg0: i32) -> (i32, i32) {
    %c0_i32 = arith.constant 0 : i32
    %c0_i32_0 = arith.constant 0 : i32
    %c0_i32_1 = arith.constant 0 : i32
    return %c0_i32, %c0_i32_0 : i32, i32
  }
}

module attributes {stable_mosaic.version = 11 : i64} {
  func.func @_lstm_dense_kernel(%arg0: i32, %arg1: memref<4x96xf32, #tpu.memory_space<vmem>>, %arg2: memref<96x128xf32, #tpu.memory_space<vmem>>, %arg3: memref<32x128xf32, #tpu.memory_space<vmem>>, %arg4: memref<1x128xf32, #tpu.memory_space<vmem>>, %arg5: memref<32x128xf32, #tpu.memory_space<vmem>>, %arg6: memref<32x128xf32, #tpu.memory_space<vmem>>, %arg7: memref<1x128xf32, #tpu.memory_space<vmem>>, %arg8: memref<32x120xf32, #tpu.memory_space<vmem>>, %arg9: memref<1x120xf32, #tpu.memory_space<vmem>>, %arg10: memref<120x4xf32, #tpu.memory_space<vmem>>, %arg11: memref<1x4xf32, #tpu.memory_space<vmem>>, %arg12: memref<2x4xf32, #tpu.memory_space<vmem>>, %arg13: memref<4x32xf32, #tpu.memory_space<vmem>>) attributes {dimension_semantics = [#tpu.dimension_semantics<arbitrary>], iteration_bounds = array<i64: 1>, scalar_prefetch = 0 : i64, scratch_operands = 1 : i64, tpu.core_type = #tpu.core_type<tc>, window_params = [{pipeline_mode = #tpu.pipeline_mode<synchronous>, transform_indices = @transform_0, window_bounds = array<i64: 4, 96>}, {pipeline_mode = #tpu.pipeline_mode<synchronous>, transform_indices = @transform_1, window_bounds = array<i64: 96, 128>}, {pipeline_mode = #tpu.pipeline_mode<synchronous>, transform_indices = @transform_2, window_bounds = array<i64: 32, 128>}, {pipeline_mode = #tpu.pipeline_mode<synchronous>, transform_indices = @transform_3, window_bounds = array<i64: 1, 128>}, {pipeline_mode = #tpu.pipeline_mode<synchronous>, transform_indices = @transform_4, window_bounds = array<i64: 32, 128>}, {pipeline_mode = #tpu.pipeline_mode<synchronous>, transform_indices = @transform_5, window_bounds = array<i64: 32, 128>}, {pipeline_mode = #tpu.pipeline_mode<synchronous>, transform_indices = @transform_6, window_bounds = array<i64: 1, 128>}, {pipeline_mode = #tpu.pipeline_mode<synchronous>, transform_indices = @transform_7, window_bounds = array<i64: 32, 120>}, {pipeline_mode = #tpu.pipeline_mode<synchronous>, transform_indices = @transform_8, window_bounds = array<i64: 1, 120>}, {pipeline_mode = #tpu.pipeline_mode<synchronous>, transform_indices = @transform_9, window_bounds = array<i64: 120, 4>}, {pipeline_mode = #tpu.pipeline_mode<synchronous>, transform_indices = @transform_10, window_bounds = array<i64: 1, 4>}, {pipeline_mode = #tpu.pipeline_mode<synchronous>, transform_indices = @transform_11, window_bounds = array<i64: 2, 4>}]} {
    %c0 = arith.constant 0 : index
    %c0_0 = arith.constant 0 : index
    %0 = vector.load %arg1[%c0, %c0_0] : memref<4x96xf32, #tpu.memory_space<vmem>>, vector<4x96xf32>
    %c0_1 = arith.constant 0 : index
    %c0_2 = arith.constant 0 : index
    %1 = vector.load %arg2[%c0_1, %c0_2] : memref<96x128xf32, #tpu.memory_space<vmem>>, vector<96x128xf32>
    %cst = arith.constant dense<0.000000e+00> : vector<4x128xf32>
    %2 = tpu.matmul %0, %1, %cst {dimension_numbers = #tpu.dot_dimension_numbers<[1], [0], [0], [1], [0, 0, 1, 1], [], []>} : vector<4x96xf32>, vector<96x128xf32>, vector<4x128xf32> -> vector<4x128xf32>
    %c0_3 = arith.constant 0 : index
    %c0_4 = arith.constant 0 : index
    %3 = vector.load %arg4[%c0_3, %c0_4] : memref<1x128xf32, #tpu.memory_space<vmem>>, vector<1x128xf32>
    %4 = vector.broadcast %3 : vector<1x128xf32> to vector<4x128xf32>
    %5 = arith.addf %2, %4 : vector<4x128xf32>
    %c0_5 = arith.constant 0 : index
    %c0_6 = arith.constant 0 : index
    %6 = vector.load %arg3[%c0_5, %c0_6] : memref<32x128xf32, #tpu.memory_space<vmem>>, vector<32x128xf32>
    %cst_7 = arith.constant 0.000000e+00 : f32
    %7 = vector.broadcast %cst_7 : f32 to vector<2x32xf32>
    %cst_8 = arith.constant 0.000000e+00 : f32
    %8 = vector.broadcast %cst_8 : f32 to vector<2x32xf32>
    %9 = vector.extract_strided_slice %5 {offsets = [0, 0], sizes = [2, 128], strides = [1, 1]} : vector<4x128xf32> to vector<2x128xf32>
    %cst_9 = arith.constant dense<0.000000e+00> : vector<2x128xf32>
    %10 = tpu.matmul %7, %6, %cst_9 {dimension_numbers = #tpu.dot_dimension_numbers<[1], [0], [0], [1], [0, 0, 1, 1], [], []>} : vector<2x32xf32>, vector<32x128xf32>, vector<2x128xf32> -> vector<2x128xf32>
    %11 = arith.addf %9, %10 : vector<2x128xf32>
    %12 = vector.extract_strided_slice %11 {offsets = [0, 0], sizes = [2, 32], strides = [1, 1]} : vector<2x128xf32> to vector<2x32xf32>
    %13 = arith.negf %12 : vector<2x32xf32>
    %14 = math.exp %13 : vector<2x32xf32>
    %cst_10 = arith.constant 1.000000e+00 : f32
    %15 = vector.broadcast %cst_10 : f32 to vector<2x32xf32>
    %16 = arith.addf %15, %14 : vector<2x32xf32>
    %17 = arith.divf %15, %16 : vector<2x32xf32>
    %18 = vector.extract_strided_slice %11 {offsets = [0, 32], sizes = [2, 32], strides = [1, 1]} : vector<2x128xf32> to vector<2x32xf32>
    %19 = arith.negf %18 : vector<2x32xf32>
    %20 = math.exp %19 : vector<2x32xf32>
    %cst_11 = arith.constant 1.000000e+00 : f32
    %21 = vector.broadcast %cst_11 : f32 to vector<2x32xf32>
    %22 = arith.addf %21, %20 : vector<2x32xf32>
    %23 = arith.divf %21, %22 : vector<2x32xf32>
    %24 = vector.extract_strided_slice %11 {offsets = [0, 64], sizes = [2, 32], strides = [1, 1]} : vector<2x128xf32> to vector<2x32xf32>
    %25 = math.tanh %24 : vector<2x32xf32>
    %26 = vector.extract_strided_slice %11 {offsets = [0, 96], sizes = [2, 32], strides = [1, 1]} : vector<2x128xf32> to vector<2x32xf32>
    %27 = arith.negf %26 : vector<2x32xf32>
    %28 = math.exp %27 : vector<2x32xf32>
    %cst_12 = arith.constant 1.000000e+00 : f32
    %29 = vector.broadcast %cst_12 : f32 to vector<2x32xf32>
    %30 = arith.addf %29, %28 : vector<2x32xf32>
    %31 = arith.divf %29, %30 : vector<2x32xf32>
    %32 = arith.mulf %23, %8 : vector<2x32xf32>
    %33 = arith.mulf %17, %25 : vector<2x32xf32>
    %34 = arith.addf %32, %33 : vector<2x32xf32>
    %35 = math.tanh %34 : vector<2x32xf32>
    %36 = arith.mulf %31, %35 : vector<2x32xf32>
    %c0_13 = arith.constant 0 : index
    %c0_14 = arith.constant 0 : index
    %37 = vector.load %arg13[%c0_13, %c0_14] : memref<4x32xf32, #tpu.memory_space<vmem>>, vector<2x32xf32>
    tpu.vector_store %arg13[%c0_13, %c0_14], %36 {strides = array<i32>} : memref<4x32xf32, #tpu.memory_space<vmem>>, vector<2x32xf32>,
    %38 = vector.extract_strided_slice %5 {offsets = [2, 0], sizes = [2, 128], strides = [1, 1]} : vector<4x128xf32> to vector<2x128xf32>
    %cst_15 = arith.constant dense<0.000000e+00> : vector<2x128xf32>
    %39 = tpu.matmul %36, %6, %cst_15 {dimension_numbers = #tpu.dot_dimension_numbers<[1], [0], [0], [1], [0, 0, 1, 1], [], []>} : vector<2x32xf32>, vector<32x128xf32>, vector<2x128xf32> -> vector<2x128xf32>
    %40 = arith.addf %38, %39 : vector<2x128xf32>
    %41 = vector.extract_strided_slice %40 {offsets = [0, 0], sizes = [2, 32], strides = [1, 1]} : vector<2x128xf32> to vector<2x32xf32>
    %42 = arith.negf %41 : vector<2x32xf32>
    %43 = math.exp %42 : vector<2x32xf32>
    %cst_16 = arith.constant 1.000000e+00 : f32
    %44 = vector.broadcast %cst_16 : f32 to vector<2x32xf32>
    %45 = arith.addf %44, %43 : vector<2x32xf32>
    %46 = arith.divf %44, %45 : vector<2x32xf32>
    %47 = vector.extract_strided_slice %40 {offsets = [0, 32], sizes = [2, 32], strides = [1, 1]} : vector<2x128xf32> to vector<2x32xf32>
    %48 = arith.negf %47 : vector<2x32xf32>
    %49 = math.exp %48 : vector<2x32xf32>
    %cst_17 = arith.constant 1.000000e+00 : f32
    %50 = vector.broadcast %cst_17 : f32 to vector<2x32xf32>
    %51 = arith.addf %50, %49 : vector<2x32xf32>
    %52 = arith.divf %50, %51 : vector<2x32xf32>
    %53 = vector.extract_strided_slice %40 {offsets = [0, 64], sizes = [2, 32], strides = [1, 1]} : vector<2x128xf32> to vector<2x32xf32>
    %54 = math.tanh %53 : vector<2x32xf32>
    %55 = vector.extract_strided_slice %40 {offsets = [0, 96], sizes = [2, 32], strides = [1, 1]} : vector<2x128xf32> to vector<2x32xf32>
    %56 = arith.negf %55 : vector<2x32xf32>
    %57 = math.exp %56 : vector<2x32xf32>
    %cst_18 = arith.constant 1.000000e+00 : f32
    %58 = vector.broadcast %cst_18 : f32 to vector<2x32xf32>
    %59 = arith.addf %58, %57 : vector<2x32xf32>
    %60 = arith.divf %58, %59 : vector<2x32xf32>
    %61 = arith.mulf %52, %34 : vector<2x32xf32>
    %62 = arith.mulf %46, %54 : vector<2x32xf32>
    %63 = arith.addf %61, %62 : vector<2x32xf32>
    %64 = math.tanh %63 : vector<2x32xf32>
    %65 = arith.mulf %60, %64 : vector<2x32xf32>
    %c2 = arith.constant 2 : index
    %c0_19 = arith.constant 0 : index
    %66 = vector.load %arg13[%c2, %c0_19] : memref<4x32xf32, #tpu.memory_space<vmem>>, vector<2x32xf32>
    tpu.vector_store %arg13[%c2, %c0_19], %65 {strides = array<i32>} : memref<4x32xf32, #tpu.memory_space<vmem>>, vector<2x32xf32>,
    %c0_20 = arith.constant 0 : index
    %c0_21 = arith.constant 0 : index
    %67 = vector.load %arg13[%c0_20, %c0_21] : memref<4x32xf32, #tpu.memory_space<vmem>>, vector<4x32xf32>
    %c0_22 = arith.constant 0 : index
    %c0_23 = arith.constant 0 : index
    %68 = vector.load %arg5[%c0_22, %c0_23] : memref<32x128xf32, #tpu.memory_space<vmem>>, vector<32x128xf32>
    %cst_24 = arith.constant dense<0.000000e+00> : vector<4x128xf32>
    %69 = tpu.matmul %67, %68, %cst_24 {dimension_numbers = #tpu.dot_dimension_numbers<[1], [0], [0], [1], [0, 0, 1, 1], [], []>} : vector<4x32xf32>, vector<32x128xf32>, vector<4x128xf32> -> vector<4x128xf32>
    %c0_25 = arith.constant 0 : index
    %c0_26 = arith.constant 0 : index
    %70 = vector.load %arg7[%c0_25, %c0_26] : memref<1x128xf32, #tpu.memory_space<vmem>>, vector<1x128xf32>
    %71 = vector.broadcast %70 : vector<1x128xf32> to vector<4x128xf32>
    %72 = arith.addf %69, %71 : vector<4x128xf32>
    %c0_27 = arith.constant 0 : index
    %c0_28 = arith.constant 0 : index
    %73 = vector.load %arg6[%c0_27, %c0_28] : memref<32x128xf32, #tpu.memory_space<vmem>>, vector<32x128xf32>
    %cst_29 = arith.constant 0.000000e+00 : f32
    %74 = vector.broadcast %cst_29 : f32 to vector<2x32xf32>
    %cst_30 = arith.constant 0.000000e+00 : f32
    %75 = vector.broadcast %cst_30 : f32 to vector<2x32xf32>
    %76 = vector.extract_strided_slice %72 {offsets = [0, 0], sizes = [2, 128], strides = [1, 1]} : vector<4x128xf32> to vector<2x128xf32>
    %cst_31 = arith.constant dense<0.000000e+00> : vector<2x128xf32>
    %77 = tpu.matmul %74, %73, %cst_31 {dimension_numbers = #tpu.dot_dimension_numbers<[1], [0], [0], [1], [0, 0, 1, 1], [], []>} : vector<2x32xf32>, vector<32x128xf32>, vector<2x128xf32> -> vector<2x128xf32>
    %78 = arith.addf %76, %77 : vector<2x128xf32>
    %79 = vector.extract_strided_slice %78 {offsets = [0, 0], sizes = [2, 32], strides = [1, 1]} : vector<2x128xf32> to vector<2x32xf32>
    %80 = arith.negf %79 : vector<2x32xf32>
    %81 = math.exp %80 : vector<2x32xf32>
    %cst_32 = arith.constant 1.000000e+00 : f32
    %82 = vector.broadcast %cst_32 : f32 to vector<2x32xf32>
    %83 = arith.addf %82, %81 : vector<2x32xf32>
    %84 = arith.divf %82, %83 : vector<2x32xf32>
    %85 = vector.extract_strided_slice %78 {offsets = [0, 32], sizes = [2, 32], strides = [1, 1]} : vector<2x128xf32> to vector<2x32xf32>
    %86 = arith.negf %85 : vector<2x32xf32>
    %87 = math.exp %86 : vector<2x32xf32>
    %cst_33 = arith.constant 1.000000e+00 : f32
    %88 = vector.broadcast %cst_33 : f32 to vector<2x32xf32>
    %89 = arith.addf %88, %87 : vector<2x32xf32>
    %90 = arith.divf %88, %89 : vector<2x32xf32>
    %91 = vector.extract_strided_slice %78 {offsets = [0, 64], sizes = [2, 32], strides = [1, 1]} : vector<2x128xf32> to vector<2x32xf32>
    %92 = math.tanh %91 : vector<2x32xf32>
    %93 = vector.extract_strided_slice %78 {offsets = [0, 96], sizes = [2, 32], strides = [1, 1]} : vector<2x128xf32> to vector<2x32xf32>
    %94 = arith.negf %93 : vector<2x32xf32>
    %95 = math.exp %94 : vector<2x32xf32>
    %cst_34 = arith.constant 1.000000e+00 : f32
    %96 = vector.broadcast %cst_34 : f32 to vector<2x32xf32>
    %97 = arith.addf %96, %95 : vector<2x32xf32>
    %98 = arith.divf %96, %97 : vector<2x32xf32>
    %99 = arith.mulf %90, %75 : vector<2x32xf32>
    %100 = arith.mulf %84, %92 : vector<2x32xf32>
    %101 = arith.addf %99, %100 : vector<2x32xf32>
    %102 = math.tanh %101 : vector<2x32xf32>
    %103 = arith.mulf %98, %102 : vector<2x32xf32>
    %104 = vector.extract_strided_slice %72 {offsets = [2, 0], sizes = [2, 128], strides = [1, 1]} : vector<4x128xf32> to vector<2x128xf32>
    %cst_35 = arith.constant dense<0.000000e+00> : vector<2x128xf32>
    %105 = tpu.matmul %103, %73, %cst_35 {dimension_numbers = #tpu.dot_dimension_numbers<[1], [0], [0], [1], [0, 0, 1, 1], [], []>} : vector<2x32xf32>, vector<32x128xf32>, vector<2x128xf32> -> vector<2x128xf32>
    %106 = arith.addf %104, %105 : vector<2x128xf32>
    %107 = vector.extract_strided_slice %106 {offsets = [0, 0], sizes = [2, 32], strides = [1, 1]} : vector<2x128xf32> to vector<2x32xf32>
    %108 = arith.negf %107 : vector<2x32xf32>
    %109 = math.exp %108 : vector<2x32xf32>
    %cst_36 = arith.constant 1.000000e+00 : f32
    %110 = vector.broadcast %cst_36 : f32 to vector<2x32xf32>
    %111 = arith.addf %110, %109 : vector<2x32xf32>
    %112 = arith.divf %110, %111 : vector<2x32xf32>
    %113 = vector.extract_strided_slice %106 {offsets = [0, 32], sizes = [2, 32], strides = [1, 1]} : vector<2x128xf32> to vector<2x32xf32>
    %114 = arith.negf %113 : vector<2x32xf32>
    %115 = math.exp %114 : vector<2x32xf32>
    %cst_37 = arith.constant 1.000000e+00 : f32
    %116 = vector.broadcast %cst_37 : f32 to vector<2x32xf32>
    %117 = arith.addf %116, %115 : vector<2x32xf32>
    %118 = arith.divf %116, %117 : vector<2x32xf32>
    %119 = vector.extract_strided_slice %106 {offsets = [0, 64], sizes = [2, 32], strides = [1, 1]} : vector<2x128xf32> to vector<2x32xf32>
    %120 = math.tanh %119 : vector<2x32xf32>
    %121 = vector.extract_strided_slice %106 {offsets = [0, 96], sizes = [2, 32], strides = [1, 1]} : vector<2x128xf32> to vector<2x32xf32>
    %122 = arith.negf %121 : vector<2x32xf32>
    %123 = math.exp %122 : vector<2x32xf32>
    %cst_38 = arith.constant 1.000000e+00 : f32
    %124 = vector.broadcast %cst_38 : f32 to vector<2x32xf32>
    %125 = arith.addf %124, %123 : vector<2x32xf32>
    %126 = arith.divf %124, %125 : vector<2x32xf32>
    %127 = arith.mulf %118, %101 : vector<2x32xf32>
    %128 = arith.mulf %112, %120 : vector<2x32xf32>
    %129 = arith.addf %127, %128 : vector<2x32xf32>
    %130 = math.tanh %129 : vector<2x32xf32>
    %131 = arith.mulf %126, %130 : vector<2x32xf32>
    %c0_39 = arith.constant 0 : index
    %c0_40 = arith.constant 0 : index
    %132 = vector.load %arg8[%c0_39, %c0_40] : memref<32x120xf32, #tpu.memory_space<vmem>>, vector<32x120xf32>
    %cst_41 = arith.constant dense<0.000000e+00> : vector<2x120xf32>
    %133 = tpu.matmul %131, %132, %cst_41 {dimension_numbers = #tpu.dot_dimension_numbers<[1], [0], [0], [1], [0, 0, 1, 1], [], []>} : vector<2x32xf32>, vector<32x120xf32>, vector<2x120xf32> -> vector<2x120xf32>
    %c0_42 = arith.constant 0 : index
    %c0_43 = arith.constant 0 : index
    %134 = vector.load %arg9[%c0_42, %c0_43] : memref<1x120xf32, #tpu.memory_space<vmem>>, vector<1x120xf32>
    %135 = vector.broadcast %134 : vector<1x120xf32> to vector<2x120xf32>
    %136 = arith.addf %133, %135 : vector<2x120xf32>
    %cst_44 = arith.constant 0.000000e+00 : f32
    %137 = vector.broadcast %cst_44 : f32 to vector<2x120xf32>
    %138 = arith.maximumf %136, %137 : vector<2x120xf32>
    %c0_45 = arith.constant 0 : index
    %c0_46 = arith.constant 0 : index
    %139 = vector.load %arg10[%c0_45, %c0_46] : memref<120x4xf32, #tpu.memory_space<vmem>>, vector<120x4xf32>
    %cst_47 = arith.constant dense<0.000000e+00> : vector<2x4xf32>
    %140 = tpu.matmul %138, %139, %cst_47 {dimension_numbers = #tpu.dot_dimension_numbers<[1], [0], [0], [1], [0, 0, 1, 1], [], []>} : vector<2x120xf32>, vector<120x4xf32>, vector<2x4xf32> -> vector<2x4xf32>
    %c0_48 = arith.constant 0 : index
    %c0_49 = arith.constant 0 : index
    %141 = vector.load %arg11[%c0_48, %c0_49] : memref<1x4xf32, #tpu.memory_space<vmem>>, vector<1x4xf32>
    %142 = vector.broadcast %141 : vector<1x4xf32> to vector<2x4xf32>
    %143 = arith.addf %140, %142 : vector<2x4xf32>
    %c0_50 = arith.constant 0 : index
    %c0_51 = arith.constant 0 : index
    %144 = vector.load %arg12[%c0_50, %c0_51] : memref<2x4xf32, #tpu.memory_space<vmem>>, vector<2x4xf32>
    tpu.vector_store %arg12[%c0_50, %c0_51], %143 {strides = array<i32>} : memref<2x4xf32, #tpu.memory_space<vmem>>, vector<2x4xf32>,
    return
  }
  func.func @transform_0(%arg0: i32) -> (i32, i32) {
    %c0_i32 = arith.constant 0 : i32
    %c0_i32_0 = arith.constant 0 : i32
    %c0_i32_1 = arith.constant 0 : i32
    return %c0_i32, %c0_i32_0 : i32, i32
  }
  func.func @transform_1(%arg0: i32) -> (i32, i32) {
    %c0_i32 = arith.constant 0 : i32
    %c0_i32_0 = arith.constant 0 : i32
    %c0_i32_1 = arith.constant 0 : i32
    return %c0_i32, %c0_i32_0 : i32, i32
  }
  func.func @transform_2(%arg0: i32) -> (i32, i32) {
    %c0_i32 = arith.constant 0 : i32
    %c0_i32_0 = arith.constant 0 : i32
    %c0_i32_1 = arith.constant 0 : i32
    return %c0_i32, %c0_i32_0 : i32, i32
  }
  func.func @transform_3(%arg0: i32) -> (i32, i32) {
    %c0_i32 = arith.constant 0 : i32
    %c0_i32_0 = arith.constant 0 : i32
    %c0_i32_1 = arith.constant 0 : i32
    return %c0_i32, %c0_i32_0 : i32, i32
  }
  func.func @transform_4(%arg0: i32) -> (i32, i32) {
    %c0_i32 = arith.constant 0 : i32
    %c0_i32_0 = arith.constant 0 : i32
    %c0_i32_1 = arith.constant 0 : i32
    return %c0_i32, %c0_i32_0 : i32, i32
  }
  func.func @transform_5(%arg0: i32) -> (i32, i32) {
    %c0_i32 = arith.constant 0 : i32
    %c0_i32_0 = arith.constant 0 : i32
    %c0_i32_1 = arith.constant 0 : i32
    return %c0_i32, %c0_i32_0 : i32, i32
  }
  func.func @transform_6(%arg0: i32) -> (i32, i32) {
    %c0_i32 = arith.constant 0 : i32
    %c0_i32_0 = arith.constant 0 : i32
    %c0_i32_1 = arith.constant 0 : i32
    return %c0_i32, %c0_i32_0 : i32, i32
  }
  func.func @transform_7(%arg0: i32) -> (i32, i32) {
    %c0_i32 = arith.constant 0 : i32
    %c0_i32_0 = arith.constant 0 : i32
    %c0_i32_1 = arith.constant 0 : i32
    return %c0_i32, %c0_i32_0 : i32, i32
  }
  func.func @transform_8(%arg0: i32) -> (i32, i32) {
    %c0_i32 = arith.constant 0 : i32
    %c0_i32_0 = arith.constant 0 : i32
    %c0_i32_1 = arith.constant 0 : i32
    return %c0_i32, %c0_i32_0 : i32, i32
  }
  func.func @transform_9(%arg0: i32) -> (i32, i32) {
    %c0_i32 = arith.constant 0 : i32
    %c0_i32_0 = arith.constant 0 : i32
    %c0_i32_1 = arith.constant 0 : i32
    return %c0_i32, %c0_i32_0 : i32, i32
  }
  func.func @transform_10(%arg0: i32) -> (i32, i32) {
    %c0_i32 = arith.constant 0 : i32
    %c0_i32_0 = arith.constant 0 : i32
    %c0_i32_1 = arith.constant 0 : i32
    return %c0_i32, %c0_i32_0 : i32, i32
  }
  func.func @transform_11(%arg0: i32) -> (i32, i32) {
    %c0_i32 = arith.constant 0 : i32
    %c0_i32_0 = arith.constant 0 : i32
    %c0_i32_1 = arith.constant 0 : i32
    return %c0_i32, %c0_i32_0 : i32, i32
  }
}

</mosaic_0001>

<bundles_post_ra>
// kernel: _lambda_.4
= control target key start
LH: loop header
LB: loop body
LE: loop exit
PB: predicated region body
PF: predicated region fallthrough
CT: control target
= control target key end

     0   :  { %vm200_vm0 = vcmask 1045504   ;;  %vm61_vm1 = vcmask 48128   ;;  %vm3228_vm2 = vcmask 261120   ;;  %vm3274_vm3 = vcmask 257024   ;;  %s6716_s1 = inlined_call_operand.vmem [shape: f32[6,32], index: 1, kind: input, shape index: {}]   ;;  %s6717_s0 = inlined_call_operand.vmem [shape: f32[6,364,6], index: 0, kind: input, shape index: {}]   ;;  %s6718_s2 = inlined_call_operand.vmem [shape: f32[1,32], index: 2, kind: input, shape index: {}]   ;;  %s6719_s3 = inlined_call_operand.vmem [shape: f32[364,32], index: 3, kind: output, shape index: {}]  }
   0x1   :  { %v4524_v0 = vld [vmem:[%s6716_s1] sm:$0x3f]  ;;  %v3327_v2 = vld [vmem:[%s6717_s0 + $0x170] sm:$0xff]  ;;  %v16_v3 = vld [vmem:[%s6717_s0 + $0x8] sm:$0xff] }
   0x2   :  { %v15_v1 = vld [vmem:[%s6717_s0] sm:$0xff]  ;;  %4075 = vmatprep.subr.msk.mxu0 %vm200_vm0, %v4524_v0  ;;  %4146 = vmatprep.subr.msk.mxu1 %vm200_vm0, %v4524_v0  ;;  %v3328_v4 = vld [vmem:[%s6717_s0 + $0x178] sm:$0xff]  ;;  %v17_v5 = vld [vmem:[%s6717_s0 + $0x10] sm:$0xff] }
   0x3   :  { %4076 = vmatpush3.msk.msra.mxu0 %vm200_vm0, %v4524_v0  ;;  %4077 = vmatprep.mubr.msk.f32.mxu0 %vm61_vm1, %v15_v1  ;;  %v3329_v6 = vld [vmem:[%s6717_s0 + $0x180] sm:$0xff]  ;;  %v18_v7 = vld [vmem:[%s6717_s0 + $0x18] sm:$0xff]  ;;  %v3330_v8 = vld [vmem:[%s6717_s0 + $0x188] sm:$0xff] }
   0x4   :  { %4147 = vmatpush3.msk.msra.mxu1 %vm200_vm0, %v4524_v0  ;;  %4148 = vmatprep.mubr.msk.f32.mxu1 %vm61_vm1, %v3327_v2  ;;  %v19_v9 = vld [vmem:[%s6717_s0 + $0x20] sm:$0xff]  ;;  %v3331_v10 = vld [vmem:[%s6717_s0 + $0x190] sm:$0xff]  ;;  %v20_v11 = vld [vmem:[%s6717_s0 + $0x28] sm:$0xff] }
   0x5   :  { %4078 = vmatmul.mubr.msk.f32.vlgmr.msra.gmra.mrb[0].mxu0 %vm61_vm1, %v16_v3  ;;  %4149 = vmatmul.mubr.msk.f32.vlgmr.msra.gmra.mrb[0].mxu1 %vm61_vm1, %v3328_v4  ;;  %v3332_v12 = vld [vmem:[%s6717_s0 + $0x198] sm:$0xff]  ;;  %v21_v13 = vld [vmem:[%s6717_s0 + $0x30] sm:$0xff]  ;;  %v3333_v14 = vld [vmem:[%s6717_s0 + $0x1a0] sm:$0xff] }
   0x6   :  { %4217 = vmatprep.subr.msk.mxu0 %vm200_vm0, %v4524_v0  ;;  %4288 = vmatprep.subr.msk.mxu1 %vm200_vm0, %v4524_v0  ;;  %v22_v15 = vld [vmem:[%s6717_s0 + $0x38] sm:$0xff]  ;;  %v3334_v16 = vld [vmem:[%s6717_s0 + $0x1a8] sm:$0xff]  ;;  %v23_v17 = vld [vmem:[%s6717_s0 + $0x40] sm:$0xff] }
   0x7   :  { %4218 = vmatpush3.msk.msra.mxu0 %vm200_vm0, %v4524_v0  ;;  %4080 = vmatprep.mubr.msk.f32.mxu0 %vm61_vm1, %v17_v5  ;;  %v3335_v18 = vld [vmem:[%s6717_s0 + $0x1b0] sm:$0xff]  ;;  %v24_v19 = vld [vmem:[%s6717_s0 + $0x48] sm:$0xff]  ;;  %v3336_v20 = vld [vmem:[%s6717_s0 + $0x1b8] sm:$0xff] }
   0x8   :  { %4151 = vmatprep.mubr.msk.f32.mxu1 %vm61_vm1, %v3329_v6  ;;  %4289 = vmatpush3.msk.msra.mxu1 %vm200_vm0, %v4524_v0  ;;  %v25_v21 = vld [vmem:[%s6717_s0 + $0x50] sm:$0xff]  ;;  %v3337_v22 = vld [vmem:[%s6717_s0 + $0x1c0] sm:$0xff]  ;;  %v26_v23 = vld [vmem:[%s6717_s0 + $0x58] sm:$0xff] }
   0x9   :  { %4081 = vmatmul.mubr.msk.f32.gmra.mrb[2].mxu0 %vm61_vm1, %v18_v7  ;;  %4152 = vmatmul.mubr.msk.f32.gmra.mrb[2].mxu1 %vm61_vm1, %v3330_v8  ;;  %v3338_v24 = vld [vmem:[%s6717_s0 + $0x1c8] sm:$0xff]  ;;  %v27_v25 = vld [vmem:[%s6717_s0 + $0x60] sm:$0xff]  ;;  %v3339_v26 = vld [vmem:[%s6717_s0 + $0x1d0] sm:$0xff] }
   0xa   :  { %4083 = vmatprep.mubr.msk.f32.mxu0 %vm61_vm1, %v19_v9  ;;  %4154 = vmatprep.mubr.msk.f32.mxu1 %vm61_vm1, %v3331_v10  ;;  %v28_v27 = vld [vmem:[%s6717_s0 + $0x68] sm:$0xff]  ;;  %v3340_v28 = vld [vmem:[%s6717_s0 + $0x1d8] sm:$0xff]  ;;  %v29_v29 = vld [vmem:[%s6717_s0 + $0x70] sm:$0xff] }
   0xb   :  { %4359 = vmatprep.subr.msk.mxu0 %vm200_vm0, %v4524_v0  ;;  %4430 = vmatprep.subr.msk.mxu1 %vm200_vm0, %v4524_v0  ;;  %v3341_v30 = vld [vmem:[%s6717_s0 + $0x1e0] sm:$0xff]  ;;  %v30_v31 = vld [vmem:[%s6717_s0 + $0x78] sm:$0xff]  ;;  %v3342_v32 = vld [vmem:[%s6717_s0 + $0x1e8] sm:$0xff] }
   0xc   :  { %v31_v33 = vld [vmem:[%s6717_s0 + $0x80] sm:$0xff]  ;;  %v3343_v34 = vld [vmem:[%s6717_s0 + $0x1f0] sm:$0xff]  ;;  %v32_v35 = vld [vmem:[%s6717_s0 + $0x88] sm:$0xff] }
   0xd   :  { %4084 = vmatmul.mubr.msk.f32.gmra.mrb[4].mxu0 %vm61_vm1, %v20_v11  ;;  %4155 = vmatmul.mubr.msk.f32.gmra.mrb[4].mxu1 %vm61_vm1, %v3332_v12  ;;  %v3344_v36 = vld [vmem:[%s6717_s0 + $0x1f8] sm:$0xff]  ;;  %v33_v37 = vld [vmem:[%s6717_s0 + $0x90] sm:$0xff]  ;;  %v3345_v38 = vld [vmem:[%s6717_s0 + $0x200] sm:$0xff] }
   0xe   :  { %4086 = vmatprep.mubr.msk.f32.mxu0 %vm61_vm1, %v21_v13  ;;  %4157 = vmatprep.mubr.msk.f32.mxu1 %vm61_vm1, %v3333_v14  ;;  %v34_v39 = vld [vmem:[%s6717_s0 + $0x98] sm:$0xff]  ;;  %v3346_v40 = vld [vmem:[%s6717_s0 + $0x208] sm:$0xff]  ;;  %v35_v41 = vld [vmem:[%s6717_s0 + $0xa0] sm:$0xff] }
   0xf   :  { %v3347_v42 = vld [vmem:[%s6717_s0 + $0x210] sm:$0xff]  ;;  %v36_v43 = vld [vmem:[%s6717_s0 + $0xa8] sm:$0xff]  ;;  %v3348_v44 = vld [vmem:[%s6717_s0 + $0x218] sm:$0xff] }
  0x10   :  { %v37_v45 = vld [vmem:[%s6717_s0 + $0xb0] sm:$0xff]  ;;  %v3349_v46 = vld [vmem:[%s6717_s0 + $0x220] sm:$0xff]  ;;  %v38_v47 = vld [vmem:[%s6717_s0 + $0xb8] sm:$0xff] }
  0x11   :  { %4087 = vmatmul.mubr.msk.f32.gmra.mrb[6].mxu0 %vm61_vm1, %v22_v15  ;;  %4158 = vmatmul.mubr.msk.f32.gmra.mrb[6].mxu1 %vm61_vm1, %v3334_v16  ;;  %v3350_v48 = vld [vmem:[%s6717_s0 + $0x228] sm:$0xff]  ;;  %v39_v49 = vld [vmem:[%s6717_s0 + $0xc0] sm:$0xff]  ;;  %v3351_v50 = vld [vmem:[%s6717_s0 + $0x230] sm:$0xff] }
  0x12   :  { %4089 = vmatprep.mubr.msk.f32.mxu0 %vm61_vm1, %v23_v17  ;;  %4160 = vmatprep.mubr.msk.f32.mxu1 %vm61_vm1, %v3335_v18  ;;  %v40_v51 = vld [vmem:[%s6717_s0 + $0xc8] sm:$0xff]  ;;  %v3352_v52 = vld [vmem:[%s6717_s0 + $0x238] sm:$0xff]  ;;  %v41_v53 = vld [vmem:[%s6717_s0 + $0xd0] sm:$0xff] }
  0x13   :  { %v3353_v54 = vld [vmem:[%s6717_s0 + $0x240] sm:$0xff]  ;;  %v42_v55 = vld [vmem:[%s6717_s0 + $0xd8] sm:$0xff]  ;;  %v3354_v56 = vld [vmem:[%s6717_s0 + $0x248] sm:$0xff] }
  0x14   :  { %v43_v57 = vld [vmem:[%s6717_s0 + $0xe0] sm:$0xff]  ;;  %v3355_v58 = vld [vmem:[%s6717_s0 + $0x250] sm:$0xff]  ;;  %v44_v59 = vld [vmem:[%s6717_s0 + $0xe8] sm:$0xff] }
  0x15   :  { %4090 = vmatmul.mubr.msk.f32.gmra.mrb[8].mxu0 %vm61_vm1, %v24_v19  ;;  %4161 = vmatmul.mubr.msk.f32.gmra.mrb[8].mxu1 %vm61_vm1, %v3336_v20  ;;  %v3356_v60 = vld [vmem:[%s6717_s0 + $0x258] sm:$0xff]  ;;  %v45_v61 = vld [vmem:[%s6717_s0 + $0xf0] sm:$0xff]  ;;  %v3357_v62 = vld [vmem:[%s6717_s0 + $0x260] sm:$0xff] }
  0x16   :  { %4092 = vmatprep.mubr.msk.f32.mxu0 %vm61_vm1, %v25_v21  ;;  %4163 = vmatprep.mubr.msk.f32.mxu1 %vm61_vm1, %v3337_v22  ;;  %v46_v63 = vld [vmem:[%s6717_s0 + $0xf8] sm:$0xff]  ;;  %v3358_v1 = vld [vmem:[%s6717_s0 + $0x268] sm:$0xff]  ;;  %v47_v2 = vld [vmem:[%s6717_s0 + $0x100] sm:$0xff] }
  0x17   :  { %v3359_v3 = vld [vmem:[%s6717_s0 + $0x270] sm:$0xff]  ;;  %v48_v4 = vld [vmem:[%s6717_s0 + $0x108] sm:$0xff]  ;;  %v3360_v5 = vld [vmem:[%s6717_s0 + $0x278] sm:$0xff] }
  0x18   :  { %v49_v6 = vld [vmem:[%s6717_s0 + $0x110] sm:$0xff]  ;;  %v3361_v7 = vld [vmem:[%s6717_s0 + $0x280] sm:$0xff]  ;;  %v50_v8 = vld [vmem:[%s6717_s0 + $0x118] sm:$0xff] }
  0x19   :  { %4093 = vmatmul.mubr.msk.f32.gmra.mrb[10].mxu0 %vm61_vm1, %v26_v23  ;;  %4164 = vmatmul.mubr.msk.f32.gmra.mrb[10].mxu1 %vm61_vm1, %v3338_v24  ;;  %v3362_v9 = vld [vmem:[%s6717_s0 + $0x288] sm:$0xff]  ;;  %v51_v10 = vld [vmem:[%s6717_s0 + $0x120] sm:$0xff]  ;;  %v3363_v11 = vld [vmem:[%s6717_s0 + $0x290] sm:$0xff] }
  0x1a   :  { %4095 = vmatprep.mubr.msk.f32.mxu0 %vm61_vm1, %v27_v25  ;;  %4166 = vmatprep.mubr.msk.f32.mxu1 %vm61_vm1, %v3339_v26  ;;  %v52_v12 = vld [vmem:[%s6717_s0 + $0x128] sm:$0xff]  ;;  %v3364_v13 = vld [vmem:[%s6717_s0 + $0x298] sm:$0xff]  ;;  %v53_v14 = vld [vmem:[%s6717_s0 + $0x130] sm:$0xff] }
  0x1b   :  { %v3365_v15 = vld [vmem:[%s6717_s0 + $0x2a0] sm:$0xff]  ;;  %v54_v16 = vld [vmem:[%s6717_s0 + $0x138] sm:$0xff]  ;;  %v3366_v17 = vld [vmem:[%s6717_s0 + $0x2a8] sm:$0xff] }
  0x1c   :  { %v55_v18 = vld [vmem:[%s6717_s0 + $0x140] sm:$0xff]  ;;  %v3367_v19 = vld [vmem:[%s6717_s0 + $0x2b0] sm:$0xff]  ;;  %v56_v20 = vld [vmem:[%s6717_s0 + $0x148] sm:$0xff] }
  0x1d   :  { %4096 = vmatmul.mubr.msk.f32.gmra.mrb[12].mxu0 %vm61_vm1, %v28_v27  ;;  %4167 = vmatmul.mubr.msk.f32.gmra.mrb[12].mxu1 %vm61_vm1, %v3340_v28  ;;  %v3368_v21 = vld [vmem:[%s6717_s0 + $0x2b8] sm:$0xff]  ;;  %v57_v22 = vld [vmem:[%s6717_s0 + $0x150] sm:$0xff]  ;;  %v3369_v23 = vld [vmem:[%s6717_s0 + $0x2c0] sm:$0xff] }
  0x1e   :  { %4098 = vmatprep.mubr.msk.f32.mxu0 %vm61_vm1, %v29_v29  ;;  %4169 = vmatprep.mubr.msk.f32.mxu1 %vm61_vm1, %v3341_v30  ;;  %v58_v24 = vld [vmem:[%s6717_s0 + $0x158] sm:$0xff]  ;;  %v3370_v25 = vld [vmem:[%s6717_s0 + $0x2c8] sm:$0xff]  ;;  %v59_v26 = vld [vmem:[%s6717_s0 + $0x160] sm:$0xff] }
  0x1f   :  { %v3371_v27 = vld [vmem:[%s6717_s0 + $0x2d0] sm:$0xff]  ;;  %v60_v28 = vld [vmem:[%s6717_s0 + $0x168] sm:$0xf]  ;;  %v3372_v29 = vld [vmem:[%s6717_s0 + $0x2d8] sm:$0xf] }
  0x20   :  { %v3420_v30 = vld [vmem:[%s6717_s0 + $0x2e0] sm:$0xff] }
  0x21   :  { %4099 = vmatmul.mubr.msk.f32.gmra.mrb[14].mxu0 %vm61_vm1, %v30_v31  ;;  %4170 = vmatmul.mubr.msk.f32.gmra.mrb[14].mxu1 %vm61_vm1, %v3342_v32  ;;  %v3513_v31 = vld [vmem:[%s6717_s0 + $0x450] sm:$0xff]  ;;  %v3421_v32 = vld [vmem:[%s6717_s0 + $0x2e8] sm:$0xff] }
  0x22   :  { %4101 = vmatprep.mubr.msk.f32.mxu0 %vm61_vm1, %v31_v33  ;;  %4172 = vmatprep.mubr.msk.f32.mxu1 %vm61_vm1, %v3343_v34  ;;  %v3514_v33 = vld [vmem:[%s6717_s0 + $0x458] sm:$0xff]  ;;  %v3422_v34 = vld [vmem:[%s6717_s0 + $0x2f0] sm:$0xff] }
  0x25   :  { %4102 = vmatmul.mubr.msk.f32.gmra.mrb[16].mxu0 %vm61_vm1, %v32_v35  ;;  %4173 = vmatmul.mubr.msk.f32.gmra.mrb[16].mxu1 %vm61_vm1, %v3344_v36  ;;  %v3515_v35 = vld [vmem:[%s6717_s0 + $0x460] sm:$0xff]  ;;  %v3423_v36 = vld [vmem:[%s6717_s0 + $0x2f8] sm:$0xff] }
  0x26   :  { %4104 = vmatprep.mubr.msk.f32.mxu0 %vm61_vm1, %v33_v37  ;;  %4175 = vmatprep.mubr.msk.f32.mxu1 %vm61_vm1, %v3345_v38  ;;  %v3516_v37 = vld [vmem:[%s6717_s0 + $0x468] sm:$0xff]  ;;  %v3424_v38 = vld [vmem:[%s6717_s0 + $0x300] sm:$0xff] }
  0x29   :  { %4105 = vmatmul.mubr.msk.f32.gmra.mrb[18].mxu0 %vm61_vm1, %v34_v39  ;;  %4176 = vmatmul.mubr.msk.f32.gmra.mrb[18].mxu1 %vm61_vm1, %v3346_v40  ;;  %v3517_v39 = vld [vmem:[%s6717_s0 + $0x470] sm:$0xff]  ;;  %v3518_v40 = vld [vmem:[%s6717_s0 + $0x478] sm:$0xff] }
  0x2a   :  { %4107 = vmatprep.mubr.msk.f32.mxu0 %vm61_vm1, %v35_v41  ;;  %4178 = vmatprep.mubr.msk.f32.mxu1 %vm61_vm1, %v3347_v42  ;;  %v3426_v41 = vld [vmem:[%s6717_s0 + $0x310] sm:$0xff]  ;;  %v3519_v42 = vld [vmem:[%s6717_s0 + $0x480] sm:$0xff] }
  0x2d   :  { %4108 = vmatmul.mubr.msk.f32.gmra.mrb[20].mxu0 %vm61_vm1, %v36_v43  ;;  %4179 = vmatmul.mubr.msk.f32.gmra.mrb[20].mxu1 %vm61_vm1, %v3348_v44  ;;  %v3427_v43 = vld [vmem:[%s6717_s0 + $0x318] sm:$0xff]  ;;  %v3520_v44 = vld [vmem:[%s6717_s0 + $0x488] sm:$0xff] }
  0x2e   :  { %4110 = vmatprep.mubr.msk.f32.mxu0 %vm61_vm1, %v37_v45  ;;  %4181 = vmatprep.mubr.msk.f32.mxu1 %vm61_vm1, %v3349_v46  ;;  %v3428_v45 = vld [vmem:[%s6717_s0 + $0x320] sm:$0xff]  ;;  %v3521_v46 = vld [vmem:[%s6717_s0 + $0x490] sm:$0xff] }
  0x31   :  { %4111 = vmatmul.mubr.msk.f32.gmra.mrb[22].mxu0 %vm61_vm1, %v38_v47  ;;  %4182 = vmatmul.mubr.msk.f32.gmra.mrb[22].mxu1 %vm61_vm1, %v3350_v48  ;;  %v3429_v47 = vld [vmem:[%s6717_s0 + $0x328] sm:$0xff]  ;;  %v3522_v48 = vld [vmem:[%s6717_s0 + $0x498] sm:$0xff] }
  0x32   :  { %4113 = vmatprep.mubr.msk.f32.mxu0 %vm61_vm1, %v39_v49  ;;  %4184 = vmatprep.mubr.msk.f32.mxu1 %vm61_vm1, %v3351_v50  ;;  %v3430_v49 = vld [vmem:[%s6717_s0 + $0x330] sm:$0xff]  ;;  %v3523_v50 = vld [vmem:[%s6717_s0 + $0x4a0] sm:$0xff] }
  0x35   :  { %4114 = vmatmul.mubr.msk.f32.gmra.mrb[24].mxu0 %vm61_vm1, %v40_v51  ;;  %4185 = vmatmul.mubr.msk.f32.gmra.mrb[24].mxu1 %vm61_vm1, %v3352_v52  ;;  %v3431_v51 = vld [vmem:[%s6717_s0 + $0x338] sm:$0xff]  ;;  %v3524_v52 = vld [vmem:[%s6717_s0 + $0x4a8] sm:$0xff] }
  0x36   :  { %4116 = vmatprep.mubr.msk.f32.mxu0 %vm61_vm1, %v41_v53  ;;  %4187 = vmatprep.mubr.msk.f32.mxu1 %vm61_vm1, %v3353_v54  ;;  %v3432_v53 = vld [vmem:[%s6717_s0 + $0x340] sm:$0xff]  ;;  %v3525_v54 = vld [vmem:[%s6717_s0 + $0x4b0] sm:$0xff] }
  0x39   :  { %4117 = vmatmul.mubr.msk.f32.gmra.mrb[26].mxu0 %vm61_vm1, %v42_v55  ;;  %4188 = vmatmul.mubr.msk.f32.gmra.mrb[26].mxu1 %vm61_vm1, %v3354_v56  ;;  %v3433_v55 = vld [vmem:[%s6717_s0 + $0x348] sm:$0xff]  ;;  %v3526_v56 = vld [vmem:[%s6717_s0 + $0x4b8] sm:$0xff] }
  0x3a   :  { %4119 = vmatprep.mubr.msk.f32.mxu0 %vm61_vm1, %v43_v57  ;;  %4190 = vmatprep.mubr.msk.f32.mxu1 %vm61_vm1, %v3355_v58  ;;  %v3434_v57 = vld [vmem:[%s6717_s0 + $0x350] sm:$0xff]  ;;  %v3527_v58 = vld [vmem:[%s6717_s0 + $0x4c0] sm:$0xff] }
  0x3d   :  { %4120 = vmatmul.mubr.msk.f32.gmra.mrb[28].mxu0 %vm61_vm1, %v44_v59  ;;  %4191 = vmatmul.mubr.msk.f32.gmra.mrb[28].mxu1 %vm61_vm1, %v3356_v60  ;;  %v3435_v59 = vld [vmem:[%s6717_s0 + $0x358] sm:$0xff]  ;;  %v3528_v60 = vld [vmem:[%s6717_s0 + $0x4c8] sm:$0xff] }
  0x3e   :  { %4122 = vmatprep.mubr.msk.f32.mxu0 %vm61_vm1, %v45_v61  ;;  %4193 = vmatprep.mubr.msk.f32.mxu1 %vm61_vm1, %v3357_v62  ;;  %v3436_v61 = vld [vmem:[%s6717_s0 + $0x360] sm:$0xff]  ;;  %v3529_v62 = vld [vmem:[%s6717_s0 + $0x4d0] sm:$0xff] }
  0x41   :  { %4123 = vmatmul.mubr.msk.f32.gmra.mrb[30].mxu0 %vm61_vm1, %v46_v63  ;;  %4194 = vmatmul.mubr.msk.f32.gmra.mrb[30].mxu1 %vm61_vm1, %v3358_v1  ;;  %v3437_v63 = vld [vmem:[%s6717_s0 + $0x368] sm:$0xff]  ;;  %v3530_v1 = vld [vmem:[%s6717_s0 + $0x4d8] sm:$0xff] }
  0x42   :  { %4125 = vmatprep.mubr.msk.f32.mxu0 %vm61_vm1, %v47_v2  ;;  %4196 = vmatprep.mubr.msk.f32.mxu1 %vm61_vm1, %v3359_v3  ;;  %v3438_v2 = vld [vmem:[%s6717_s0 + $0x370] sm:$0xff]  ;;  %v3531_v3 = vld [vmem:[%s6717_s0 + $0x4e0] sm:$0xff] }
  0x45   :  { %4126 = vmatmul.mubr.msk.f32.gmra.mrb[32].mxu0 %vm61_vm1, %v48_v4  ;;  %4197 = vmatmul.mubr.msk.f32.gmra.mrb[32].mxu1 %vm61_vm1, %v3360_v5  ;;  %v3439_v4 = vld [vmem:[%s6717_s0 + $0x378] sm:$0xff]  ;;  %v3532_v5 = vld [vmem:[%s6717_s0 + $0x4e8] sm:$0xff] }
  0x46   :  { %4128 = vmatprep.mubr.msk.f32.mxu0 %vm61_vm1, %v49_v6  ;;  %4199 = vmatprep.mubr.msk.f32.mxu1 %vm61_vm1, %v3361_v7  ;;  %v3440_v6 = vld [vmem:[%s6717_s0 + $0x380] sm:$0xff]  ;;  %v3533_v7 = vld [vmem:[%s6717_s0 + $0x4f0] sm:$0xff] }
  0x49   :  { %4129 = vmatmul.mubr.msk.f32.gmra.mrb[34].mxu0 %vm61_vm1, %v50_v8  ;;  %4200 = vmatmul.mubr.msk.f32.gmra.mrb[34].mxu1 %vm61_vm1, %v3362_v9  ;;  %v3441_v8 = vld [vmem:[%s6717_s0 + $0x388] sm:$0xff]  ;;  %v3534_v9 = vld [vmem:[%s6717_s0 + $0x4f8] sm:$0xff] }
  0x4a   :  { %4131 = vmatprep.mubr.msk.f32.mxu0 %vm61_vm1, %v51_v10  ;;  %4202 = vmatprep.mubr.msk.f32.mxu1 %vm61_vm1, %v3363_v11  ;;  %v3442_v10 = vld [vmem:[%s6717_s0 + $0x390] sm:$0xff]  ;;  %v3535_v11 = vld [vmem:[%s6717_s0 + $0x500] sm:$0xff] }
  0x4d   :  { %4132 = vmatmul.mubr.msk.f32.gmra.mrb[36].mxu0 %vm61_vm1, %v52_v12  ;;  %4203 = vmatmul.mubr.msk.f32.gmra.mrb[36].mxu1 %vm61_vm1, %v3364_v13  ;;  %v3443_v12 = vld [vmem:[%s6717_s0 + $0x398] sm:$0xff]  ;;  %v3536_v13 = vld [vmem:[%s6717_s0 + $0x508] sm:$0xff] }
  0x4e   :  { %4134 = vmatprep.mubr.msk.f32.mxu0 %vm61_vm1, %v53_v14  ;;  %4205 = vmatprep.mubr.msk.f32.mxu1 %vm61_vm1, %v3365_v15  ;;  %v3444_v14 = vld [vmem:[%s6717_s0 + $0x3a0] sm:$0xff]  ;;  %v3537_v15 = vld [vmem:[%s6717_s0 + $0x510] sm:$0xff] }
  0x51   :  { %4135 = vmatmul.mubr.msk.f32.gmra.mrb[38].mxu0 %vm61_vm1, %v54_v16  ;;  %4206 = vmatmul.mubr.msk.f32.gmra.mrb[38].mxu1 %vm61_vm1, %v3366_v17  ;;  %v3445_v16 = vld [vmem:[%s6717_s0 + $0x3a8] sm:$0xff]  ;;  %v3538_v17 = vld [vmem:[%s6717_s0 + $0x518] sm:$0xff] }
  0x52   :  { %4137 = vmatprep.mubr.msk.f32.mxu0 %vm61_vm1, %v55_v18  ;;  %4208 = vmatprep.mubr.msk.f32.mxu1 %vm61_vm1, %v3367_v19  ;;  %v3446_v18 = vld [vmem:[%s6717_s0 + $0x3b0] sm:$0xff]  ;;  %v3539_v19 = vld [vmem:[%s6717_s0 + $0x520] sm:$0xff] }
  0x55   :  { %4138 = vmatmul.mubr.msk.f32.gmra.mrb[40].mxu0 %vm61_vm1, %v56_v20  ;;  %4209 = vmatmul.mubr.msk.f32.gmra.mrb[40].mxu1 %vm61_vm1, %v3368_v21  ;;  %v3447_v20 = vld [vmem:[%s6717_s0 + $0x3b8] sm:$0xff]  ;;  %v3540_v21 = vld [vmem:[%s6717_s0 + $0x528] sm:$0xff] }
  0x56   :  { %4140 = vmatprep.mubr.msk.f32.mxu0 %vm61_vm1, %v57_v22  ;;  %4211 = vmatprep.mubr.msk.f32.mxu1 %vm61_vm1, %v3369_v23  ;;  %v3448_v22 = vld [vmem:[%s6717_s0 + $0x3c0] sm:$0xff]  ;;  %v3541_v23 = vld [vmem:[%s6717_s0 + $0x530] sm:$0xff] }
  0x59   :  { %4141 = vmatmul.mubr.msk.f32.gmra.mrb[42].mxu0 %vm61_vm1, %v58_v24  ;;  %4212 = vmatmul.mubr.msk.f32.gmra.mrb[42].mxu1 %vm61_vm1, %v3370_v25  ;;  %v3449_v24 = vld [vmem:[%s6717_s0 + $0x3c8] sm:$0xff]  ;;  %v3542_v25 = vld [vmem:[%s6717_s0 + $0x538] sm:$0xff] }
  0x5a   :  { %4143 = vmatprep.mubr.msk.f32.mxu0 %vm61_vm1, %v59_v26  ;;  %4214 = vmatprep.mubr.msk.f32.mxu1 %vm61_vm1, %v3371_v27  ;;  %v3450_v26 = vld [vmem:[%s6717_s0 + $0x3d0] sm:$0xff]  ;;  %v3543_v27 = vld [vmem:[%s6717_s0 + $0x540] sm:$0xff] }
  0x5d   :  { %4144 = vmatmul.mubr.msk.f32.gmra.mrb[44].mxu0 %vm61_vm1, %v60_v28  ;;  %4215 = vmatmul.mubr.msk.f32.gmra.mrb[44].mxu1 %vm61_vm1, %v3372_v29  ;;  %v3451_v28 = vld [vmem:[%s6717_s0 + $0x3d8] sm:$0xff]  ;;  %v3544_v29 = vld [vmem:[%s6717_s0 + $0x548] sm:$0xff] }
  0x5e   :  { %4219 = vmatprep.mubr.msk.f32.mxu0 %vm61_vm1, %v3420_v30  ;;  %4290 = vmatprep.mubr.msk.f32.mxu1 %vm61_vm1, %v3513_v31  ;;  %v3452_v30 = vld [vmem:[%s6717_s0 + $0x3e0] sm:$0xff]  ;;  %v3545_v31 = vld [vmem:[%s6717_s0 + $0x550] sm:$0xff] }
  0x61   :  { %4220 = vmatmul.mubr.msk.f32.vlgmr.msra.gmra.mrb[46].mxu0 %vm61_vm1, %v3421_v32  ;;  %4291 = vmatmul.mubr.msk.f32.vlgmr.msra.gmra.mrb[46].mxu1 %vm61_vm1, %v3514_v33  ;;  %v3453_v32 = vld [vmem:[%s6717_s0 + $0x3e8] sm:$0xff]  ;;  %v3546_v33 = vld [vmem:[%s6717_s0 + $0x558] sm:$0xff] }
  0x62   :  { %4360 = vmatpush3.msk.msra.mxu0 %vm200_vm0, %v4524_v0  ;;  %4222 = vmatprep.mubr.msk.f32.mxu0 %vm61_vm1, %v3422_v34  ;;  %v3454_v34 = vld [vmem:[%s6717_s0 + $0x3f0] sm:$0xff] }
  0x63   :  { %4431 = vmatpush3.msk.msra.mxu1 %vm200_vm0, %v4524_v0  ;;  %4293 = vmatprep.mubr.msk.f32.mxu1 %vm61_vm1, %v3515_v35  ;;  %v3425_v0 = vld [vmem:[%s6717_s0 + $0x308] sm:$0xff]  ;;  %v3547_v35 = vld [vmem:[%s6717_s0 + $0x560] sm:$0xff] }
  0x65   :  { %4223 = vmatmul.mubr.msk.f32.gmra.mrb[48].mxu0 %vm61_vm1, %v3423_v36  ;;  %4294 = vmatmul.mubr.msk.f32.gmra.mrb[48].mxu1 %vm61_vm1, %v3516_v37  ;;  %v3455_v36 = vld [vmem:[%s6717_s0 + $0x3f8] sm:$0xff]  ;;  %v3548_v37 = vld [vmem:[%s6717_s0 + $0x568] sm:$0xff] }
  0x66   :  { %4225 = vmatprep.mubr.msk.f32.mxu0 %vm61_vm1, %v3424_v38  ;;  %4296 = vmatprep.mubr.msk.f32.mxu1 %vm61_vm1, %v3517_v39  ;;  %v3456_v38 = vld [vmem:[%s6717_s0 + $0x400] sm:$0xff]  ;;  %v3549_v39 = vld [vmem:[%s6717_s0 + $0x570] sm:$0xff] }
  0x69   :  { %4226 = vmatmul.mubr.msk.f32.gmra.mrb[50].mxu0 %vm61_vm1, %v3425_v0  ;;  %4297 = vmatmul.mubr.msk.f32.gmra.mrb[50].mxu1 %vm61_vm1, %v3518_v40  ;;  %v3457_v0 = vld [vmem:[%s6717_s0 + $0x408] sm:$0xff]  ;;  %v3550_v40 = vld [vmem:[%s6717_s0 + $0x578] sm:$0xff] }
  0x6a   :  { %4228 = vmatprep.mubr.msk.f32.mxu0 %vm61_vm1, %v3426_v41  ;;  %4299 = vmatprep.mubr.msk.f32.mxu1 %vm61_vm1, %v3519_v42  ;;  %v3458_v41 = vld [vmem:[%s6717_s0 + $0x410] sm:$0xff]  ;;  %v3551_v42 = vld [vmem:[%s6717_s0 + $0x580] sm:$0xff] }
  0x6d   :  { %4229 = vmatmul.mubr.msk.f32.gmra.mrb[52].mxu0 %vm61_vm1, %v3427_v43  ;;  %4300 = vmatmul.mubr.msk.f32.gmra.mrb[52].mxu1 %vm61_vm1, %v3520_v44  ;;  %v3459_v43 = vld [vmem:[%s6717_s0 + $0x418] sm:$0xff]  ;;  %v3552_v44 = vld [vmem:[%s6717_s0 + $0x588] sm:$0xff] }
  0x6e   :  { %4231 = vmatprep.mubr.msk.f32.mxu0 %vm61_vm1, %v3428_v45  ;;  %4302 = vmatprep.mubr.msk.f32.mxu1 %vm61_vm1, %v3521_v46  ;;  %v3460_v45 = vld [vmem:[%s6717_s0 + $0x420] sm:$0xff]  ;;  %v3553_v46 = vld [vmem:[%s6717_s0 + $0x590] sm:$0xff] }
  0x71   :  { %4232 = vmatmul.mubr.msk.f32.gmra.mrb[54].mxu0 %vm61_vm1, %v3429_v47  ;;  %4303 = vmatmul.mubr.msk.f32.gmra.mrb[54].mxu1 %vm61_vm1, %v3522_v48  ;;  %v3461_v47 = vld [vmem:[%s6717_s0 + $0x428] sm:$0xff]  ;;  %v3554_v48 = vld [vmem:[%s6717_s0 + $0x598] sm:$0xff] }
  0x72   :  { %4234 = vmatprep.mubr.msk.f32.mxu0 %vm61_vm1, %v3430_v49  ;;  %4305 = vmatprep.mubr.msk.f32.mxu1 %vm61_vm1, %v3523_v50  ;;  %v3462_v49 = vld [vmem:[%s6717_s0 + $0x430] sm:$0xff]  ;;  %v3555_v50 = vld [vmem:[%s6717_s0 + $0x5a0] sm:$0xff] }
  0x75   :  { %4235 = vmatmul.mubr.msk.f32.gmra.mrb[56].mxu0 %vm61_vm1, %v3431_v51  ;;  %4306 = vmatmul.mubr.msk.f32.gmra.mrb[56].mxu1 %vm61_vm1, %v3524_v52  ;;  %v3463_v51 = vld [vmem:[%s6717_s0 + $0x438] sm:$0xff]  ;;  %v3556_v52 = vld [vmem:[%s6717_s0 + $0x5a8] sm:$0xff] }
  0x76   :  { %4237 = vmatprep.mubr.msk.f32.mxu0 %vm61_vm1, %v3432_v53  ;;  %4308 = vmatprep.mubr.msk.f32.mxu1 %vm61_vm1, %v3525_v54  ;;  %v3464_v53 = vld [vmem:[%s6717_s0 + $0x440] sm:$0xff]  ;;  %v3557_v54 = vld [vmem:[%s6717_s0 + $0x5b0] sm:$0xff] }
  0x79   :  { %4238 = vmatmul.mubr.msk.f32.gmra.mrb[58].mxu0 %vm61_vm1, %v3433_v55  ;;  %4309 = vmatmul.mubr.msk.f32.gmra.mrb[58].mxu1 %vm61_vm1, %v3526_v56  ;;  %v3465_v55 = vld [vmem:[%s6717_s0 + $0x448] sm:$0xf]  ;;  %v3558_v56 = vld [vmem:[%s6717_s0 + $0x5b8] sm:$0xf] }
  0x7a   :  { %4240 = vmatprep.mubr.msk.f32.mxu0 %vm61_vm1, %v3434_v57  ;;  %4311 = vmatprep.mubr.msk.f32.mxu1 %vm61_vm1, %v3527_v58  ;;  %v3606_v57 = vld [vmem:[%s6717_s0 + $0x5c0] sm:$0xff]  ;;  %v3699_v58 = vld [vmem:[%s6717_s0 + $0x730] sm:$0xff] }
  0x7d   :  { %4241 = vmatmul.mubr.msk.f32.gmra.mrb[60].mxu0 %vm61_vm1, %v3435_v59  ;;  %4312 = vmatmul.mubr.msk.f32.gmra.mrb[60].mxu1 %vm61_vm1, %v3528_v60  ;;  %v3607_v59 = vld [vmem:[%s6717_s0 + $0x5c8] sm:$0xff]  ;;  %v3700_v60 = vld [vmem:[%s6717_s0 + $0x738] sm:$0xff] }
  0x7e   :  { %4243 = vmatprep.mubr.msk.f32.mxu0 %vm61_vm1, %v3436_v61  ;;  %4314 = vmatprep.mubr.msk.f32.mxu1 %vm61_vm1, %v3529_v62  ;;  %v3608_v61 = vld [vmem:[%s6717_s0 + $0x5d0] sm:$0xff]  ;;  %v3701_v62 = vld [vmem:[%s6717_s0 + $0x740] sm:$0xff] }
  0x81   :  { %4244 = vmatmul.mubr.msk.f32.gmra.mrb[62].mxu0 %vm61_vm1, %v3437_v63  ;;  %4315 = vmatmul.mubr.msk.f32.gmra.mrb[62].mxu1 %vm61_vm1, %v3530_v1  ;;  %v3609_v63 = vld [vmem:[%s6717_s0 + $0x5d8] sm:$0xff]  ;;  %v3702_v1 = vld [vmem:[%s6717_s0 + $0x748] sm:$0xff] }
  0x82   :  { %4246 = vmatprep.mubr.msk.f32.mxu0 %vm61_vm1, %v3438_v2  ;;  %4317 = vmatprep.mubr.msk.f32.mxu1 %vm61_vm1, %v3531_v3  ;;  %v3610_v2 = vld [vmem:[%s6717_s0 + $0x5e0] sm:$0xff]  ;;  %v3703_v3 = vld [vmem:[%s6717_s0 + $0x750] sm:$0xff] }
  0x85   :  { %4247 = vmatmul.mubr.msk.f32.gmra.mrb[64].mxu0 %vm61_vm1, %v3439_v4  ;;  %4318 = vmatmul.mubr.msk.f32.gmra.mrb[64].mxu1 %vm61_vm1, %v3532_v5  ;;  %v3611_v4 = vld [vmem:[%s6717_s0 + $0x5e8] sm:$0xff]  ;;  %v3704_v5 = vld [vmem:[%s6717_s0 + $0x758] sm:$0xff] }
  0x86   :  { %4249 = vmatprep.mubr.msk.f32.mxu0 %vm61_vm1, %v3440_v6  ;;  %4320 = vmatprep.mubr.msk.f32.mxu1 %vm61_vm1, %v3533_v7  ;;  %v3612_v6 = vld [vmem:[%s6717_s0 + $0x5f0] sm:$0xff]  ;;  %v3705_v7 = vld [vmem:[%s6717_s0 + $0x760] sm:$0xff] }
  0x89   :  { %4250 = vmatmul.mubr.msk.f32.gmra.mrb[66].mxu0 %vm61_vm1, %v3441_v8  ;;  %4321 = vmatmul.mubr.msk.f32.gmra.mrb[66].mxu1 %vm61_vm1, %v3534_v9  ;;  %v3613_v8 = vld [vmem:[%s6717_s0 + $0x5f8] sm:$0xff]  ;;  %v3706_v9 = vld [vmem:[%s6717_s0 + $0x768] sm:$0xff] }
  0x8a   :  { %4252 = vmatprep.mubr.msk.f32.mxu0 %vm61_vm1, %v3442_v10  ;;  %4323 = vmatprep.mubr.msk.f32.mxu1 %vm61_vm1, %v3535_v11  ;;  %v3614_v10 = vld [vmem:[%s6717_s0 + $0x600] sm:$0xff]  ;;  %v3707_v11 = vld [vmem:[%s6717_s0 + $0x770] sm:$0xff] }
  0x8d   :  { %4253 = vmatmul.mubr.msk.f32.gmra.mrb[68].mxu0 %vm61_vm1, %v3443_v12  ;;  %4324 = vmatmul.mubr.msk.f32.gmra.mrb[68].mxu1 %vm61_vm1, %v3536_v13  ;;  %v3615_v12 = vld [vmem:[%s6717_s0 + $0x608] sm:$0xff]  ;;  %v3708_v13 = vld [vmem:[%s6717_s0 + $0x778] sm:$0xff] }
  0x8e   :  { %4255 = vmatprep.mubr.msk.f32.mxu0 %vm61_vm1, %v3444_v14  ;;  %4326 = vmatprep.mubr.msk.f32.mxu1 %vm61_vm1, %v3537_v15  ;;  %v3616_v14 = vld [vmem:[%s6717_s0 + $0x610] sm:$0xff]  ;;  %v3709_v15 = vld [vmem:[%s6717_s0 + $0x780] sm:$0xff] }
  0x91   :  { %4256 = vmatmul.mubr.msk.f32.gmra.mrb[70].mxu0 %vm61_vm1, %v3445_v16  ;;  %4327 = vmatmul.mubr.msk.f32.gmra.mrb[70].mxu1 %vm61_vm1, %v3538_v17  ;;  %v3617_v16 = vld [vmem:[%s6717_s0 + $0x618] sm:$0xff]  ;;  %v3710_v17 = vld [vmem:[%s6717_s0 + $0x788] sm:$0xff] }
  0x92   :  { %4258 = vmatprep.mubr.msk.f32.mxu0 %vm61_vm1, %v3446_v18  ;;  %4329 = vmatprep.mubr.msk.f32.mxu1 %vm61_vm1, %v3539_v19  ;;  %v3618_v18 = vld [vmem:[%s6717_s0 + $0x620] sm:$0xff]  ;;  %v3711_v19 = vld [vmem:[%s6717_s0 + $0x790] sm:$0xff] }
  0x95   :  { %4259 = vmatmul.mubr.msk.f32.gmra.mrb[72].mxu0 %vm61_vm1, %v3447_v20  ;;  %4330 = vmatmul.mubr.msk.f32.gmra.mrb[72].mxu1 %vm61_vm1, %v3540_v21  ;;  %v3619_v20 = vld [vmem:[%s6717_s0 + $0x628] sm:$0xff]  ;;  %v3712_v21 = vld [vmem:[%s6717_s0 + $0x798] sm:$0xff] }
  0x96   :  { %4261 = vmatprep.mubr.msk.f32.mxu0 %vm61_vm1, %v3448_v22  ;;  %4332 = vmatprep.mubr.msk.f32.mxu1 %vm61_vm1, %v3541_v23  ;;  %v3620_v22 = vld [vmem:[%s6717_s0 + $0x630] sm:$0xff]  ;;  %v3713_v23 = vld [vmem:[%s6717_s0 + $0x7a0] sm:$0xff] }
  0x99   :  { %4262 = vmatmul.mubr.msk.f32.gmra.mrb[74].mxu0 %vm61_vm1, %v3449_v24  ;;  %4333 = vmatmul.mubr.msk.f32.gmra.mrb[74].mxu1 %vm61_vm1, %v3542_v25  ;;  %v3621_v24 = vld [vmem:[%s6717_s0 + $0x638] sm:$0xff]  ;;  %v3714_v25 = vld [vmem:[%s6717_s0 + $0x7a8] sm:$0xff] }
  0x9a   :  { %4264 = vmatprep.mubr.msk.f32.mxu0 %vm61_vm1, %v3450_v26  ;;  %4335 = vmatprep.mubr.msk.f32.mxu1 %vm61_vm1, %v3543_v27  ;;  %v3622_v26 = vld [vmem:[%s6717_s0 + $0x640] sm:$0xff]  ;;  %v3715_v27 = vld [vmem:[%s6717_s0 + $0x7b0] sm:$0xff] }
  0x9d   :  { %4265 = vmatmul.mubr.msk.f32.gmra.mrb[76].mxu0 %vm61_vm1, %v3451_v28  ;;  %4336 = vmatmul.mubr.msk.f32.gmra.mrb[76].mxu1 %vm61_vm1, %v3544_v29 }
  0x9e   :  { %4267 = vmatprep.mubr.msk.f32.mxu0 %vm61_vm1, %v3452_v30  ;;  %4338 = vmatprep.mubr.msk.f32.mxu1 %vm61_vm1, %v3545_v31  ;;  %v3744_v30 = vld [vmem:[%s6717_s0 + $0x898] sm:$0xf] }
  0xa1   :  { %4268 = vmatmul.mubr.msk.f32.gmra.mrb[78].mxu0 %vm61_vm1, %v3453_v32  ;;  %4339 = vmatmul.mubr.msk.f32.gmra.mrb[78].mxu1 %vm61_vm1, %v3546_v33  ;;  %v3649_v33 = vld [vmem:[%s6717_s0 + $0x718] sm:$0xff] }
  0xa2   :  { %4270 = vmatprep.mubr.msk.f32.mxu0 %vm61_vm1, %v3454_v34  ;;  %4341 = vmatprep.mubr.msk.f32.mxu1 %vm61_vm1, %v3547_v35  ;;  %v3623_v34 = vld [vmem:[%s6717_s0 + $0x648] sm:$0xff]  ;;  %v3716_v35 = vld [vmem:[%s6717_s0 + $0x7b8] sm:$0xff] }
  0xa5   :  { %4271 = vmatmul.mubr.msk.f32.gmra.mrb[80].mxu0 %vm61_vm1, %v3455_v36  ;;  %4342 = vmatmul.mubr.msk.f32.gmra.mrb[80].mxu1 %vm61_vm1, %v3548_v37  ;;  %v3624_v36 = vld [vmem:[%s6717_s0 + $0x650] sm:$0xff]  ;;  %v3717_v37 = vld [vmem:[%s6717_s0 + $0x7c0] sm:$0xff] }
  0xa6   :  { %4273 = vmatprep.mubr.msk.f32.mxu0 %vm61_vm1, %v3456_v38  ;;  %4344 = vmatprep.mubr.msk.f32.mxu1 %vm61_vm1, %v3549_v39 }
  0xa9   :  { %4274 = vmatmul.mubr.msk.f32.gmra.mrb[82].mxu0 %vm61_vm1, %v3457_v0  ;;  %4345 = vmatmul.mubr.msk.f32.gmra.mrb[82].mxu1 %vm61_vm1, %v3550_v40 }
  0xaa   :  { %4276 = vmatprep.mubr.msk.f32.mxu0 %vm61_vm1, %v3458_v41  ;;  %4347 = vmatprep.mubr.msk.f32.mxu1 %vm61_vm1, %v3551_v42 }
  0xad   :  { %4277 = vmatmul.mubr.msk.f32.gmra.mrb[84].mxu0 %vm61_vm1, %v3459_v43  ;;  %4348 = vmatmul.mubr.msk.f32.gmra.mrb[84].mxu1 %vm61_vm1, %v3552_v44  ;;  %v3625_v43 = vld [vmem:[%s6717_s0 + $0x658] sm:$0xff]  ;;  %v3718_v44 = vld [vmem:[%s6717_s0 + $0x7c8] sm:$0xff] }
  0xae   :  { %4279 = vmatprep.mubr.msk.f32.mxu0 %vm61_vm1, %v3460_v45  ;;  %4350 = vmatprep.mubr.msk.f32.mxu1 %vm61_vm1, %v3553_v46  ;;  %v3626_v45 = vld [vmem:[%s6717_s0 + $0x660] sm:$0xff]  ;;  %v3719_v46 = vld [vmem:[%s6717_s0 + $0x7d0] sm:$0xff] }
  0xb1   :  { %4280 = vmatmul.mubr.msk.f32.gmra.mrb[86].mxu0 %vm61_vm1, %v3461_v47  ;;  %4351 = vmatmul.mubr.msk.f32.gmra.mrb[86].mxu1 %vm61_vm1, %v3554_v48 }
  0xb2   :  { %4282 = vmatprep.mubr.msk.f32.mxu0 %vm61_vm1, %v3462_v49  ;;  %4353 = vmatprep.mubr.msk.f32.mxu1 %vm61_vm1, %v3555_v50  ;;  %v3742_v49 = vld [vmem:[%s6717_s0 + $0x888] sm:$0xff] }
  0xb5   :  { %4283 = vmatmul.mubr.msk.f32.gmra.mrb[88].mxu0 %vm61_vm1, %v3463_v51  ;;  %4354 = vmatmul.mubr.msk.f32.gmra.mrb[88].mxu1 %vm61_vm1, %v3556_v52  ;;  %v3647_v52 = vld [vmem:[%s6717_s0 + $0x708] sm:$0xff] }
  0xb6   :  { %4285 = vmatprep.mubr.msk.f32.mxu0 %vm61_vm1, %v3464_v53  ;;  %4356 = vmatprep.mubr.msk.f32.mxu1 %vm61_vm1, %v3557_v54  ;;  %v3627_v53 = vld [vmem:[%s6717_s0 + $0x668] sm:$0xff]  ;;  %v3720_v54 = vld [vmem:[%s6717_s0 + $0x7d8] sm:$0xff] }
  0xb9   :  { %4286 = vmatmul.mubr.msk.f32.gmra.mrb[90].mxu0 %vm61_vm1, %v3465_v55  ;;  %4357 = vmatmul.mubr.msk.f32.gmra.mrb[90].mxu1 %vm61_vm1, %v3558_v56  ;;  %v3628_v55 = vld [vmem:[%s6717_s0 + $0x670] sm:$0xff]  ;;  %v3721_v56 = vld [vmem:[%s6717_s0 + $0x7e0] sm:$0xff] }
  0xba   :  { %4361 = vmatprep.mubr.msk.f32.mxu0 %vm61_vm1, %v3606_v57  ;;  %4432 = vmatprep.mubr.msk.f32.mxu1 %vm61_vm1, %v3699_v58 }
  0xbd   :  { %4362 = vmatmul.mubr.msk.f32.vlgmr.msra.gmra.mrb[92].mxu0 %vm61_vm1, %v3607_v59  ;;  %4433 = vmatmul.mubr.msk.f32.vlgmr.msra.gmra.mrb[92].mxu1 %vm61_vm1, %v3700_v60 }
  0xbe   :  { %4364 = vmatprep.mubr.msk.f32.mxu0 %vm61_vm1, %v3608_v61  ;;  %4435 = vmatprep.mubr.msk.f32.mxu1 %vm61_vm1, %v3701_v62 }
  0xc1   :  { %4365 = vmatmul.mubr.msk.f32.gmra.mrb[94].mxu0 %vm61_vm1, %v3609_v63  ;;  %4436 = vmatmul.mubr.msk.f32.gmra.mrb[94].mxu1 %vm61_vm1, %v3702_v1  ;;  %v3629_v63 = vld [vmem:[%s6717_s0 + $0x678] sm:$0xff]  ;;  %v3722_v1 = vld [vmem:[%s6717_s0 + $0x7e8] sm:$0xff] }
  0xc2   :  { %4367 = vmatprep.mubr.msk.f32.mxu0 %vm61_vm1, %v3610_v2  ;;  %4438 = vmatprep.mubr.msk.f32.mxu1 %vm61_vm1, %v3703_v3  ;;  %v3630_v2 = vld [vmem:[%s6717_s0 + $0x680] sm:$0xff]  ;;  %v3723_v3 = vld [vmem:[%s6717_s0 + $0x7f0] sm:$0xff] }
  0xc5   :  { %4368 = vmatmul.mubr.msk.f32.gmra.mrb[96].mxu0 %vm61_vm1, %v3611_v4  ;;  %4439 = vmatmul.mubr.msk.f32.gmra.mrb[96].mxu1 %vm61_vm1, %v3704_v5 }
  0xc6   :  { %4370 = vmatprep.mubr.msk.f32.mxu0 %vm61_vm1, %v3612_v6  ;;  %4441 = vmatprep.mubr.msk.f32.mxu1 %vm61_vm1, %v3705_v7  ;;  %v3740_v6 = vld [vmem:[%s6717_s0 + $0x878] sm:$0xff] }
  0xc9   :  { %4371 = vmatmul.mubr.msk.f32.gmra.mrb[98].mxu0 %vm61_vm1, %v3613_v8  ;;  %4442 = vmatmul.mubr.msk.f32.gmra.mrb[98].mxu1 %vm61_vm1, %v3706_v9  ;;  %v3645_v9 = vld [vmem:[%s6717_s0 + $0x6f8] sm:$0xff] }
  0xca   :  { %4373 = vmatprep.mubr.msk.f32.mxu0 %vm61_vm1, %v3614_v10  ;;  %4444 = vmatprep.mubr.msk.f32.mxu1 %vm61_vm1, %v3707_v11  ;;  %v3631_v10 = vld [vmem:[%s6717_s0 + $0x688] sm:$0xff]  ;;  %v3724_v11 = vld [vmem:[%s6717_s0 + $0x7f8] sm:$0xff] }
  0xcd   :  { %4374 = vmatmul.mubr.msk.f32.gmra.mrb[100].mxu0 %vm61_vm1, %v3615_v12  ;;  %4445 = vmatmul.mubr.msk.f32.gmra.mrb[100].mxu1 %vm61_vm1, %v3708_v13  ;;  %v3632_v12 = vld [vmem:[%s6717_s0 + $0x690] sm:$0xff]  ;;  %v3725_v13 = vld [vmem:[%s6717_s0 + $0x800] sm:$0xff] }
  0xce   :  { %4376 = vmatprep.mubr.msk.f32.mxu0 %vm61_vm1, %v3616_v14  ;;  %4447 = vmatprep.mubr.msk.f32.mxu1 %vm61_vm1, %v3709_v15 }
  0xd1   :  { %4377 = vmatmul.mubr.msk.f32.gmra.mrb[102].mxu0 %vm61_vm1, %v3617_v16  ;;  %4448 = vmatmul.mubr.msk.f32.gmra.mrb[102].mxu1 %vm61_vm1, %v3710_v17 }
  0xd2   :  { %4379 = vmatprep.mubr.msk.f32.mxu0 %vm61_vm1, %v3618_v18  ;;  %4450 = vmatprep.mubr.msk.f32.mxu1 %vm61_vm1, %v3711_v19 }
  0xd5   :  { %4380 = vmatmul.mubr.msk.f32.gmra.mrb[104].mxu0 %vm61_vm1, %v3619_v20  ;;  %4451 = vmatmul.mubr.msk.f32.gmra.mrb[104].mxu1 %vm61_vm1, %v3712_v21  ;;  %v3633_v20 = vld [vmem:[%s6717_s0 + $0x698] sm:$0xff]  ;;  %v3726_v21 = vld [vmem:[%s6717_s0 + $0x808] sm:$0xff] }
  0xd6   :  { %4382 = vmatprep.mubr.msk.f32.mxu0 %vm61_vm1, %v3620_v22  ;;  %4453 = vmatprep.mubr.msk.f32.mxu1 %vm61_vm1, %v3713_v23  ;;  %v3634_v22 = vld [vmem:[%s6717_s0 + $0x6a0] sm:$0xff]  ;;  %v3727_v23 = vld [vmem:[%s6717_s0 + $0x810] sm:$0xff] }
  0xd8   :  { %v5418_v28 = vpop.f32.mrb[0].mxu0  ;;  %v5420_v29 = vpop.f32.mrb[0].mxu1 }
  0xd9   :  { %v5424_v31 = vpop.f32.mrb[1].mxu0  ;;  %v5426_v32 = vpop.f32.mrb[1].mxu1  ;;  %4383 = vmatmul.mubr.msk.f32.gmra.mrb[106].mxu0 %vm61_vm1, %v3621_v24  ;;  %4454 = vmatmul.mubr.msk.f32.gmra.mrb[106].mxu1 %vm61_vm1, %v3714_v25 }
  0xda   :  { %4385 = vmatprep.mubr.msk.f32.mxu0 %vm61_vm1, %v3622_v26  ;;  %4456 = vmatprep.mubr.msk.f32.mxu1 %vm61_vm1, %v3715_v27  ;;  %v3738_v26 = vld [vmem:[%s6717_s0 + $0x868] sm:$0xff] }
  0xdc   :  { %v5446_v38 = vpop.f32.mrb[2].mxu0  ;;  %v5448_v39 = vpop.f32.mrb[2].mxu1 }
  0xdd   :  { %v5452_v40 = vpop.f32.mrb[3].mxu0  ;;  %v5454_v41 = vpop.f32.mrb[3].mxu1  ;;  %4386 = vmatmul.mubr.msk.f32.gmra.mrb[108].mxu0 %vm61_vm1, %v3623_v34  ;;  %4457 = vmatmul.mubr.msk.f32.gmra.mrb[108].mxu1 %vm61_vm1, %v3716_v35  ;;  %v3643_v35 = vld [vmem:[%s6717_s0 + $0x6e8] sm:$0xff] }
  0xde   :  { %4388 = vmatprep.mubr.msk.f32.mxu0 %vm61_vm1, %v3624_v36  ;;  %4459 = vmatprep.mubr.msk.f32.mxu1 %vm61_vm1, %v3717_v37  ;;  %v3635_v36 = vld [vmem:[%s6717_s0 + $0x6a8] sm:$0xff]  ;;  %v3728_v37 = vld [vmem:[%s6717_s0 + $0x818] sm:$0xff] }
  0xe0   :  { %v5474_v47 = vpop.f32.mrb[4].mxu0  ;;  %v5476_v48 = vpop.f32.mrb[4].mxu1 }
  0xe1   :  { %v5480_v50 = vpop.f32.mrb[5].mxu0  ;;  %v5482_v51 = vpop.f32.mrb[5].mxu1  ;;  %4389 = vmatmul.mubr.msk.f32.gmra.mrb[110].mxu0 %vm61_vm1, %v3625_v43  ;;  %4460 = vmatmul.mubr.msk.f32.gmra.mrb[110].mxu1 %vm61_vm1, %v3718_v44  ;;  %v3636_v43 = vld [vmem:[%s6717_s0 + $0x6b0] sm:$0xff]  ;;  %v3729_v44 = vld [vmem:[%s6717_s0 + $0x820] sm:$0xff] }
  0xe2   :  { %4391 = vmatprep.mubr.msk.f32.mxu0 %vm61_vm1, %v3626_v45  ;;  %4462 = vmatprep.mubr.msk.f32.mxu1 %vm61_vm1, %v3719_v46 }
  0xe4   :  { %v5502_v57 = vpop.f32.mrb[6].mxu0  ;;  %v5504_v58 = vpop.f32.mrb[6].mxu1 }
  0xe5   :  { %v5508_v60 = vpop.f32.mrb[7].mxu0  ;;  %v5510_v61 = vpop.f32.mrb[7].mxu1  ;;  %4392 = vmatmul.mubr.msk.f32.gmra.mrb[112].mxu0 %vm61_vm1, %v3627_v53  ;;  %4463 = vmatmul.mubr.msk.f32.gmra.mrb[112].mxu1 %vm61_vm1, %v3720_v54 }
  0xe6   :  { %4394 = vmatprep.mubr.msk.f32.mxu0 %vm61_vm1, %v3628_v55  ;;  %4465 = vmatprep.mubr.msk.f32.mxu1 %vm61_vm1, %v3721_v56 }
  0xe8   :  { %v5530_v4 = vpop.f32.mrb[8].mxu0  ;;  %v5532_v5 = vpop.f32.mrb[8].mxu1 }
  0xe9   :  { %v5536_v7 = vpop.f32.mrb[9].mxu0  ;;  %v5538_v8 = vpop.f32.mrb[9].mxu1  ;;  %4395 = vmatmul.mubr.msk.f32.gmra.mrb[114].mxu0 %vm61_vm1, %v3629_v63  ;;  %4466 = vmatmul.mubr.msk.f32.gmra.mrb[114].mxu1 %vm61_vm1, %v3722_v1  ;;  %v3637_v63 = vld [vmem:[%s6717_s0 + $0x6b8] sm:$0xff]  ;;  %v3730_v1 = vld [vmem:[%s6717_s0 + $0x828] sm:$0xff] }
  0xea   :  { %4397 = vmatprep.mubr.msk.f32.mxu0 %vm61_vm1, %v3630_v2  ;;  %4468 = vmatprep.mubr.msk.f32.mxu1 %vm61_vm1, %v3723_v3  ;;  %v3638_v2 = vld [vmem:[%s6717_s0 + $0x6c0] sm:$0xff]  ;;  %v3731_v3 = vld [vmem:[%s6717_s0 + $0x830] sm:$0xff] }
  0xec   :  { %v5558_v14 = vpop.f32.mrb[10].mxu0  ;;  %v5560_v15 = vpop.f32.mrb[10].mxu1 }
  0xed   :  { %v5564_v17 = vpop.f32.mrb[11].mxu0  ;;  %v5566_v18 = vpop.f32.mrb[11].mxu1  ;;  %4398 = vmatmul.mubr.msk.f32.gmra.mrb[116].mxu0 %vm61_vm1, %v3631_v10  ;;  %4469 = vmatmul.mubr.msk.f32.gmra.mrb[116].mxu1 %vm61_vm1, %v3724_v11 }
  0xee   :  { %4400 = vmatprep.mubr.msk.f32.mxu0 %vm61_vm1, %v3632_v12  ;;  %4471 = vmatprep.mubr.msk.f32.mxu1 %vm61_vm1, %v3725_v13  ;;  %v3736_v12 = vld [vmem:[%s6717_s0 + $0x858] sm:$0xff] }
  0xf0   :  { %v5586_v24 = vpop.f32.mrb[12].mxu0  ;;  %v5588_v25 = vpop.f32.mrb[12].mxu1 }
  0xf1   :  { %v5592_v27 = vpop.f32.mrb[13].mxu0  ;;  %v5594_v34 = vpop.f32.mrb[13].mxu1  ;;  %4401 = vmatmul.mubr.msk.f32.gmra.mrb[118].mxu0 %vm61_vm1, %v3633_v20  ;;  %4472 = vmatmul.mubr.msk.f32.gmra.mrb[118].mxu1 %vm61_vm1, %v3726_v21  ;;  %v3641_v21 = vld [vmem:[%s6717_s0 + $0x6d8] sm:$0xff] }
  0xf2   :  { %4403 = vmatprep.mubr.msk.f32.mxu0 %vm61_vm1, %v3634_v22  ;;  %4474 = vmatprep.mubr.msk.f32.mxu1 %vm61_vm1, %v3727_v23  ;;  %v3639_v22 = vld [vmem:[%s6717_s0 + $0x6c8] sm:$0xff]  ;;  %v3732_v23 = vld [vmem:[%s6717_s0 + $0x838] sm:$0xff] }
  0xf4   :  { %v5614_v45 = vpop.f32.mrb[14].mxu0  ;;  %v5616_v46 = vpop.f32.mrb[14].mxu1 }
  0xf5   :  { %v5620_v54 = vpop.f32.mrb[15].mxu0  ;;  %v5622_v55 = vpop.f32.mrb[15].mxu1  ;;  %4404 = vmatmul.mubr.msk.f32.gmra.mrb[120].mxu0 %vm61_vm1, %v3635_v36  ;;  %4475 = vmatmul.mubr.msk.f32.gmra.mrb[120].mxu1 %vm61_vm1, %v3728_v37  ;;  %v3640_v36 = vld [vmem:[%s6717_s0 + $0x6d0] sm:$0xff]  ;;  %v3733_v37 = vld [vmem:[%s6717_s0 + $0x840] sm:$0xff] }
  0xf6   :  { %4406 = vmatprep.mubr.msk.f32.mxu0 %vm61_vm1, %v3636_v43  ;;  %4477 = vmatprep.mubr.msk.f32.mxu1 %vm61_vm1, %v3729_v44 }
  0xf8   :  { %v5642_v10 = vpop.f32.mrb[16].mxu0  ;;  %v5644_v11 = vpop.f32.mrb[16].mxu1 }
  0xf9   :  { %v5648_v13 = vpop.f32.mrb[17].mxu0  ;;  %v5650_v20 = vpop.f32.mrb[17].mxu1  ;;  %4407 = vmatmul.mubr.msk.f32.gmra.mrb[122].mxu0 %vm61_vm1, %v3637_v63  ;;  %4478 = vmatmul.mubr.msk.f32.gmra.mrb[122].mxu1 %vm61_vm1, %v3730_v1  ;;  %v3734_v63 = vld [vmem:[%s6717_s0 + $0x848] sm:$0xff] }
  0xfa   :  { %4409 = vmatprep.mubr.msk.f32.mxu0 %vm61_vm1, %v3638_v2  ;;  %4480 = vmatprep.mubr.msk.f32.mxu1 %vm61_vm1, %v3731_v3 }
  0xfc   :  { %v5670_v43 = vpop.f32.mrb[18].mxu0  ;;  %v5672_v44 = vpop.f32.mrb[18].mxu1 }
  0xfd   :  { %v5676_v1 = vpop.f32.mrb[19].mxu0  ;;  %v5678_v2 = vpop.f32.mrb[19].mxu1  ;;  %4410 = vmatmul.mubr.msk.f32.gmra.mrb[124].mxu0 %vm61_vm1, %v3639_v22  ;;  %4481 = vmatmul.mubr.msk.f32.gmra.mrb[124].mxu1 %vm61_vm1, %v3732_v23  ;;  %v3642_v22 = vld [vmem:[%s6717_s0 + $0x6e0] sm:$0xff]  ;;  %v3735_v23 = vld [vmem:[%s6717_s0 + $0x850] sm:$0xff] }
  0xfe   :  { %4412 = vmatprep.mubr.msk.f32.mxu0 %vm61_vm1, %v3640_v36  ;;  %4483 = vmatprep.mubr.msk.f32.mxu1 %vm61_vm1, %v3733_v37 }
 0x100   :  { %v5698_v3 = vpop.f32.mrb[20].mxu0  ;;  %v5700_v36 = vpop.f32.mrb[20].mxu1 }
 0x101   :  { %v5704_v37 = vpop.f32.mrb[21].mxu0  ;;  %v5706_v56 = vpop.f32.mrb[21].mxu1  ;;  %4413 = vmatmul.mubr.msk.f32.gmra.mrb[126].mxu0 %vm61_vm1, %v3641_v21  ;;  %4484 = vmatmul.mubr.msk.f32.gmra.mrb[126].mxu1 %vm61_vm1, %v3734_v63  ;;  %v3644_v21 = vld [vmem:[%s6717_s0 + $0x6f0] sm:$0xff]  ;;  %v3737_v63 = vld [vmem:[%s6717_s0 + $0x860] sm:$0xff] }
 0x102   :  { %4415 = vmatprep.mubr.msk.f32.mxu0 %vm61_vm1, %v3642_v22  ;;  %4486 = vmatprep.mubr.msk.f32.mxu1 %vm61_vm1, %v3735_v23 }
 0x104   :  { %v5726_v53 = vpop.f32.mrb[22].mxu0  ;;  %v5728_v22 = vpop.f32.mrb[22].mxu1 }
 0x105   :  { %v5732_v23 = vpop.f32.mrb[23].mxu0  ;;  %v5734_v19 = vpop.f32.mrb[23].mxu1  ;;  %4416 = vmatmul.mubr.msk.f32.gmra.mrb[128].mxu0 %vm61_vm1, %v3643_v35  ;;  %4487 = vmatmul.mubr.msk.f32.gmra.mrb[128].mxu1 %vm61_vm1, %v3736_v12  ;;  %v3646_v35 = vld [vmem:[%s6717_s0 + $0x700] sm:$0xff]  ;;  %v3739_v12 = vld [vmem:[%s6717_s0 + $0x870] sm:$0xff] }
 0x106   :  { %4418 = vmatprep.mubr.msk.f32.mxu0 %vm61_vm1, %v3644_v21  ;;  %4489 = vmatprep.mubr.msk.f32.mxu1 %vm61_vm1, %v3737_v63 }
 0x108   :  { %v5754_v16 = vpop.f32.mrb[24].mxu0  ;;  %v5756_v21 = vpop.f32.mrb[24].mxu1 }
 0x109   :  { %v5760_v63 = vpop.f32.mrb[25].mxu0  ;;  %v5762_v62 = vpop.f32.mrb[25].mxu1  ;;  %4419 = vmatmul.mubr.msk.f32.gmra.mrb[130].mxu0 %vm61_vm1, %v3645_v9  ;;  %4490 = vmatmul.mubr.msk.f32.gmra.mrb[130].mxu1 %vm61_vm1, %v3738_v26  ;;  %v3648_v9 = vld [vmem:[%s6717_s0 + $0x710] sm:$0xff]  ;;  %v3741_v26 = vld [vmem:[%s6717_s0 + $0x880] sm:$0xff] }
 0x10a   :  { %4421 = vmatprep.mubr.msk.f32.mxu0 %vm61_vm1, %v3646_v35  ;;  %4492 = vmatprep.mubr.msk.f32.mxu1 %vm61_vm1, %v3739_v12 }
 0x10c   :  { %v5782_v59 = vpop.f32.mrb[26].mxu0  ;;  %v5784_v35 = vpop.f32.mrb[26].mxu1 }
 0x10d   :  { %6803 = vst [vmem:[#allocation2_spill] sm:$0xff] %v5782_v59  ;;  %6804 = vst [vmem:[#allocation3_spill] sm:$0xff] %v5784_v35  ;;  %v5788_v12 = vpop.f32.mrb[27].mxu0  ;;  %v5790_v42 = vpop.f32.mrb[27].mxu1  ;;  %4422 = vmatmul.mubr.msk.f32.gmra.mrb[132].mxu0 %vm61_vm1, %v3647_v52  ;;  %4493 = vmatmul.mubr.msk.f32.gmra.mrb[132].mxu1 %vm61_vm1, %v3740_v6  ;;  %v3650_v52 = vld [vmem:[%s6717_s0 + $0x720] sm:$0xff]  ;;  %v3743_v6 = vld [vmem:[%s6717_s0 + $0x890] sm:$0xff] }
 0x10e   :  { %6805 = vst [vmem:[#allocation4_spill] sm:$0xff] %v5788_v12  ;;  %6806 = vst [vmem:[#allocation5_spill] sm:$0xff] %v5790_v42  ;;  %4424 = vmatprep.mubr.msk.f32.mxu0 %vm61_vm1, %v3648_v9  ;;  %4495 = vmatprep.mubr.msk.f32.mxu1 %vm61_vm1, %v3741_v26  ;;  %v3651_v35 = vld [vmem:[%s6717_s0 + $0x728] sm:$0xf] }
 0x110   :  { %v5810_v0 = vpop.f32.mrb[28].mxu0  ;;  %v5812_v9 = vpop.f32.mrb[28].mxu1 }
 0x111   :  { %6807 = vst [vmem:[#allocation6_spill] sm:$0xff] %v5810_v0  ;;  %6808 = vst [vmem:[#allocation7_spill] sm:$0xff] %v5812_v9  ;;  %v5816_v26 = vpop.f32.mrb[29].mxu0  ;;  %v5818_v42 = vpop.f32.mrb[29].mxu1  ;;  %4425 = vmatmul.mubr.msk.f32.gmra.mrb[134].mxu0 %vm61_vm1, %v3649_v33  ;;  %4496 = vmatmul.mubr.msk.f32.gmra.mrb[134].mxu1 %vm61_vm1, %v3742_v49  ;;  %v6844_v0 = vmax.f32 %v5424_v31, %v5426_v32  ;;  %v6846_v31 = vmax.f32 %v5452_v40, %v5454_v41 }
 0x112   :  { %6809 = vst [vmem:[#allocation8_spill] sm:$0xff] %v5816_v26  ;;  %6810 = vst [vmem:[#allocation9_spill] sm:$0xff] %v5818_v42  ;;  %4427 = vmatprep.mubr.msk.f32.mxu0 %vm61_vm1, %v3650_v52  ;;  %4498 = vmatprep.mubr.msk.f32.mxu1 %vm61_vm1, %v3743_v6  ;;  %v6843_v6 = vmax.f32 %v5418_v28, %v5420_v29  ;;  %v6845_v28 = vmax.f32 %v5446_v38, %v5448_v39 }
 0x113   :  { %v6847_v38 = vmax.f32 %v5474_v47, %v5476_v48  ;;  %v6848_v40 = vmax.f32 %v5480_v50, %v5482_v51  ;;  %v6849_v47 = vmax.f32 %v5502_v57, %v5504_v58  ;;  %v6850_v50 = vmax.f32 %v5508_v60, %v5510_v61 }
 0x114   :  { %v5832_v9 = vpop.f32.mrb[30].mxu0  ;;  %v5834_v33 = vpop.f32.mrb[30].mxu1  ;;  %v6851_v57 = vmax.f32 %v5530_v4, %v5532_v5  ;;  %v6852_v60 = vmax.f32 %v5536_v7, %v5538_v8  ;;  %v6853_v4 = vmax.f32 %v5558_v14, %v5560_v15  ;;  %v6854_v7 = vmax.f32 %v5564_v17, %v5566_v18 }
 0x115   :  { %6811 = vst [vmem:[#allocation10_spill] sm:$0xff] %v5832_v9  ;;  %6812 = vst [vmem:[#allocation11_spill] sm:$0xff] %v5834_v33  ;;  %v5838_v12 = vpop.f32.mrb[31].mxu0  ;;  %v5840_v52 = vpop.f32.mrb[31].mxu1  ;;  %4428 = vmatmul.mubr.msk.f32.gmra.mrb[136].mxu0 %vm61_vm1, %v3651_v35  ;;  %4499 = vmatmul.mubr.msk.f32.gmra.mrb[136].mxu1 %vm61_vm1, %v3744_v30  ;;  %v6855_v14 = vmax.f32 %v5586_v24, %v5588_v25  ;;  %v6856_v17 = vmax.f32 %v5592_v27, %v5594_v34 }
 0x116   :  { %6813 = vst [vmem:[#allocation12_spill] sm:$0xff] %v5838_v12  ;;  %6814 = vst [vmem:[#allocation13_spill] sm:$0xff] %v5840_v52  ;;  %v6857_v24 = vmax.f32 %v5614_v45, %v5616_v46  ;;  %v6858_v27 = vmax.f32 %v5620_v54, %v5622_v55  ;;  %v6859_v45 = vmax.f32 %v5642_v10, %v5644_v11 }
 0x117   :  { %v6860_v54 = vmax.f32 %v5648_v13, %v5650_v20  ;;  %v6861_v10 = vmax.f32 %v5670_v43, %v5672_v44  ;;  %v6862_v13 = vmax.f32 %v5676_v1, %v5678_v2  ;;  %v6863_v43 = vmax.f32 %v5698_v3, %v5700_v36 }
 0x118   :  { %v5846_v42 = vpop.f32.mrb[32].mxu0  ;;  %v5848_v26 = vpop.f32.mrb[32].mxu1  ;;  %v6864_v1 = vmax.f32 %v5704_v37, %v5706_v56  ;;  %v6865_v3 = vmax.f32 %v5726_v53, %v5728_v22  ;;  %v6867_v56 = vmax.f32 %v5732_v23, %v5734_v19  ;;  %v6870_v53 = vmax.f32 %v5754_v16, %v5756_v21  ;;  %v6876_v16 = vld [vmem:[#allocation2_spill] sm:$0xff]  ;;  %v6877_v21 = vld [vmem:[#allocation3_spill] sm:$0xff] }
 0x119   :  { %6815 = vst [vmem:[#allocation14_spill] sm:$0xff] %v5846_v42  ;;  %6816 = vst [vmem:[#allocation15_spill] sm:$0xff] %v5848_v26  ;;  %v5852_v59 = vpop.f32.mrb[33].mxu0  ;;  %v5854_v49 = vpop.f32.mrb[33].mxu1  ;;  %v6873_v19 = vmax.f32 %v5760_v63, %v5762_v62  ;;  %v6881_v62 = vld [vmem:[#allocation4_spill] sm:$0xff]  ;;  %v6882_v63 = vld [vmem:[#allocation5_spill] sm:$0xff] }
 0x11a   :  { %6817 = vst [vmem:[#allocation16_spill] sm:$0xff] %v5852_v59  ;;  %6818 = vst [vmem:[#allocation17_spill] sm:$0xff] %v5854_v49 }
 0x11c   :  { %v5858_v35 = vpop.f32.mrb[34].mxu0  ;;  %v5860_v30 = vpop.f32.mrb[34].mxu1 }
 0x11d   :  { %6819 = vst [vmem:[#allocation18_spill] sm:$0xff] %v5858_v35  ;;  %6820 = vst [vmem:[#allocation19_spill] sm:$0xff] %v5860_v30  ;;  %v5864_v52 = vpop.f32.mrb[35].mxu0  ;;  %v5866_v12 = vpop.f32.mrb[35].mxu1 }
 0x11e   :  { %6821 = vst [vmem:[#allocation20_spill] sm:$0xff] %v5864_v52  ;;  %6822 = vst [vmem:[#allocation21_spill] sm:$0xff] %v5866_v12 }
 0x120   :  { %v5870_v26 = vpop.f32.mrb[36].mxu0  ;;  %v5872_v42 = vpop.f32.mrb[36].mxu1 }
 0x121   :  { %6823 = vst [vmem:[#allocation22_spill] sm:$0xff] %v5870_v26  ;;  %6824 = vst [vmem:[#allocation23_spill] sm:$0xff] %v5872_v42  ;;  %v5876_v49 = vpop.f32.mrb[37].mxu0  ;;  %v5878_v59 = vpop.f32.mrb[37].mxu1 }
 0x122   :  { %6825 = vst [vmem:[#allocation24_spill] sm:$0xff] %v5876_v49  ;;  %6826 = vst [vmem:[#allocation25_spill] sm:$0xff] %v5878_v59 }
 0x124   :  { %v5882_v30 = vpop.f32.mrb[38].mxu0  ;;  %v5884_v35 = vpop.f32.mrb[38].mxu1 }
 0x125   :  { %6827 = vst [vmem:[#allocation26_spill] sm:$0xff] %v5882_v30  ;;  %6828 = vst [vmem:[#allocation27_spill] sm:$0xff] %v5884_v35  ;;  %v5888_v12 = vpop.f32.mrb[39].mxu0  ;;  %v5890_v52 = vpop.f32.mrb[39].mxu1 }
 0x126   :  { %6829 = vst [vmem:[#allocation28_spill] sm:$0xff] %v5888_v12  ;;  %6830 = vst [vmem:[#allocation29_spill] sm:$0xff] %v5890_v52 }
 0x128   :  { %v5894_v42 = vpop.f32.mrb[40].mxu0  ;;  %v5896_v26 = vpop.f32.mrb[40].mxu1 }
 0x129   :  { %6831 = vst [vmem:[#allocation30_spill] sm:$0xff] %v5894_v42  ;;  %6832 = vst [vmem:[#allocation31_spill] sm:$0xff] %v5896_v26  ;;  %v5900_v59 = vpop.f32.mrb[41].mxu0  ;;  %v5902_v49 = vpop.f32.mrb[41].mxu1 }
 0x12a   :  { %6833 = vst [vmem:[#allocation32_spill] sm:$0xff] %v5900_v59  ;;  %6834 = vst [vmem:[#allocation33_spill] sm:$0xff] %v5902_v49 }
 0x12c   :  { %v5906_v35 = vpop.f32.mrb[42].mxu0  ;;  %v5908_v30 = vpop.f32.mrb[42].mxu1 }
 0x12d   :  { %6835 = vst [vmem:[#allocation34_spill] sm:$0xff] %v5906_v35  ;;  %6836 = vst [vmem:[#allocation35_spill] sm:$0xff] %v5908_v30  ;;  %v5912_v52 = vpop.f32.mrb[43].mxu0  ;;  %v5914_v12 = vpop.f32.mrb[43].mxu1 }
 0x12e   :  { %6837 = vst [vmem:[#allocation36_spill] sm:$0xff] %v5912_v52  ;;  %6838 = vst [vmem:[#allocation37_spill] sm:$0xff] %v5914_v12 }
 0x130   :  { %v5918_v26 = vpop.f32.mrb[44].mxu0  ;;  %v5920_v42 = vpop.f32.mrb[44].mxu1 }
 0x131   :  { %6839 = vst [vmem:[#allocation38_spill] sm:$0xff] %v5918_v26  ;;  %6840 = vst [vmem:[#allocation39_spill] sm:$0xff] %v5920_v42  ;;  %v5924_v49 = vpop.f32.mrb[45].mxu0  ;;  %v5926_v59 = vpop.f32.mrb[45].mxu1 }
 0x132   :  { %6841 = vst [vmem:[#allocation40_spill] sm:$0xff] %v5924_v49  ;;  %6842 = vst [vmem:[#allocation41_spill] sm:$0xff] %v5926_v59 }
 0x134   :  { %v4221_v30 = vpop.f32.mrb[46].mxu0  ;;  %v5930_v35 = vpop.f32.mrb[46].mxu1 }
 0x135   :  { %v5935_v12 = vmax.f32 %v6843_v6, %v4221_v30  ;;  %v1276_v52 = vpop.f32.mrb[47].mxu0  ;;  %v5937_v9 = vpop.f32.mrb[47].mxu1 }
 0x136   :  { %v5942_v42 = vmax.f32 %v6844_v0, %v1276_v52 }
 0x138   :  { %v4224_v59 = vpop.f32.mrb[48].mxu0  ;;  %v5948_v49 = vpop.f32.mrb[48].mxu1 }
 0x139   :  { %v5953_v29 = vmax.f32 %v6845_v28, %v4224_v59  ;;  %v1286_v6 = vpop.f32.mrb[49].mxu0  ;;  %v5955_v30 = vpop.f32.mrb[49].mxu1 }
 0x13a   :  { %v5960_v32 = vmax.f32 %v6846_v31, %v1286_v6 }
 0x13c   :  { %v4227_v33 = vpop.f32.mrb[50].mxu0  ;;  %v5966_v26 = vpop.f32.mrb[50].mxu1 }
 0x13d   :  { %v5971_v39 = vmax.f32 %v6847_v38, %v4227_v33  ;;  %v1296_v59 = vpop.f32.mrb[51].mxu0  ;;  %v5973_v28 = vpop.f32.mrb[51].mxu1 }
 0x13e   :  { %v5978_v41 = vmax.f32 %v6848_v40, %v1296_v59 }
 0x140   :  { %v4230_v52 = vpop.f32.mrb[52].mxu0  ;;  %v5984_v0 = vpop.f32.mrb[52].mxu1 }
 0x141   :  { %v5989_v48 = vmax.f32 %v6849_v47, %v4230_v52  ;;  %v1306_v33 = vpop.f32.mrb[53].mxu0  ;;  %v5991_v38 = vpop.f32.mrb[53].mxu1 }
 0x142   :  { %v5996_v51 = vmax.f32 %v6850_v50, %v1306_v33 }
 0x144   :  { %v4233_v31 = vpop.f32.mrb[54].mxu0  ;;  %v6002_v6 = vpop.f32.mrb[54].mxu1 }
 0x145   :  { %v6007_v58 = vmax.f32 %v6851_v57, %v4233_v31  ;;  %v1316_v52 = vpop.f32.mrb[55].mxu0  ;;  %v6009_v47 = vpop.f32.mrb[55].mxu1 }
 0x146   :  { %v6014_v61 = vmax.f32 %v6852_v60, %v1316_v52 }
 0x148   :  { %v4236_v40 = vpop.f32.mrb[56].mxu0  ;;  %v6020_v59 = vpop.f32.mrb[56].mxu1 }
 0x149   :  { %v6025_v5 = vmax.f32 %v6853_v4, %v4236_v40  ;;  %v1326_v31 = vpop.f32.mrb[57].mxu0  ;;  %v6027_v57 = vpop.f32.mrb[57].mxu1 }
 0x14a   :  { %v6032_v8 = vmax.f32 %v6854_v7, %v1326_v31 }
 0x14c   :  { %v4239_v50 = vpop.f32.mrb[58].mxu0  ;;  %v6038_v33 = vpop.f32.mrb[58].mxu1 }
 0x14d   :  { %v6043_v15 = vmax.f32 %v6855_v14, %v4239_v50  ;;  %v1336_v40 = vpop.f32.mrb[59].mxu0  ;;  %v6045_v4 = vpop.f32.mrb[59].mxu1 }
 0x14e   :  { %v6050_v18 = vmax.f32 %v6856_v17, %v1336_v40 }
 0x150   :  { %v4242_v60 = vpop.f32.mrb[60].mxu0  ;;  %v6056_v52 = vpop.f32.mrb[60].mxu1 }
 0x151   :  { %v6061_v25 = vmax.f32 %v6857_v24, %v4242_v60  ;;  %v1346_v50 = vpop.f32.mrb[61].mxu0  ;;  %v6063_v14 = vpop.f32.mrb[61].mxu1 }
 0x152   :  { %v6068_v34 = vmax.f32 %v6858_v27, %v1346_v50 }
 0x154   :  { %v4245_v7 = vpop.f32.mrb[62].mxu0  ;;  %v6074_v31 = vpop.f32.mrb[62].mxu1 }
 0x155   :  { %v6079_v46 = vmax.f32 %v6859_v45, %v4245_v7  ;;  %v1356_v60 = vpop.f32.mrb[63].mxu0  ;;  %v6081_v24 = vpop.f32.mrb[63].mxu1 }
 0x156   :  { %v6086_v55 = vmax.f32 %v6860_v54, %v1356_v60 }
 0x158   :  { %v4248_v17 = vpop.f32.mrb[64].mxu0  ;;  %v6092_v40 = vpop.f32.mrb[64].mxu1 }
 0x159   :  { %v6097_v11 = vmax.f32 %v6861_v10, %v4248_v17  ;;  %v1366_v7 = vpop.f32.mrb[65].mxu0  ;;  %v6099_v45 = vpop.f32.mrb[65].mxu1 }
 0x15a   :  { %v6104_v20 = vmax.f32 %v6862_v13, %v1366_v7 }
 0x15c   :  { %v4251_v27 = vpop.f32.mrb[66].mxu0  ;;  %v6110_v50 = vpop.f32.mrb[66].mxu1 }
 0x15d   :  { %v6115_v44 = vmax.f32 %v6863_v43, %v4251_v27  ;;  %v1376_v17 = vpop.f32.mrb[67].mxu0  ;;  %v6117_v10 = vpop.f32.mrb[67].mxu1 }
 0x15e   :  { %v6122_v2 = vmax.f32 %v6864_v1, %v1376_v17 }
 0x160   :  { %v4254_v54 = vpop.f32.mrb[68].mxu0  ;;  %v6128_v60 = vpop.f32.mrb[68].mxu1 }
 0x161   :  { %v6133_v36 = vmax.f32 %v6865_v3, %v4254_v54  ;;  %v1386_v27 = vpop.f32.mrb[69].mxu0  ;;  %v6135_v43 = vpop.f32.mrb[69].mxu1 }
 0x162   :  { %6866 = vst [vmem:[#allocation42_spill] sm:$0xff] %v6135_v43  ;;  %v6140_v37 = vmax.f32 %v6867_v56, %v1386_v27 }
 0x164   :  { %6868 = vst [vmem:[#allocation43_spill] sm:$0xff] %v6140_v37  ;;  %v4257_v13 = vpop.f32.mrb[70].mxu0  ;;  %v6146_v7 = vpop.f32.mrb[70].mxu1 }
 0x165   :  { %6869 = vst [vmem:[#allocation44_spill] sm:$0xff] %v6146_v7  ;;  %v6151_v22 = vmax.f32 %v6870_v53, %v4257_v13  ;;  %v1396_v54 = vpop.f32.mrb[71].mxu0  ;;  %v6153_v3 = vpop.f32.mrb[71].mxu1  ;;  %v6878_v13 = vmax.f32 %v6876_v16, %v6877_v21  ;;  %v6886_v16 = vld [vmem:[#allocation6_spill] sm:$0xff] }
 0x166   :  { %6872 = vst [vmem:[#allocation46_spill] sm:$0xff] %v6153_v3  ;;  %v6158_v23 = vmax.f32 %v6873_v19, %v1396_v54  ;;  %v6883_v54 = vmax.f32 %v6881_v62, %v6882_v63  ;;  %v6891_v62 = vld [vmem:[#allocation8_spill] sm:$0xff] }
 0x167   :  { %6871 = vst [vmem:[#allocation45_spill] sm:$0xff] %v6151_v22 }
 0x168   :  { %6874 = vst [vmem:[#allocation47_spill] sm:$0xff] %v6158_v23  ;;  %v4260_v1 = vpop.f32.mrb[72].mxu0  ;;  %v6164_v17 = vpop.f32.mrb[72].mxu1 }
 0x169   :  { %6875 = vst [vmem:[#allocation48_spill] sm:$0xff] %v6164_v17  ;;  %v6169_v53 = vmax.f32 %v6878_v13, %v4260_v1  ;;  %v1406_v43 = vpop.f32.mrb[73].mxu0  ;;  %v6171_v37 = vpop.f32.mrb[73].mxu1  ;;  %v6887_v1 = vld [vmem:[#allocation7_spill] sm:$0xff] }
 0x16a   :  { %6880 = vst [vmem:[#allocation3_spill] sm:$0xff] %v6171_v37  ;;  %v6176_v19 = vmax.f32 %v6883_v54, %v1406_v43  ;;  %v6888_v21 = vmax.f32 %v6886_v16, %v6887_v1  ;;  %v6892_v43 = vld [vmem:[#allocation9_spill] sm:$0xff]  ;;  %v6896_v16 = vld [vmem:[#allocation10_spill] sm:$0xff] }
 0x16b   :  { %6879 = vst [vmem:[#allocation2_spill] sm:$0xff] %v6169_v53  ;;  %v6893_v63 = vmax.f32 %v6891_v62, %v6892_v43  ;;  %v6901_v62 = vld [vmem:[#allocation12_spill] sm:$0xff] }
 0x16c   :  { %6884 = vst [vmem:[#allocation4_spill] sm:$0xff] %v6176_v19  ;;  %v4263_v3 = vpop.f32.mrb[74].mxu0  ;;  %v6182_v23 = vpop.f32.mrb[74].mxu1 }
 0x16d   :  { %6885 = vst [vmem:[#allocation5_spill] sm:$0xff] %v6182_v23  ;;  %v6187_v13 = vmax.f32 %v6888_v21, %v4263_v3  ;;  %v1416_v7 = vpop.f32.mrb[75].mxu0  ;;  %v6189_v22 = vpop.f32.mrb[75].mxu1  ;;  %v6897_v3 = vld [vmem:[#allocation11_spill] sm:$0xff] }
 0x16e   :  { %6890 = vst [vmem:[#allocation7_spill] sm:$0xff] %v6189_v22  ;;  %v6194_v54 = vmax.f32 %v6893_v63, %v1416_v7  ;;  %v6898_v1 = vmax.f32 %v6896_v16, %v6897_v3  ;;  %v6902_v7 = vld [vmem:[#allocation13_spill] sm:$0xff]  ;;  %v6906_v16 = vld [vmem:[#allocation14_spill] sm:$0xff] }
 0x16f   :  { %6889 = vst [vmem:[#allocation6_spill] sm:$0xff] %v6187_v13  ;;  %v6903_v43 = vmax.f32 %v6901_v62, %v6902_v7  ;;  %v6911_v62 = vld [vmem:[#allocation16_spill] sm:$0xff] }
 0x170   :  { %6894 = vst [vmem:[#allocation8_spill] sm:$0xff] %v6194_v54  ;;  %v4266_v37 = vpop.f32.mrb[76].mxu0  ;;  %v6200_v19 = vpop.f32.mrb[76].mxu1 }
 0x171   :  { %6895 = vst [vmem:[#allocation9_spill] sm:$0xff] %v6200_v19  ;;  %v6205_v21 = vmax.f32 %v6898_v1, %v4266_v37  ;;  %v1426_v17 = vpop.f32.mrb[77].mxu0  ;;  %v6207_v53 = vpop.f32.mrb[77].mxu1  ;;  %v6907_v37 = vld [vmem:[#allocation15_spill] sm:$0xff] }
 0x172   :  { %6900 = vst [vmem:[#allocation11_spill] sm:$0xff] %v6207_v53  ;;  %v6212_v63 = vmax.f32 %v6903_v43, %v1426_v17  ;;  %v6908_v3 = vmax.f32 %v6906_v16, %v6907_v37  ;;  %v6912_v17 = vld [vmem:[#allocation17_spill] sm:$0xff]  ;;  %v6916_v16 = vld [vmem:[#allocation18_spill] sm:$0xff] }
 0x173   :  { %6899 = vst [vmem:[#allocation10_spill] sm:$0xff] %v6205_v21  ;;  %v6913_v7 = vmax.f32 %v6911_v62, %v6912_v17  ;;  %v6921_v62 = vld [vmem:[#allocation20_spill] sm:$0xff] }
 0x174   :  { %6904 = vst [vmem:[#allocation12_spill] sm:$0xff] %v6212_v63  ;;  %v4269_v22 = vpop.f32.mrb[78].mxu0  ;;  %v6218_v54 = vpop.f32.mrb[78].mxu1 }
 0x175   :  { %6905 = vst [vmem:[#allocation13_spill] sm:$0xff] %v6218_v54  ;;  %v6223_v1 = vmax.f32 %v6908_v3, %v4269_v22  ;;  %v1436_v23 = vpop.f32.mrb[79].mxu0  ;;  %v6225_v13 = vpop.f32.mrb[79].mxu1  ;;  %v6917_v22 = vld [vmem:[#allocation19_spill] sm:$0xff] }
 0x176   :  { %6910 = vst [vmem:[#allocation15_spill] sm:$0xff] %v6225_v13  ;;  %v6230_v43 = vmax.f32 %v6913_v7, %v1436_v23  ;;  %v6918_v37 = vmax.f32 %v6916_v16, %v6917_v22  ;;  %v6922_v23 = vld [vmem:[#allocation21_spill] sm:$0xff]  ;;  %v6926_v16 = vld [vmem:[#allocation22_spill] sm:$0xff] }
 0x177   :  { %6909 = vst [vmem:[#allocation14_spill] sm:$0xff] %v6223_v1  ;;  %v6923_v17 = vmax.f32 %v6921_v62, %v6922_v23  ;;  %v6931_v62 = vld [vmem:[#allocation24_spill] sm:$0xff] }
 0x178   :  { %6914 = vst [vmem:[#allocation16_spill] sm:$0xff] %v6230_v43  ;;  %v4272_v53 = vpop.f32.mrb[80].mxu0  ;;  %v6236_v63 = vpop.f32.mrb[80].mxu1 }
 0x179   :  { %6915 = vst [vmem:[#allocation17_spill] sm:$0xff] %v6236_v63  ;;  %v6241_v3 = vmax.f32 %v6918_v37, %v4272_v53  ;;  %v1446_v19 = vpop.f32.mrb[81].mxu0  ;;  %v6243_v21 = vpop.f32.mrb[81].mxu1  ;;  %v6927_v53 = vld [vmem:[#allocation23_spill] sm:$0xff] }
 0x17a   :  { %6920 = vst [vmem:[#allocation19_spill] sm:$0xff] %v6243_v21  ;;  %v6248_v7 = vmax.f32 %v6923_v17, %v1446_v19  ;;  %v6928_v22 = vmax.f32 %v6926_v16, %v6927_v53  ;;  %v6932_v19 = vld [vmem:[#allocation25_spill] sm:$0xff]  ;;  %v6936_v16 = vld [vmem:[#allocation26_spill] sm:$0xff] }
 0x17b   :  { %6919 = vst [vmem:[#allocation18_spill] sm:$0xff] %v6241_v3  ;;  %v6933_v23 = vmax.f32 %v6931_v62, %v6932_v19  ;;  %v6941_v62 = vld [vmem:[#allocation28_spill] sm:$0xff] }
 0x17c   :  { %6924 = vst [vmem:[#allocation20_spill] sm:$0xff] %v6248_v7  ;;  %v4275_v13 = vpop.f32.mrb[82].mxu0  ;;  %v6254_v43 = vpop.f32.mrb[82].mxu1 }
 0x17d   :  { %6925 = vst [vmem:[#allocation21_spill] sm:$0xff] %v6254_v43  ;;  %v6259_v37 = vmax.f32 %v6928_v22, %v4275_v13  ;;  %v1456_v54 = vpop.f32.mrb[83].mxu0  ;;  %v6261_v1 = vpop.f32.mrb[83].mxu1  ;;  %v6937_v13 = vld [vmem:[#allocation27_spill] sm:$0xff] }
 0x17e   :  { %6930 = vst [vmem:[#allocation23_spill] sm:$0xff] %v6261_v1  ;;  %v6266_v17 = vmax.f32 %v6933_v23, %v1456_v54  ;;  %v6938_v53 = vmax.f32 %v6936_v16, %v6937_v13  ;;  %v6942_v54 = vld [vmem:[#allocation29_spill] sm:$0xff]  ;;  %v6946_v16 = vld [vmem:[#allocation30_spill] sm:$0xff] }
 0x17f   :  { %6929 = vst [vmem:[#allocation22_spill] sm:$0xff] %v6259_v37  ;;  %v6943_v19 = vmax.f32 %v6941_v62, %v6942_v54  ;;  %v6951_v62 = vld [vmem:[#allocation32_spill] sm:$0xff] }
 0x180   :  { %6934 = vst [vmem:[#allocation24_spill] sm:$0xff] %v6266_v17  ;;  %v4278_v21 = vpop.f32.mrb[84].mxu0  ;;  %v6272_v7 = vpop.f32.mrb[84].mxu1 }
 0x181   :  { %6935 = vst [vmem:[#allocation25_spill] sm:$0xff] %v6272_v7  ;;  %v6277_v22 = vmax.f32 %v6938_v53, %v4278_v21  ;;  %v1466_v63 = vpop.f32.mrb[85].mxu0  ;;  %v6279_v3 = vpop.f32.mrb[85].mxu1  ;;  %v6947_v21 = vld [vmem:[#allocation31_spill] sm:$0xff] }
 0x182   :  { %6940 = vst [vmem:[#allocation27_spill] sm:$0xff] %v6279_v3  ;;  %v6284_v23 = vmax.f32 %v6943_v19, %v1466_v63  ;;  %v6948_v13 = vmax.f32 %v6946_v16, %v6947_v21  ;;  %v6952_v63 = vld [vmem:[#allocation33_spill] sm:$0xff]  ;;  %v6956_v16 = vld [vmem:[#allocation34_spill] sm:$0xff] }
 0x183   :  { %6939 = vst [vmem:[#allocation26_spill] sm:$0xff] %v6277_v22  ;;  %v6953_v54 = vmax.f32 %v6951_v62, %v6952_v63  ;;  %v6960_v62 = vld [vmem:[#allocation36_spill] sm:$0xff] }
 0x184   :  { %6944 = vst [vmem:[#allocation28_spill] sm:$0xff] %v6284_v23  ;;  %v4281_v1 = vpop.f32.mrb[86].mxu0  ;;  %v6290_v17 = vpop.f32.mrb[86].mxu1 }
 0x185   :  { %6945 = vst [vmem:[#allocation29_spill] sm:$0xff] %v6290_v17  ;;  %v6295_v53 = vmax.f32 %v6948_v13, %v4281_v1  ;;  %v1476_v43 = vpop.f32.mrb[87].mxu0  ;;  %v6297_v37 = vpop.f32.mrb[87].mxu1  ;;  %v6957_v1 = vld [vmem:[#allocation35_spill] sm:$0xff] }
 0x186   :  { %6950 = vst [vmem:[#allocation31_spill] sm:$0xff] %v6297_v37  ;;  %v6302_v19 = vmax.f32 %v6953_v54, %v1476_v43  ;;  %v6958_v21 = vmax.f32 %v6956_v16, %v6957_v1  ;;  %v6961_v43 = vld [vmem:[#allocation37_spill] sm:$0xff]  ;;  %v6964_v16 = vld [vmem:[#allocation38_spill] sm:$0xff] }
 0x187   :  { %6949 = vst [vmem:[#allocation30_spill] sm:$0xff] %v6295_v53  ;;  %v6962_v63 = vmax.f32 %v6960_v62, %v6961_v43  ;;  %v6968_v62 = vld [vmem:[#allocation40_spill] sm:$0xff] }
 0x188   :  { %6954 = vst [vmem:[#allocation32_spill] sm:$0xff] %v6302_v19  ;;  %v4284_v3 = vpop.f32.mrb[88].mxu0  ;;  %v6308_v23 = vpop.f32.mrb[88].mxu1 }
 0x189   :  { %6955 = vst [vmem:[#allocation33_spill] sm:$0xff] %v6308_v23  ;;  %v6313_v13 = vmax.f32 %v6958_v21, %v4284_v3  ;;  %v1486_v7 = vpop.f32.mrb[89].mxu0  ;;  %v6315_v22 = vpop.f32.mrb[89].mxu1  ;;  %v6965_v3 = vld [vmem:[#allocation39_spill] sm:$0xff]  ;;  %v6973_v23 = vmax.f32 %v5942_v42, %v5937_v9  ;;  %v6975_v9 = vmax.f32 %v5960_v32, %v5955_v30 }
 0x18a   :  { %6959 = vst [vmem:[#allocation34_spill] sm:$0xff] %v6315_v22  ;;  %v6320_v54 = vmax.f32 %v6962_v63, %v1486_v7  ;;  %v6966_v1 = vmax.f32 %v6964_v16, %v6965_v3  ;;  %v6969_v7 = vld [vmem:[#allocation41_spill] sm:$0xff] }
 0x18b   :  { %v6970_v43 = vmax.f32 %v6968_v62, %v6969_v7 }
 0x18c   :  { %6963 = vst [vmem:[#allocation35_spill] sm:$0xff] %v6320_v54  ;;  %v4287_v37 = vpop.f32.mrb[90].mxu0  ;;  %v6326_v19 = vpop.f32.mrb[90].mxu1 }
 0x18d   :  { %v6331_v21 = vmax.f32 %v6966_v1, %v4287_v37  ;;  %v1496_v17 = vpop.f32.mrb[91].mxu0  ;;  %v6333_v53 = vpop.f32.mrb[91].mxu1  ;;  %v6972_v37 = vmax.f32 %v5935_v12, %v5930_v35  ;;  %v6974_v12 = vmax.f32 %v5953_v29, %v5948_v49  ;;  %v6976_v29 = vmax.f32 %v5971_v39, %v5966_v26 }
 0x18e   :  { %6967 = vst [vmem:[#allocation36_spill] sm:$0xff] %v6333_v53  ;;  %v6338_v63 = vmax.f32 %v6970_v43, %v1496_v17  ;;  %v6353_v17 = vld [vmem:[%s6718_s2] ss:$0 sm:$0xff] }
 0x190   :  { %6971 = vst [vmem:[#allocation37_spill] sm:$0xff] %v6338_v63  ;;  %v4363_v22 = vpop.f32.mrb[92].mxu0  ;;  %v4434_v54 = vpop.f32.mrb[92].mxu1 }
 0x191   :  { %v2558_v16 = vmax.f32 %v6972_v37, %v4363_v22  ;;  %v2328_v3 = vpop.f32.mrb[93].mxu0  ;;  %v2854_v1 = vpop.f32.mrb[93].mxu1 }
 0x192   :  { %v2557_v62 = vmax.f32 %v6973_v23, %v2328_v3 }
 0x193   :  { %v3084_v7 = vmax.f32 %v2558_v16, %v4434_v54 }
 0x194   :  { %v3083_v43 = vmax.f32 %v2557_v62, %v2854_v1  ;;  %v4366_v56 = vpop.f32.mrb[94].mxu0  ;;  %v4437_v27 = vpop.f32.mrb[94].mxu1 }
 0x195   :  { %v3137_v53 = vadd.f32 %v6353_v17, %v3084_v7  ;;  %v2560_v35 = vmax.f32 %v6974_v12, %v4366_v56  ;;  %v2338_v22 = vpop.f32.mrb[95].mxu0  ;;  %v2864_v37 = vpop.f32.mrb[95].mxu1 }
 0x196   :  { %v3136_v42 = vadd.f32 %v6353_v17, %v3083_v43  ;;  %v2559_v23 = vmax.f32 %v6975_v9, %v2338_v22 }
 0x197   :  { %v3183_v3 = vmax.f32 %v3137_v53, 0.0  ;;  %v3086_v54 = vmax.f32 %v2560_v35, %v4437_v27  ;;  %v6977_v27 = vmax.f32 %v5978_v41, %v5973_v28 }
 0x198   :  { %v3182_v16 = vmax.f32 %v3136_v42, 0.0  ;;  %v3085_v1 = vmax.f32 %v2559_v23, %v2864_v37  ;;  %v4369_v62 = vpop.f32.mrb[96].mxu0  ;;  %v4440_v63 = vpop.f32.mrb[96].mxu1  ;;  %v6978_v42 = vmax.f32 %v5989_v48, %v5984_v0 }
 0x199   :  { %3230 = vst.msk [vmem:[%s6719_s3 + $0x8] sm:$0xff] %vm3228_vm2, %v3183_v3  ;;  %v3139_v49 = vadd.f32 %v6353_v17, %v3086_v54  ;;  %v2562_v56 = vmax.f32 %v6976_v29, %v4369_v62  ;;  %v2348_v7 = vpop.f32.mrb[97].mxu0  ;;  %v2874_v30 = vpop.f32.mrb[97].mxu1  ;;  %v6980_v29 = vmax.f32 %v6007_v58, %v6002_v6 }
 0x19a   :  { %3229 = vst.msk [vmem:[%s6719_s3] sm:$0xff] %vm3228_vm2, %v3182_v16  ;;  %v3138_v32 = vadd.f32 %v6353_v17, %v3085_v1  ;;  %v2561_v53 = vmax.f32 %v6977_v27, %v2348_v7 }
 0x19b   :  { %v3185_v43 = vmax.f32 %v3139_v49, 0.0  ;;  %v3088_v12 = vmax.f32 %v2562_v56, %v4440_v63  ;;  %v6979_v63 = vmax.f32 %v5996_v51, %v5991_v38 }
 0x19c   :  { %v3184_v35 = vmax.f32 %v3138_v32, 0.0  ;;  %v3087_v22 = vmax.f32 %v2561_v53, %v2874_v30  ;;  %v4372_v37 = vpop.f32.mrb[98].mxu0  ;;  %v4443_v26 = vpop.f32.mrb[98].mxu1  ;;  %v6981_v30 = vmax.f32 %v6014_v61, %v6009_v47 }
 0x19d   :  { %3232 = vst.msk [vmem:[%s6719_s3 + $0x18] sm:$0xff] %vm3228_vm2, %v3185_v43  ;;  %v3141_v39 = vadd.f32 %v6353_v17, %v3088_v12  ;;  %v2564_v9 = vmax.f32 %v6978_v42, %v4372_v37  ;;  %v2358_v23 = vpop.f32.mrb[99].mxu0  ;;  %v2884_v28 = vpop.f32.mrb[99].mxu1 }
 0x19e   :  { %3231 = vst.msk [vmem:[%s6719_s3 + $0x10] sm:$0xff] %vm3228_vm2, %v3184_v35  ;;  %v3140_v41 = vadd.f32 %v6353_v17, %v3087_v22  ;;  %v2563_v3 = vmax.f32 %v6979_v63, %v2358_v23  ;;  %v6982_v22 = vmax.f32 %v6025_v5, %v6020_v59 }
 0x19f   :  { %v3187_v54 = vmax.f32 %v3141_v39, 0.0  ;;  %v3090_v16 = vmax.f32 %v2564_v9, %v4443_v26  ;;  %v6983_v39 = vmax.f32 %v6032_v8, %v6027_v57 }
 0x1a0   :  { %v3186_v1 = vmax.f32 %v3140_v41, 0.0  ;;  %v3089_v62 = vmax.f32 %v2563_v3, %v2884_v28  ;;  %v4375_v49 = vpop.f32.mrb[100].mxu0  ;;  %v4446_v0 = vpop.f32.mrb[100].mxu1  ;;  %v6984_v3 = vmax.f32 %v6043_v15, %v6038_v33 }
 0x1a1   :  { %3234 = vst.msk [vmem:[%s6719_s3 + $0x28] sm:$0xff] %vm3228_vm2, %v3187_v54  ;;  %v3143_v48 = vadd.f32 %v6353_v17, %v3090_v16  ;;  %v2566_v56 = vmax.f32 %v6980_v29, %v4375_v49  ;;  %v2368_v7 = vpop.f32.mrb[101].mxu0  ;;  %v2894_v38 = vpop.f32.mrb[101].mxu1 }
 0x1a2   :  { %3233 = vst.msk [vmem:[%s6719_s3 + $0x20] sm:$0xff] %vm3228_vm2, %v3186_v1  ;;  %v3142_v51 = vadd.f32 %v6353_v17, %v3089_v62  ;;  %v2565_v32 = vmax.f32 %v6981_v30, %v2368_v7  ;;  %v6985_v1 = vmax.f32 %v6050_v18, %v6045_v4  ;;  %v6986_v7 = vmax.f32 %v6061_v25, %v6056_v52 }
 0x1a3   :  { %v3189_v27 = vmax.f32 %v3143_v48, 0.0  ;;  %v3092_v53 = vmax.f32 %v2566_v56, %v4446_v0  ;;  %v6987_v30 = vmax.f32 %v6068_v34, %v6063_v14 }
 0x1a4   :  { %v3188_v43 = vmax.f32 %v3142_v51, 0.0  ;;  %v3091_v12 = vmax.f32 %v2565_v32, %v2894_v38  ;;  %v4378_v35 = vpop.f32.mrb[102].mxu0  ;;  %v4449_v6 = vpop.f32.mrb[102].mxu1 }
 0x1a5   :  { %3236 = vst.msk [vmem:[%s6719_s3 + $0x38] sm:$0xff] %vm3228_vm2, %v3189_v27  ;;  %v3145_v58 = vadd.f32 %v6353_v17, %v3092_v53  ;;  %v2568_v37 = vmax.f32 %v6982_v22, %v4378_v35  ;;  %v2378_v26 = vpop.f32.mrb[103].mxu0  ;;  %v2904_v47 = vpop.f32.mrb[103].mxu1 }
 0x1a6   :  { %3235 = vst.msk [vmem:[%s6719_s3 + $0x30] sm:$0xff] %vm3228_vm2, %v3188_v43  ;;  %v3144_v61 = vadd.f32 %v6353_v17, %v3091_v12  ;;  %v2567_v42 = vmax.f32 %v6983_v39, %v2378_v26 }
 0x1a7   :  { %v3191_v9 = vmax.f32 %v3145_v58, 0.0  ;;  %v3094_v23 = vmax.f32 %v2568_v37, %v4449_v6  ;;  %v6988_v6 = vmax.f32 %v6079_v46, %v6074_v31  ;;  %v6989_v37 = vmax.f32 %v6086_v55, %v6081_v24 }
 0x1a8   :  { %v3190_v28 = vmax.f32 %v3144_v61, 0.0  ;;  %v3093_v41 = vmax.f32 %v2567_v42, %v2904_v47  ;;  %v4381_v63 = vpop.f32.mrb[104].mxu0  ;;  %v4452_v59 = vpop.f32.mrb[104].mxu1 }
 0x1a9   :  { %3238 = vst.msk [vmem:[%s6719_s3 + $0x48] sm:$0xff] %vm3228_vm2, %v3191_v9  ;;  %v3147_v5 = vadd.f32 %v6353_v17, %v3094_v23  ;;  %v2570_v54 = vmax.f32 %v6984_v3, %v4381_v63  ;;  %v2388_v16 = vpop.f32.mrb[105].mxu0  ;;  %v2914_v57 = vpop.f32.mrb[105].mxu1  ;;  %v6990_v23 = vmax.f32 %v6097_v11, %v6092_v40  ;;  %v6991_v63 = vmax.f32 %v6104_v20, %v6099_v45 }
 0x1aa   :  { %3237 = vst.msk [vmem:[%s6719_s3 + $0x40] sm:$0xff] %vm3228_vm2, %v3190_v28  ;;  %v3146_v8 = vadd.f32 %v6353_v17, %v3093_v41  ;;  %v2569_v62 = vmax.f32 %v6985_v1, %v2388_v16 }
 0x1ab   :  { %v3193_v49 = vmax.f32 %v3147_v5, 0.0  ;;  %v3096_v0 = vmax.f32 %v2570_v54, %v4452_v59 }
 0x1ac   :  { %v3192_v48 = vmax.f32 %v3146_v8, 0.0  ;;  %v3095_v29 = vmax.f32 %v2569_v62, %v2914_v57  ;;  %v4384_v56 = vpop.f32.mrb[106].mxu0  ;;  %v4455_v33 = vpop.f32.mrb[106].mxu1  ;;  %v6992_v8 = vmax.f32 %v6115_v44, %v6110_v50 }
 0x1ad   :  { %3240 = vst.msk [vmem:[%s6719_s3 + $0x58] sm:$0xff] %vm3228_vm2, %v3193_v49  ;;  %v3149_v15 = vadd.f32 %v6353_v17, %v3096_v0  ;;  %v2572_v38 = vmax.f32 %v6986_v7, %v4384_v56  ;;  %v2398_v51 = vpop.f32.mrb[107].mxu0  ;;  %v2924_v4 = vpop.f32.mrb[107].mxu1  ;;  %v6993_v49 = vmax.f32 %v6122_v2, %v6117_v10  ;;  %v6994_v7 = vmax.f32 %v6133_v36, %v6128_v60 }
 0x1ae   :  { %3239 = vst.msk [vmem:[%s6719_s3 + $0x50] sm:$0xff] %vm3228_vm2, %v3192_v48  ;;  %v3148_v18 = vadd.f32 %v6353_v17, %v3095_v29  ;;  %v2571_v32 = vmax.f32 %v6987_v30, %v2398_v51 }
 0x1af   :  { %v3195_v27 = vmax.f32 %v3149_v15, 0.0  ;;  %v3098_v53 = vmax.f32 %v2572_v38, %v4455_v33 }
 0x1b0   :  { %v3194_v43 = vmax.f32 %v3148_v18, 0.0  ;;  %v3097_v12 = vmax.f32 %v2571_v32, %v2924_v4  ;;  %v4387_v35 = vpop.f32.mrb[108].mxu0  ;;  %v4458_v52 = vpop.f32.mrb[108].mxu1  ;;  %v6995_v4 = vld [vmem:[#allocation43_spill] sm:$0xff]  ;;  %v6996_v18 = vld [vmem:[#allocation42_spill] sm:$0xff] }
 0x1b1   :  { %3242 = vst.msk [vmem:[%s6719_s3 + $0x68] sm:$0xff] %vm3228_vm2, %v3195_v27  ;;  %v3151_v25 = vadd.f32 %v6353_v17, %v3098_v53  ;;  %v2574_v58 = vmax.f32 %v6988_v6, %v4387_v35  ;;  %v2408_v22 = vpop.f32.mrb[109].mxu0  ;;  %v2934_v14 = vpop.f32.mrb[109].mxu1  ;;  %v6997_v30 = vmax.f32 %v6995_v4, %v6996_v18 }
 0x1b2   :  { %3241 = vst.msk [vmem:[%s6719_s3 + $0x60] sm:$0xff] %vm3228_vm2, %v3194_v43  ;;  %v3150_v34 = vadd.f32 %v6353_v17, %v3097_v12  ;;  %v2573_v26 = vmax.f32 %v6989_v37, %v2408_v22  ;;  %v7001_v37 = vld [vmem:[#allocation47_spill] sm:$0xff] }
 0x1b3   :  { %v3197_v47 = vmax.f32 %v3151_v25, 0.0  ;;  %v3100_v61 = vmax.f32 %v2574_v58, %v4458_v52  ;;  %v6998_v52 = vld [vmem:[#allocation45_spill] sm:$0xff]  ;;  %v6999_v25 = vld [vmem:[#allocation44_spill] sm:$0xff] }
 0x1b4   :  { %v3196_v39 = vmax.f32 %v3150_v34, 0.0  ;;  %v3099_v42 = vmax.f32 %v2573_v26, %v2934_v14  ;;  %v4390_v9 = vpop.f32.mrb[110].mxu0  ;;  %v4461_v31 = vpop.f32.mrb[110].mxu1  ;;  %v7000_v6 = vmax.f32 %v6998_v52, %v6999_v25  ;;  %v7002_v26 = vld [vmem:[#allocation46_spill] sm:$0xff]  ;;  %v7019_v25 = vld [vmem:[#allocation12_spill] sm:$0xff] }
 0x1b5   :  { %3244 = vst.msk [vmem:[%s6719_s3 + $0x78] sm:$0xff] %vm3228_vm2, %v3197_v47  ;;  %v3153_v46 = vadd.f32 %v6353_v17, %v3100_v61  ;;  %v2576_v28 = vmax.f32 %v6990_v23, %v4390_v9  ;;  %v2418_v41 = vpop.f32.mrb[111].mxu0  ;;  %v2944_v24 = vpop.f32.mrb[111].mxu1  ;;  %v7003_v47 = vmax.f32 %v7001_v37, %v7002_v26 }
 0x1b6   :  { %3243 = vst.msk [vmem:[%s6719_s3 + $0x70] sm:$0xff] %vm3228_vm2, %v3196_v39  ;;  %v3152_v55 = vadd.f32 %v6353_v17, %v3099_v42  ;;  %v2575_v59 = vmax.f32 %v6991_v63, %v2418_v41  ;;  %v7004_v41 = vld [vmem:[#allocation2_spill] sm:$0xff] }
 0x1b7   :  { %v3199_v5 = vmax.f32 %v3153_v46, 0.0  ;;  %v3102_v3 = vmax.f32 %v2576_v28, %v4461_v31 }
 0x1b8   :  { %v3198_v54 = vmax.f32 %v3152_v55, 0.0  ;;  %v3101_v16 = vmax.f32 %v2575_v59, %v2944_v24  ;;  %v4393_v57 = vpop.f32.mrb[112].mxu0  ;;  %v4464_v40 = vpop.f32.mrb[112].mxu1  ;;  %v7005_v24 = vld [vmem:[#allocation48_spill] sm:$0xff] }
 0x1b9   :  { %3246 = vst.msk [vmem:[%s6719_s3 + $0x88] sm:$0xff] %vm3228_vm2, %v3199_v5  ;;  %v3155_v11 = vadd.f32 %v6353_v17, %v3102_v3  ;;  %v2578_v1 = vmax.f32 %v6992_v8, %v4393_v57  ;;  %v2428_v62 = vpop.f32.mrb[113].mxu0  ;;  %v2954_v45 = vpop.f32.mrb[113].mxu1  ;;  %v7006_v55 = vmax.f32 %v7004_v41, %v7005_v24  ;;  %v7025_v24 = vld [vmem:[#allocation16_spill] sm:$0xff] }
 0x1ba   :  { %3245 = vst.msk [vmem:[%s6719_s3 + $0x80] sm:$0xff] %vm3228_vm2, %v3198_v54  ;;  %v3154_v20 = vadd.f32 %v6353_v17, %v3101_v16  ;;  %v2577_v0 = vmax.f32 %v6993_v49, %v2428_v62  ;;  %v7007_v54 = vld [vmem:[#allocation4_spill] sm:$0xff]  ;;  %v7008_v16 = vld [vmem:[#allocation3_spill] sm:$0xff] }
 0x1bb   :  { %v3201_v48 = vmax.f32 %v3155_v11, 0.0  ;;  %v3104_v29 = vmax.f32 %v2578_v1, %v4464_v40  ;;  %v7009_v57 = vmax.f32 %v7007_v54, %v7008_v16 }
 0x1bc   :  { %v3200_v56 = vmax.f32 %v3154_v20, 0.0  ;;  %v3103_v33 = vmax.f32 %v2577_v0, %v2954_v45  ;;  %v4396_v15 = vpop.f32.mrb[114].mxu0  ;;  %v4467_v50 = vpop.f32.mrb[114].mxu1  ;;  %v7010_v0 = vld [vmem:[#allocation6_spill] sm:$0xff] }
 0x1bd   :  { %3248 = vst.msk [vmem:[%s6719_s3 + $0x98] sm:$0xff] %vm3228_vm2, %v3201_v48  ;;  %v3157_v44 = vadd.f32 %v6353_v17, %v3104_v29  ;;  %v2580_v38 = vmax.f32 %v6994_v7, %v4396_v15  ;;  %v2438_v51 = vpop.f32.mrb[115].mxu0  ;;  %v2964_v10 = vpop.f32.mrb[115].mxu1  ;;  %v7011_v48 = vld [vmem:[#allocation5_spill] sm:$0xff]  ;;  %v7014_v7 = vld [vmem:[#allocation7_spill] sm:$0xff] }
 0x1be   :  { %3247 = vst.msk [vmem:[%s6719_s3 + $0x90] sm:$0xff] %vm3228_vm2, %v3200_v56  ;;  %v3156_v2 = vadd.f32 %v6353_v17, %v3103_v33  ;;  %v2579_v32 = vmax.f32 %v6997_v30, %v2438_v51  ;;  %v7012_v29 = vmax.f32 %v7010_v0, %v7011_v48  ;;  %v7031_v48 = vld [vmem:[#allocation20_spill] sm:$0xff] }
 0x1bf   :  { %v3203_v27 = vmax.f32 %v3157_v44, 0.0  ;;  %v3106_v53 = vmax.f32 %v2580_v38, %v4467_v50  ;;  %v7013_v44 = vld [vmem:[#allocation8_spill] sm:$0xff] }
 0x1c0   :  { %v3202_v43 = vmax.f32 %v3156_v2, 0.0  ;;  %v3105_v12 = vmax.f32 %v2579_v32, %v2964_v10  ;;  %v4399_v35 = vpop.f32.mrb[116].mxu0  ;;  %v4470_v60 = vpop.f32.mrb[116].mxu1  ;;  %v7015_v38 = vmax.f32 %v7013_v44, %v7014_v7 }
 0x1c1   :  { %3250 = vst.msk [vmem:[%s6719_s3 + $0xa8] sm:$0xff] %vm3228_vm2, %v3203_v27  ;;  %v3159_v36 = vadd.f32 %v6353_v17, %v3106_v53  ;;  %v2582_v58 = vmax.f32 %v7000_v6, %v4399_v35  ;;  %v2448_v22 = vpop.f32.mrb[117].mxu0  ;;  %v2974_v14 = vpop.f32.mrb[117].mxu1  ;;  %v7016_v53 = vld [vmem:[#allocation10_spill] sm:$0xff]  ;;  %v7020_v6 = vld [vmem:[#allocation11_spill] sm:$0xff] }
 0x1c2   :  { %3249 = vst.msk [vmem:[%s6719_s3 + $0xa0] sm:$0xff] %vm3228_vm2, %v3202_v43  ;;  %v3158_v34 = vadd.f32 %v6353_v17, %v3105_v12  ;;  %v2581_v61 = vmax.f32 %v7003_v47, %v2448_v22  ;;  %v7017_v43 = vld [vmem:[#allocation9_spill] sm:$0xff] }
 0x1c3   :  { %v3205_v39 = vmax.f32 %v3159_v36, 0.0  ;;  %v3108_v42 = vmax.f32 %v2582_v58, %v4470_v60  ;;  %v7018_v12 = vmax.f32 %v7016_v53, %v7017_v43  ;;  %v7021_v58 = vmax.f32 %v7019_v25, %v7020_v6  ;;  %v7037_v43 = vld [vmem:[#allocation24_spill] sm:$0xff] }
 0x1c4   :  { %v3204_v9 = vmax.f32 %v3158_v34, 0.0  ;;  %v3107_v31 = vmax.f32 %v2581_v61, %v2974_v14  ;;  %v4402_v46 = vpop.f32.mrb[118].mxu0  ;;  %v4473_v23 = vpop.f32.mrb[118].mxu1 }
 0x1c5   :  { %3252 = vst.msk [vmem:[%s6719_s3 + $0xb8] sm:$0xff] %vm3228_vm2, %v3205_v39  ;;  %v3161_v28 = vadd.f32 %v6353_v17, %v3108_v42  ;;  %v2584_v63 = vmax.f32 %v7006_v55, %v4402_v46  ;;  %v2458_v59 = vpop.f32.mrb[119].mxu0  ;;  %v2984_v5 = vpop.f32.mrb[119].mxu1  ;;  %v7022_v42 = vld [vmem:[#allocation14_spill] sm:$0xff]  ;;  %v7026_v55 = vld [vmem:[#allocation15_spill] sm:$0xff] }
 0x1c6   :  { %3251 = vst.msk [vmem:[%s6719_s3 + $0xb0] sm:$0xff] %vm3228_vm2, %v3204_v9  ;;  %v3160_v3 = vadd.f32 %v6353_v17, %v3107_v31  ;;  %v2583_v40 = vmax.f32 %v7009_v57, %v2458_v59  ;;  %v7023_v9 = vld [vmem:[#allocation13_spill] sm:$0xff] }
 0x1c7   :  { %v3207_v11 = vmax.f32 %v3161_v28, 0.0  ;;  %v3110_v8 = vmax.f32 %v2584_v63, %v4473_v23  ;;  %v7024_v31 = vmax.f32 %v7022_v42, %v7023_v9  ;;  %v7027_v63 = vmax.f32 %v7025_v24, %v7026_v55  ;;  %v7043_v9 = vld [vmem:[#allocation28_spill] sm:$0xff] }
 0x1c8   :  { %v3206_v1 = vmax.f32 %v3160_v3, 0.0  ;;  %v3109_v62 = vmax.f32 %v2583_v40, %v2984_v5  ;;  %v4405_v45 = vpop.f32.mrb[120].mxu0  ;;  %v4476_v20 = vpop.f32.mrb[120].mxu1 }
 0x1c9   :  { %3254 = vst.msk [vmem:[%s6719_s3 + $0xc8] sm:$0xff] %vm3228_vm2, %v3207_v11  ;;  %v3163_v49 = vadd.f32 %v6353_v17, %v3110_v8  ;;  %v2586_v56 = vmax.f32 %v7012_v29, %v4405_v45  ;;  %v2468_v33 = vpop.f32.mrb[121].mxu0  ;;  %v2994_v15 = vpop.f32.mrb[121].mxu1  ;;  %v7028_v8 = vld [vmem:[#allocation18_spill] sm:$0xff]  ;;  %v7032_v29 = vld [vmem:[#allocation19_spill] sm:$0xff] }
 0x1ca   :  { %3253 = vst.msk [vmem:[%s6719_s3 + $0xc0] sm:$0xff] %vm3228_vm2, %v3206_v1  ;;  %v3162_v50 = vadd.f32 %v6353_v17, %v3109_v62  ;;  %v2585_v51 = vmax.f32 %v7015_v38, %v2468_v33  ;;  %v7029_v1 = vld [vmem:[#allocation17_spill] sm:$0xff] }
 0x1cb   :  { %v3209_v10 = vmax.f32 %v3163_v49, 0.0  ;;  %v3112_v2 = vmax.f32 %v2586_v56, %v4476_v20  ;;  %v7030_v62 = vmax.f32 %v7028_v8, %v7029_v1  ;;  %v7033_v56 = vmax.f32 %v7031_v48, %v7032_v29  ;;  %v7049_v1 = vld [vmem:[#allocation32_spill] sm:$0xff] }
 0x1cc   :  { %v3208_v4 = vmax.f32 %v3162_v50, 0.0  ;;  %v3111_v18 = vmax.f32 %v2585_v51, %v2994_v15  ;;  %v4408_v30 = vpop.f32.mrb[122].mxu0  ;;  %v4479_v32 = vpop.f32.mrb[122].mxu1 }
 0x1cd   :  { %3256 = vst.msk [vmem:[%s6719_s3 + $0xd8] sm:$0xff] %vm3228_vm2, %v3209_v10  ;;  %v3165_v27 = vadd.f32 %v6353_v17, %v3112_v2  ;;  %v2588_v35 = vmax.f32 %v7018_v12, %v4408_v30  ;;  %v2478_v60 = vpop.f32.mrb[123].mxu0  ;;  %v3004_v36 = vpop.f32.mrb[123].mxu1  ;;  %v7034_v2 = vld [vmem:[#allocation22_spill] sm:$0xff]  ;;  %v7038_v12 = vld [vmem:[#allocation23_spill] sm:$0xff] }
 0x1ce   :  { %3255 = vst.msk [vmem:[%s6719_s3 + $0xd0] sm:$0xff] %vm3228_vm2, %v3208_v4  ;;  %v3164_v52 = vadd.f32 %v6353_v17, %v3111_v18  ;;  %v2587_v22 = vmax.f32 %v7021_v58, %v2478_v60  ;;  %v7035_v4 = vld [vmem:[#allocation21_spill] sm:$0xff] }
 0x1cf   :  { %v3211_v14 = vmax.f32 %v3165_v27, 0.0  ;;  %v3114_v34 = vmax.f32 %v2588_v35, %v4479_v32  ;;  %v7036_v18 = vmax.f32 %v7034_v2, %v7035_v4  ;;  %v7039_v35 = vmax.f32 %v7037_v43, %v7038_v12  ;;  %v7054_v2 = vld [vmem:[#allocation35_spill] sm:$0xff]  ;;  %v7055_v4 = vld [vmem:[#allocation34_spill] sm:$0xff] }
 0x1d0   :  { %v3210_v37 = vmax.f32 %v3164_v52, 0.0  ;;  %v3113_v26 = vmax.f32 %v2587_v22, %v3004_v36  ;;  %v4411_v47 = vpop.f32.mrb[124].mxu0  ;;  %v4482_v61 = vpop.f32.mrb[124].mxu1 }
 0x1d1   :  { %3258 = vst.msk [vmem:[%s6719_s3 + $0xe8] sm:$0xff] %vm3228_vm2, %v3211_v14  ;;  %v3167_v39 = vadd.f32 %v6353_v17, %v3114_v34  ;;  %v2590_v46 = vmax.f32 %v7024_v31, %v4411_v47  ;;  %v2488_v23 = vpop.f32.mrb[125].mxu0  ;;  %v3014_v28 = vpop.f32.mrb[125].mxu1  ;;  %v7040_v34 = vld [vmem:[#allocation26_spill] sm:$0xff]  ;;  %v7044_v31 = vld [vmem:[#allocation27_spill] sm:$0xff] }
 0x1d2   :  { %3257 = vst.msk [vmem:[%s6719_s3 + $0xe0] sm:$0xff] %vm3228_vm2, %v3210_v37  ;;  %v3166_v41 = vadd.f32 %v6353_v17, %v3113_v26  ;;  %v2589_v59 = vmax.f32 %v7027_v63, %v2488_v23  ;;  %v7041_v37 = vld [vmem:[#allocation25_spill] sm:$0xff] }
 0x1d3   :  { %v3213_v5 = vmax.f32 %v3167_v39, 0.0  ;;  %v3116_v3 = vmax.f32 %v2590_v46, %v4482_v61  ;;  %v7042_v26 = vmax.f32 %v7040_v34, %v7041_v37  ;;  %v7045_v46 = vmax.f32 %v7043_v9, %v7044_v31 }
 0x1d4   :  { %v3212_v54 = vmax.f32 %v3166_v41, 0.0  ;;  %v3115_v16 = vmax.f32 %v2589_v59, %v3014_v28  ;;  %v4414_v57 = vpop.f32.mrb[126].mxu0  ;;  %v4485_v40 = vpop.f32.mrb[126].mxu1 }
 0x1d5   :  { %3260 = vst.msk [vmem:[%s6719_s3 + $0xf8] sm:$0xff] %vm3228_vm2, %v3213_v5  ;;  %v3169_v11 = vadd.f32 %v6353_v17, %v3116_v3  ;;  %v2592_v45 = vmax.f32 %v7030_v62, %v4414_v57  ;;  %v2498_v20 = vpop.f32.mrb[127].mxu0  ;;  %v3024_v49 = vpop.f32.mrb[127].mxu1  ;;  %v7046_v3 = vld [vmem:[#allocation30_spill] sm:$0xff]  ;;  %v7050_v62 = vld [vmem:[#allocation31_spill] sm:$0xff] }
 0x1d6   :  { %3259 = vst.msk [vmem:[%s6719_s3 + $0xf0] sm:$0xff] %vm3228_vm2, %v3212_v54  ;;  %v3168_v0 = vadd.f32 %v6353_v17, %v3115_v16  ;;  %v2591_v33 = vmax.f32 %v7033_v56, %v2498_v20  ;;  %v7047_v54 = vld [vmem:[#allocation29_spill] sm:$0xff] }
 0x1d7   :  { %v3215_v15 = vmax.f32 %v3169_v11, 0.0  ;;  %v3118_v50 = vmax.f32 %v2592_v45, %v4485_v40  ;;  %v7048_v16 = vmax.f32 %v7046_v3, %v7047_v54  ;;  %v7051_v45 = vmax.f32 %v7049_v1, %v7050_v62 }
 0x1d8   :  { %v3214_v44 = vmax.f32 %v3168_v0, 0.0  ;;  %v3117_v7 = vmax.f32 %v2591_v33, %v3024_v49  ;;  %v4417_v38 = vpop.f32.mrb[128].mxu0  ;;  %v4488_v51 = vpop.f32.mrb[128].mxu1 }
 0x1d9   :  { %3262 = vst.msk [vmem:[%s6719_s3 + $0x108] sm:$0xff] %vm3228_vm2, %v3215_v15  ;;  %v3171_v10 = vadd.f32 %v6353_v17, %v3118_v50  ;;  %v2594_v30 = vmax.f32 %v7036_v18, %v4417_v38  ;;  %v2508_v32 = vpop.f32.mrb[129].mxu0  ;;  %v3034_v27 = vpop.f32.mrb[129].mxu1  ;;  %v7052_v50 = vld [vmem:[#allocation33_spill] sm:$0xff]  ;;  %v7056_v18 = vmax.f32 %v7054_v2, %v7055_v4 }
 0x1da   :  { %3261 = vst.msk [vmem:[%s6719_s3 + $0x100] sm:$0xff] %vm3228_vm2, %v3214_v44  ;;  %v3170_v53 = vadd.f32 %v6353_v17, %v3117_v7  ;;  %v2593_v60 = vmax.f32 %v7039_v35, %v2508_v32  ;;  %v7053_v44 = vmax.f32 %v6313_v13, %v7052_v50 }
 0x1db   :  { %v3217_v36 = vmax.f32 %v3171_v10, 0.0  ;;  %v3120_v52 = vmax.f32 %v2594_v30, %v4488_v51 }
 0x1dc   :  { %v3216_v25 = vmax.f32 %v3170_v53, 0.0  ;;  %v3119_v6 = vmax.f32 %v2593_v60, %v3034_v27  ;;  %v4420_v58 = vpop.f32.mrb[130].mxu0  ;;  %v4491_v22 = vpop.f32.mrb[130].mxu1  ;;  %v7057_v60 = vmax.f32 %v6331_v21, %v6326_v19 }
 0x1dd   :  { %3264 = vst.msk [vmem:[%s6719_s3 + $0x118] sm:$0xff] %vm3228_vm2, %v3217_v36  ;;  %v3173_v14 = vadd.f32 %v6353_v17, %v3120_v52  ;;  %v2596_v47 = vmax.f32 %v7042_v26, %v4420_v58  ;;  %v2518_v61 = vpop.f32.mrb[131].mxu0  ;;  %v3044_v39 = vpop.f32.mrb[131].mxu1  ;;  %v7058_v58 = vld [vmem:[#allocation37_spill] sm:$0xff] }
 0x1de   :  { %3263 = vst.msk [vmem:[%s6719_s3 + $0x110] sm:$0xff] %vm3228_vm2, %v3216_v25  ;;  %v3172_v42 = vadd.f32 %v6353_v17, %v3119_v6  ;;  %v2595_v23 = vmax.f32 %v7045_v46, %v2518_v61 }
 0x1df   :  { %v3219_v28 = vmax.f32 %v3173_v14, 0.0  ;;  %v3122_v41 = vmax.f32 %v2596_v47, %v4491_v22  ;;  %v7059_v22 = vld [vmem:[#allocation36_spill] sm:$0xff] }
 0x1e0   :  { %v3218_v24 = vmax.f32 %v3172_v42, 0.0  ;;  %v3121_v55 = vmax.f32 %v2595_v23, %v3044_v39  ;;  %v4423_v63 = vpop.f32.mrb[132].mxu0  ;;  %v4494_v59 = vpop.f32.mrb[132].mxu1  ;;  %v7060_v14 = vmax.f32 %v7058_v58, %v7059_v22 }
 0x1e1   :  { %3266 = vst.msk [vmem:[%s6719_s3 + $0x128] sm:$0xff] %vm3228_vm2, %v3219_v28  ;;  %v3175_v5 = vadd.f32 %v6353_v17, %v3122_v41  ;;  %v2598_v57 = vmax.f32 %v7048_v16, %v4423_v63  ;;  %v2528_v40 = vpop.f32.mrb[133].mxu0  ;;  %v3054_v11 = vpop.f32.mrb[133].mxu1 }
 0x1e2   :  { %3265 = vst.msk [vmem:[%s6719_s3 + $0x120] sm:$0xff] %vm3228_vm2, %v3218_v24  ;;  %v3174_v8 = vadd.f32 %v6353_v17, %v3121_v55  ;;  %v2597_v20 = vmax.f32 %v7051_v45, %v2528_v40 }
 0x1e3   :  { %v3221_v49 = vmax.f32 %v3175_v5, 0.0  ;;  %v3124_v0 = vmax.f32 %v2598_v57, %v4494_v59 }
 0x1e4   :  { %v3220_v48 = vmax.f32 %v3174_v8, 0.0  ;;  %v3123_v29 = vmax.f32 %v2597_v20, %v3054_v11  ;;  %v4426_v56 = vpop.f32.mrb[134].mxu0  ;;  %v4497_v33 = vpop.f32.mrb[134].mxu1 }
 0x1e5   :  { %3268 = vst.msk [vmem:[%s6719_s3 + $0x138] sm:$0xff] %vm3228_vm2, %v3221_v49  ;;  %v3177_v15 = vadd.f32 %v6353_v17, %v3124_v0  ;;  %v2600_v7 = vmax.f32 %v7053_v44, %v4426_v56  ;;  %v2538_v38 = vpop.f32.mrb[135].mxu0  ;;  %v3064_v51 = vpop.f32.mrb[135].mxu1 }
 0x1e6   :  { %3267 = vst.msk [vmem:[%s6719_s3 + $0x130] sm:$0xff] %vm3228_vm2, %v3220_v48  ;;  %v3176_v10 = vadd.f32 %v6353_v17, %v3123_v29  ;;  %v2599_v30 = vmax.f32 %v7056_v18, %v2538_v38 }
 0x1e7   :  { %v3223_v32 = vmax.f32 %v3177_v15, 0.0  ;;  %v3126_v27 = vmax.f32 %v2600_v7, %v4497_v33 }
 0x1e8   :  { %v3222_v53 = vmax.f32 %v3176_v10, 0.0  ;;  %v3125_v43 = vmax.f32 %v2599_v30, %v3064_v51  ;;  %v4429_v12 = vpop.f32.mrb[136].mxu0  ;;  %v4500_v13 = vpop.f32.mrb[136].mxu1 }
 0x1e9   :  { %3270 = vst.msk [vmem:[%s6719_s3 + $0x148] sm:$0xff] %vm3228_vm2, %v3223_v32  ;;  %v3179_v35 = vadd.f32 %v6353_v17, %v3126_v27  ;;  %v2602_v36 = vmax.f32 %v7057_v60, %v4429_v12  ;;  %v2548_v52 = vpop.f32.mrb[137].mxu0  ;;  %v3074_v25 = vpop.f32.mrb[137].mxu1 }
 0x1ea   :  { %3269 = vst.msk [vmem:[%s6719_s3 + $0x140] sm:$0xff] %vm3228_vm2, %v3222_v53  ;;  %v3178_v6 = vadd.f32 %v6353_v17, %v3125_v43  ;;  %v2601_v34 = vmax.f32 %v7060_v14, %v2548_v52 }
 0x1eb   :  { %v3225_v37 = vmax.f32 %v3179_v35, 0.0  ;;  %v3128_v26 = vmax.f32 %v2602_v36, %v4500_v13 }
 0x1ec   :  { %v3224_v47 = vmax.f32 %v3178_v6, 0.0  ;;  %v3127_v61 = vmax.f32 %v2601_v34, %v3074_v25 }
 0x1ed   :  { %3272 = vst.msk [vmem:[%s6719_s3 + $0x158] sm:$0xff] %vm3228_vm2, %v3225_v37  ;;  %v3181_v19 = vadd.f32 %v6353_v17, %v3128_v26 }
 0x1ee   :  { %3271 = vst.msk [vmem:[%s6719_s3 + $0x150] sm:$0xff] %vm3228_vm2, %v3224_v47  ;;  %v3180_v21 = vadd.f32 %v6353_v17, %v3127_v61 }
 0x1ef   :  { %v3227_v39 = vmax.f32 %v3181_v19, 0.0 }
 0x1f0   :  { %v3226_v42 = vmax.f32 %v3180_v21, 0.0 }
 0x1f1   :  { %3275 = vst.msk [vmem:[%s6719_s3 + $0x168] sm:$0xf] %vm3274_vm3, %v3227_v39 }
 0x1f2   :  { %3273 = vst.msk [vmem:[%s6719_s3 + $0x160] sm:$0xff] %vm3228_vm2, %v3226_v42 }

// kernel: _lambda_.5
= control target key start
LH: loop header
LB: loop body
LE: loop exit
PB: predicated region body
PF: predicated region fallthrough
CT: control target
= control target key end

     0   :  { %v1167_v0 = vmov 0.0|0.0   ;;  %vm50_vm0 = vcmask 523264   ;;  %s1707_s1 = inlined_call_operand.vmem [shape: f32[192,64], index: 1, kind: input, shape index: {}]   ;;  %s1708_s0 = inlined_call_operand.vmem [shape: f32[6,48,192], index: 0, kind: input, shape index: {}]   ;;  %s1709_s2 = inlined_call_operand.vmem [shape: f32[1,64], index: 2, kind: input, shape index: {}]   ;;  %s1710_s3 = inlined_call_operand.vmem [shape: f32[48,64], index: 3, kind: output, shape index: {}]  }
   0x1   :  { %950 = vmatprep.subr.bf16.mxu0 %v1167_v0  ;;  %v14_v1 = vld [vmem:[%s1707_s1] sm:$0xff]  ;;  %v15_v2 = vld [vmem:[%s1707_s1 + $0x8] sm:$0xff]  ;;  %986 = vmatprep.subr.bf16.mxu1 %v1167_v0  ;;  %v16_v3 = vld [vmem:[%s1707_s1 + $0x10] sm:$0xff] }
   0x2   :  { %v1199_v4 = vpack.c.bf16 %v15_v2, %v14_v1  ;;  %v17_v5 = vld [vmem:[%s1707_s1 + $0x18] sm:$0xff]  ;;  %v18_v7 = vld [vmem:[%s1707_s1 + $0x20] sm:$0xff]  ;;  %v19_v8 = vld [vmem:[%s1707_s1 + $0x28] sm:$0xff] }
   0x3   :  { %v1206_v6 = vpack.c.bf16 %v17_v5, %v16_v3  ;;  %v1218_v9 = vpack.c.bf16 %v19_v8, %v18_v7  ;;  %v20_v10 = vld [vmem:[%s1707_s1 + $0x30] sm:$0xff]  ;;  %v21_v11 = vld [vmem:[%s1707_s1 + $0x38] sm:$0xff]  ;;  %v39_v12 = vld [vmem:[%s1708_s0 + $0x8] sm:$0xff] }
   0x4   :  { %952 = vmatpush1.bf16.msra.mxu0 %v1199_v4  ;;  %988 = vmatpush1.bf16.msra.mxu1 %v1199_v4  ;;  %v860_v13 = vld [vmem:[%s1708_s0 + $0x68] sm:$0xff]  ;;  %v1238_v14 = vpack.c.bf16 %v21_v11, %v20_v10  ;;  %v22_v15 = vld [vmem:[%s1707_s1 + $0x40] sm:$0xff]  ;;  %v24_v18 = vld [vmem:[%s1707_s1 + $0x50] sm:$0xff] }
   0x5   :  { %953 = vmatprep.subr.bf16.mxu0 %v1167_v0  ;;  %989 = vmatprep.subr.bf16.mxu1 %v1167_v0  ;;  %v23_v16 = vld [vmem:[%s1707_s1 + $0x48] sm:$0xff]  ;;  %v25_v19 = vld [vmem:[%s1707_s1 + $0x58] sm:$0xff]  ;;  %v26_v21 = vld [vmem:[%s1707_s1 + $0x60] sm:$0xff] }
   0x6   :  { %853 = vmatprep.mubr.msk.f32.mxu0 %vm50_vm0, %v39_v12  ;;  %871 = vmatprep.mubr.msk.f32.mxu1 %vm50_vm0, %v860_v13  ;;  %v1250_v17 = vpack.c.bf16 %v23_v16, %v22_v15  ;;  %v1262_v20 = vpack.c.bf16 %v25_v19, %v24_v18  ;;  %v27_v22 = vld [vmem:[%s1707_s1 + $0x68] sm:$0xff]  ;;  %v28_v24 = vld [vmem:[%s1707_s1 + $0x70] sm:$0xff]  ;;  %v29_v25 = vld [vmem:[%s1707_s1 + $0x78] sm:$0xff] }
   0x7   :  { %v1274_v23 = vpack.c.bf16 %v27_v22, %v26_v21  ;;  %v1286_v26 = vpack.c.bf16 %v29_v25, %v28_v24  ;;  %v30_v27 = vld [vmem:[%s1707_s1 + $0x80] sm:$0xff]  ;;  %v31_v28 = vld [vmem:[%s1707_s1 + $0x88] sm:$0xff]  ;;  %v32_v30 = vld [vmem:[%s1707_s1 + $0x90] sm:$0xff] }
   0x8   :  { %955 = vmatpush1.bf16.msra.mxu0 %v1206_v6  ;;  %991 = vmatpush1.bf16.msra.mxu1 %v1206_v6  ;;  %v1298_v29 = vpack.c.bf16 %v31_v28, %v30_v27  ;;  %v33_v31 = vld [vmem:[%s1707_s1 + $0x98] sm:$0xff]  ;;  %v34_v33 = vld [vmem:[%s1707_s1 + $0xa0] sm:$0xff]  ;;  %v35_v34 = vld [vmem:[%s1707_s1 + $0xa8] sm:$0xff] }
   0x9   :  { %956 = vmatprep.subr.bf16.mxu0 %v1167_v0  ;;  %992 = vmatprep.subr.bf16.mxu1 %v1167_v0  ;;  %v1310_v32 = vpack.c.bf16 %v33_v31, %v32_v30  ;;  %v1322_v35 = vpack.c.bf16 %v35_v34, %v34_v33  ;;  %v36_v36 = vld [vmem:[%s1707_s1 + $0xb0] sm:$0xff]  ;;  %v37_v37 = vld [vmem:[%s1707_s1 + $0xb8] sm:$0xff]  ;;  %v38_v39 = vld [vmem:[%s1708_s0] sm:$0xff] }
   0xa   :  { %v1334_v38 = vpack.c.bf16 %v37_v37, %v36_v36  ;;  %v859_v40 = vld [vmem:[%s1708_s0 + $0x60] sm:$0xff]  ;;  %v41_v41 = vld [vmem:[%s1708_s0 + $0x18] sm:$0xff]  ;;  %v40_v43 = vld [vmem:[%s1708_s0 + $0x10] sm:$0xff] }
   0xb   :  { %v862_v42 = vld [vmem:[%s1708_s0 + $0x78] sm:$0xff]  ;;  %v861_v44 = vld [vmem:[%s1708_s0 + $0x70] sm:$0xff]  ;;  %v43_v45 = vld [vmem:[%s1708_s0 + $0x28] sm:$0xff] }
   0xc   :  { %958 = vmatpush1.bf16.msra.mxu0 %v1218_v9  ;;  %994 = vmatpush1.bf16.msra.mxu1 %v1218_v9  ;;  %v864_v46 = vld [vmem:[%s1708_s0 + $0x88] sm:$0xff]  ;;  %v42_v47 = vld [vmem:[%s1708_s0 + $0x20] sm:$0xff]  ;;  %v45_v49 = vld [vmem:[%s1708_s0 + $0x38] sm:$0xff] }
   0xd   :  { %959 = vmatprep.subr.bf16.mxu0 %v1167_v0  ;;  %995 = vmatprep.subr.bf16.mxu1 %v1167_v0  ;;  %v863_v48 = vld [vmem:[%s1708_s0 + $0x80] sm:$0xff]  ;;  %v866_v50 = vld [vmem:[%s1708_s0 + $0x98] sm:$0xff]  ;;  %v44_v51 = vld [vmem:[%s1708_s0 + $0x30] sm:$0xff] }
   0xe   :  { %v865_v52 = vld [vmem:[%s1708_s0 + $0x90] sm:$0xff]  ;;  %v47_v53 = vld [vmem:[%s1708_s0 + $0x48] sm:$0xff]  ;;  %v46_v55 = vld [vmem:[%s1708_s0 + $0x40] sm:$0xff] }
   0xf   :  { %v868_v54 = vld [vmem:[%s1708_s0 + $0xa8] sm:$0xff]  ;;  %v867_v56 = vld [vmem:[%s1708_s0 + $0xa0] sm:$0xff]  ;;  %v49_v57 = vld [vmem:[%s1708_s0 + $0x58] sm:$0xff] }
  0x10   :  { %961 = vmatpush1.bf16.msra.mxu0 %v1238_v14  ;;  %997 = vmatpush1.bf16.msra.mxu1 %v1238_v14  ;;  %v870_v58 = vld [vmem:[%s1708_s0 + $0xb8] sm:$0xff]  ;;  %v48_v59 = vld [vmem:[%s1708_s0 + $0x50] sm:$0xff]  ;;  %v878_v61 = vld [vmem:[%s1708_s0 + $0xc8] sm:$0xff] }
  0x11   :  { %962 = vmatprep.subr.bf16.mxu0 %v1167_v0  ;;  %998 = vmatprep.subr.bf16.mxu1 %v1167_v0  ;;  %v869_v60 = vld [vmem:[%s1708_s0 + $0xb0] sm:$0xff]  ;;  %v896_v62 = vld [vmem:[%s1708_s0 + $0x128] sm:$0xff]  ;;  %v877_v63 = vld [vmem:[%s1708_s0 + $0xc0] sm:$0xff] }
  0x12   :  { %v895_v1 = vld [vmem:[%s1708_s0 + $0x120] sm:$0xff]  ;;  %v880_v2 = vld [vmem:[%s1708_s0 + $0xd8] sm:$0xff]  ;;  %v879_v5 = vld [vmem:[%s1708_s0 + $0xd0] sm:$0xff] }
  0x13   :  { %v898_v3 = vld [vmem:[%s1708_s0 + $0x138] sm:$0xff]  ;;  %v897_v7 = vld [vmem:[%s1708_s0 + $0x130] sm:$0xff]  ;;  %v900_v8 = vld [vmem:[%s1708_s0 + $0x148] sm:$0xff] }
  0x14   :  { %964 = vmatpush1.bf16.msra.mxu0 %v1250_v17  ;;  %1000 = vmatpush1.bf16.msra.mxu1 %v1250_v17  ;;  %v881_v10 = vld [vmem:[%s1708_s0 + $0xe0] sm:$0xff]  ;;  %v902_v12 = vld [vmem:[%s1708_s0 + $0x158] sm:$0xff]  ;;  %v883_v13 = vld [vmem:[%s1708_s0 + $0xf0] sm:$0xff] }
  0x15   :  { %965 = vmatprep.subr.bf16.mxu0 %v1167_v0  ;;  %1001 = vmatprep.subr.bf16.mxu1 %v1167_v0  ;;  %v899_v11 = vld [vmem:[%s1708_s0 + $0x140] sm:$0xff]  ;;  %v901_v15 = vld [vmem:[%s1708_s0 + $0x150] sm:$0xff]  ;;  %v904_v16 = vld [vmem:[%s1708_s0 + $0x168] sm:$0xff] }
  0x16   :  { %v885_v18 = vld [vmem:[%s1708_s0 + $0x100] sm:$0xff]  ;;  %v906_v21 = vld [vmem:[%s1708_s0 + $0x178] sm:$0xff]  ;;  %v887_v22 = vld [vmem:[%s1708_s0 + $0x110] sm:$0xff] }
  0x17   :  { %v903_v19 = vld [vmem:[%s1708_s0 + $0x160] sm:$0xff]  ;;  %v905_v24 = vld [vmem:[%s1708_s0 + $0x170] sm:$0xff]  ;;  %v932_v25 = vld [vmem:[%s1708_s0 + $0x1e8] sm:$0xff] }
  0x18   :  { %967 = vmatpush1.bf16.msra.mxu0 %v1262_v20  ;;  %1003 = vmatpush1.bf16.msra.mxu1 %v1262_v20  ;;  %v915_v27 = vld [vmem:[%s1708_s0 + $0x190] sm:$0xff]  ;;  %v936_v30 = vld [vmem:[%s1708_s0 + $0x208] sm:$0xff]  ;;  %v917_v31 = vld [vmem:[%s1708_s0 + $0x1a0] sm:$0xff] }
  0x19   :  { %968 = vmatprep.subr.bf16.mxu0 %v1167_v0  ;;  %1004 = vmatprep.subr.bf16.mxu1 %v1167_v0  ;;  %v933_v28 = vld [vmem:[%s1708_s0 + $0x1f0] sm:$0xff]  ;;  %v920_v33 = vld [vmem:[%s1708_s0 + $0x1b8] sm:$0xff]  ;;  %v922_v37 = vld [vmem:[%s1708_s0 + $0x1c8] sm:$0xff] }
  0x1a   :  { %v938_v34 = vld [vmem:[%s1708_s0 + $0x218] sm:$0xff]  ;;  %v937_v36 = vld [vmem:[%s1708_s0 + $0x210] sm:$0xff] }
  0x1c   :  { %970 = vmatpush1.bf16.msra.mxu0 %v1274_v23  ;;  %1006 = vmatpush1.bf16.msra.mxu1 %v1274_v23 }
  0x1d   :  { %971 = vmatprep.subr.bf16.mxu0 %v1167_v0  ;;  %1007 = vmatprep.subr.bf16.mxu1 %v1167_v0 }
  0x20   :  { %973 = vmatpush1.bf16.msra.mxu0 %v1286_v26  ;;  %1009 = vmatpush1.bf16.msra.mxu1 %v1286_v26 }
  0x21   :  { %974 = vmatprep.subr.bf16.mxu0 %v1167_v0  ;;  %1010 = vmatprep.subr.bf16.mxu1 %v1167_v0 }
  0x24   :  { %976 = vmatpush1.bf16.msra.mxu0 %v1298_v29  ;;  %1012 = vmatpush1.bf16.msra.mxu1 %v1298_v29 }
  0x25   :  { %977 = vmatprep.subr.bf16.mxu0 %v1167_v0  ;;  %1013 = vmatprep.subr.bf16.mxu1 %v1167_v0 }
  0x28   :  { %979 = vmatpush1.bf16.msra.mxu0 %v1310_v32  ;;  %1015 = vmatpush1.bf16.msra.mxu1 %v1310_v32 }
  0x29   :  { %980 = vmatprep.subr.bf16.mxu0 %v1167_v0  ;;  %1016 = vmatprep.subr.bf16.mxu1 %v1167_v0 }
  0x2c   :  { %982 = vmatpush1.bf16.msra.mxu0 %v1322_v35  ;;  %1018 = vmatpush1.bf16.msra.mxu1 %v1322_v35 }
  0x2d   :  { %983 = vmatprep.subr.bf16.mxu0 %v1167_v0  ;;  %1019 = vmatprep.subr.bf16.mxu1 %v1167_v0 }
  0x30   :  { %985 = vmatpush1.bf16.msra.mxu0 %v1334_v38  ;;  %1021 = vmatpush1.bf16.msra.mxu1 %v1334_v38 }
  0x31   :  { %1022 = vmatprep.subr.bf16.mxu0 %v1167_v0  ;;  %1058 = vmatprep.subr.bf16.mxu1 %v1167_v0 }
  0x33   :  { %134 = vmatmul.mubr.f32.vlgmr.msra.gmra.mrb[0].mxu0 %v38_v39  ;;  %260 = vmatmul.mubr.f32.vlgmr.msra.gmra.mrb[0].mxu1 %v859_v40  ;;  %v921_v39 = vld [vmem:[%s1708_s0 + $0x1c0] sm:$0xff] }
  0x34   :  { %1024 = vmatpush1.bf16.msra.mxu0 %v1199_v4  ;;  %1060 = vmatpush1.bf16.msra.mxu1 %v1199_v4  ;;  %v939_v40 = vld [vmem:[%s1708_s0 + $0x220] sm:$0xff] }
  0x35   :  { %1025 = vmatprep.subr.bf16.mxu0 %v1167_v0  ;;  %1061 = vmatprep.subr.bf16.mxu1 %v1167_v0 }
  0x36   :  { %854 = vmatprep.mubr.msk.f32.mxu0 %vm50_vm0, %v41_v41  ;;  %872 = vmatprep.mubr.msk.f32.mxu1 %vm50_vm0, %v862_v42  ;;  %v924_v41 = vld [vmem:[%s1708_s0 + $0x1d8] sm:$0xff] }
  0x37   :  { %139 = vmatmul.mubr.f32.gmra.mrb[2].mxu0 %v40_v43  ;;  %265 = vmatmul.mubr.f32.gmra.mrb[2].mxu1 %v861_v44  ;;  %v942_v42 = vld [vmem:[%s1708_s0 + $0x238] sm:$0xff]  ;;  %v923_v43 = vld [vmem:[%s1708_s0 + $0x1d0] sm:$0xff] }
  0x38   :  { %1027 = vmatpush1.bf16.msra.mxu0 %v1206_v6  ;;  %1063 = vmatpush1.bf16.msra.mxu1 %v1206_v6  ;;  %v941_v44 = vld [vmem:[%s1708_s0 + $0x230] sm:$0xff] }
  0x39   :  { %1028 = vmatprep.subr.bf16.mxu0 %v1167_v0  ;;  %1064 = vmatprep.subr.bf16.mxu1 %v1167_v0 }
  0x3a   :  { %855 = vmatprep.mubr.msk.f32.mxu0 %vm50_vm0, %v43_v45  ;;  %873 = vmatprep.mubr.msk.f32.mxu1 %vm50_vm0, %v864_v46 }
  0x3b   :  { %144 = vmatmul.mubr.f32.gmra.mrb[4].mxu0 %v42_v47  ;;  %270 = vmatmul.mubr.f32.gmra.mrb[4].mxu1 %v863_v48 }
  0x3c   :  { %1030 = vmatpush1.bf16.msra.mxu0 %v1218_v9  ;;  %1066 = vmatpush1.bf16.msra.mxu1 %v1218_v9 }
  0x3d   :  { %1031 = vmatprep.subr.bf16.mxu0 %v1167_v0  ;;  %1067 = vmatprep.subr.bf16.mxu1 %v1167_v0 }
  0x3e   :  { %856 = vmatprep.mubr.msk.f32.mxu0 %vm50_vm0, %v45_v49  ;;  %874 = vmatprep.mubr.msk.f32.mxu1 %vm50_vm0, %v866_v50 }
  0x3f   :  { %149 = vmatmul.mubr.f32.gmra.mrb[6].mxu0 %v44_v51  ;;  %275 = vmatmul.mubr.f32.gmra.mrb[6].mxu1 %v865_v52 }
  0x40   :  { %1033 = vmatpush1.bf16.msra.mxu0 %v1238_v14  ;;  %1069 = vmatpush1.bf16.msra.mxu1 %v1238_v14 }
  0x41   :  { %1034 = vmatprep.subr.bf16.mxu0 %v1167_v0  ;;  %1070 = vmatprep.subr.bf16.mxu1 %v1167_v0 }
  0x42   :  { %857 = vmatprep.mubr.msk.f32.mxu0 %vm50_vm0, %v47_v53  ;;  %875 = vmatprep.mubr.msk.f32.mxu1 %vm50_vm0, %v868_v54 }
  0x43   :  { %154 = vmatmul.mubr.f32.gmra.mrb[8].mxu0 %v46_v55  ;;  %280 = vmatmul.mubr.f32.gmra.mrb[8].mxu1 %v867_v56 }
  0x44   :  { %1036 = vmatpush1.bf16.msra.mxu0 %v1250_v17  ;;  %1072 = vmatpush1.bf16.msra.mxu1 %v1250_v17 }
  0x45   :  { %1037 = vmatprep.subr.bf16.mxu0 %v1167_v0  ;;  %1073 = vmatprep.subr.bf16.mxu1 %v1167_v0 }
  0x46   :  { %858 = vmatprep.mubr.msk.f32.mxu0 %vm50_vm0, %v49_v57  ;;  %876 = vmatprep.mubr.msk.f32.mxu1 %vm50_vm0, %v870_v58 }
  0x47   :  { %159 = vmatmul.mubr.f32.gmra.mrb[10].mxu0 %v48_v59  ;;  %285 = vmatmul.mubr.f32.gmra.mrb[10].mxu1 %v869_v60 }
  0x48   :  { %1039 = vmatpush1.bf16.msra.mxu0 %v1262_v20  ;;  %1075 = vmatpush1.bf16.msra.mxu1 %v1262_v20 }
  0x49   :  { %1040 = vmatprep.subr.bf16.mxu0 %v1167_v0  ;;  %1076 = vmatprep.subr.bf16.mxu1 %v1167_v0 }
  0x4a   :  { %889 = vmatprep.mubr.msk.f32.mxu0 %vm50_vm0, %v878_v61  ;;  %907 = vmatprep.mubr.msk.f32.mxu1 %vm50_vm0, %v896_v62 }
  0x4c   :  { %1042 = vmatpush1.bf16.msra.mxu0 %v1274_v23  ;;  %1078 = vmatpush1.bf16.msra.mxu1 %v1274_v23 }
  0x4d   :  { %1043 = vmatprep.subr.bf16.mxu0 %v1167_v0  ;;  %1079 = vmatprep.subr.bf16.mxu1 %v1167_v0 }
  0x50   :  { %1045 = vmatpush1.bf16.msra.mxu0 %v1286_v26  ;;  %1081 = vmatpush1.bf16.msra.mxu1 %v1286_v26 }
  0x51   :  { %1046 = vmatprep.subr.bf16.mxu0 %v1167_v0  ;;  %1082 = vmatprep.subr.bf16.mxu1 %v1167_v0 }
  0x54   :  { %1048 = vmatpush1.bf16.msra.mxu0 %v1298_v29  ;;  %1084 = vmatpush1.bf16.msra.mxu1 %v1298_v29 }
  0x55   :  { %1049 = vmatprep.subr.bf16.mxu0 %v1167_v0  ;;  %1085 = vmatprep.subr.bf16.mxu1 %v1167_v0 }
  0x58   :  { %1051 = vmatpush1.bf16.msra.mxu0 %v1310_v32  ;;  %1087 = vmatpush1.bf16.msra.mxu1 %v1310_v32 }
  0x59   :  { %1052 = vmatprep.subr.bf16.mxu0 %v1167_v0  ;;  %1088 = vmatprep.subr.bf16.mxu1 %v1167_v0 }
  0x5c   :  { %1054 = vmatpush1.bf16.msra.mxu0 %v1322_v35  ;;  %1090 = vmatpush1.bf16.msra.mxu1 %v1322_v35 }
  0x5d   :  { %1055 = vmatprep.subr.bf16.mxu0 %v1167_v0  ;;  %1091 = vmatprep.subr.bf16.mxu1 %v1167_v0 }
  0x60   :  { %1057 = vmatpush1.bf16.msra.mxu0 %v1334_v38  ;;  %1093 = vmatpush1.bf16.msra.mxu1 %v1334_v38 }
  0x61   :  { %1094 = vmatprep.subr.bf16.mxu0 %v1167_v0  ;;  %1130 = vmatprep.subr.bf16.mxu1 %v1167_v0 }
  0x63   :  { %392 = vmatmul.mubr.f32.vlgmr.msra.gmra.mrb[12].mxu0 %v877_v63  ;;  %524 = vmatmul.mubr.f32.vlgmr.msra.gmra.mrb[12].mxu1 %v895_v1 }
  0x64   :  { %1096 = vmatpush1.bf16.msra.mxu0 %v1199_v4  ;;  %1132 = vmatpush1.bf16.msra.mxu1 %v1199_v4  ;;  %v882_v4 = vld [vmem:[%s1708_s0 + $0xe8] sm:$0xff] }
  0x65   :  { %890 = vmatprep.mubr.msk.f32.mxu0 %vm50_vm0, %v880_v2  ;;  %1097 = vmatprep.subr.bf16.mxu0 %v1167_v0 }
  0x66   :  { %908 = vmatprep.mubr.msk.f32.mxu1 %vm50_vm0, %v898_v3  ;;  %1133 = vmatprep.subr.bf16.mxu1 %v1167_v0 }
  0x67   :  { %397 = vmatmul.mubr.f32.gmra.mrb[14].mxu0 %v879_v5  ;;  %529 = vmatmul.mubr.f32.gmra.mrb[14].mxu1 %v897_v7 }
  0x68   :  { %1099 = vmatpush1.bf16.msra.mxu0 %v1206_v6  ;;  %1135 = vmatpush1.bf16.msra.mxu1 %v1206_v6  ;;  %v884_v6 = vld [vmem:[%s1708_s0 + $0xf8] sm:$0xff] }
  0x69   :  { %891 = vmatprep.mubr.msk.f32.mxu0 %vm50_vm0, %v882_v4  ;;  %1100 = vmatprep.subr.bf16.mxu0 %v1167_v0 }
  0x6a   :  { %909 = vmatprep.mubr.msk.f32.mxu1 %vm50_vm0, %v900_v8  ;;  %1136 = vmatprep.subr.bf16.mxu1 %v1167_v0 }
  0x6b   :  { %402 = vmatmul.mubr.f32.gmra.mrb[16].mxu0 %v881_v10  ;;  %534 = vmatmul.mubr.f32.gmra.mrb[16].mxu1 %v899_v11 }
  0x6c   :  { %1102 = vmatpush1.bf16.msra.mxu0 %v1218_v9  ;;  %1138 = vmatpush1.bf16.msra.mxu1 %v1218_v9  ;;  %v886_v9 = vld [vmem:[%s1708_s0 + $0x108] sm:$0xff] }
  0x6d   :  { %892 = vmatprep.mubr.msk.f32.mxu0 %vm50_vm0, %v884_v6  ;;  %1103 = vmatprep.subr.bf16.mxu0 %v1167_v0 }
  0x6e   :  { %910 = vmatprep.mubr.msk.f32.mxu1 %vm50_vm0, %v902_v12  ;;  %1139 = vmatprep.subr.bf16.mxu1 %v1167_v0 }
  0x6f   :  { %407 = vmatmul.mubr.f32.gmra.mrb[18].mxu0 %v883_v13  ;;  %539 = vmatmul.mubr.f32.gmra.mrb[18].mxu1 %v901_v15 }
  0x70   :  { %1105 = vmatpush1.bf16.msra.mxu0 %v1238_v14  ;;  %1141 = vmatpush1.bf16.msra.mxu1 %v1238_v14  ;;  %v888_v14 = vld [vmem:[%s1708_s0 + $0x118] sm:$0xff] }
  0x71   :  { %893 = vmatprep.mubr.msk.f32.mxu0 %vm50_vm0, %v886_v9  ;;  %1106 = vmatprep.subr.bf16.mxu0 %v1167_v0 }
  0x72   :  { %911 = vmatprep.mubr.msk.f32.mxu1 %vm50_vm0, %v904_v16  ;;  %1142 = vmatprep.subr.bf16.mxu1 %v1167_v0 }
  0x73   :  { %412 = vmatmul.mubr.f32.gmra.mrb[20].mxu0 %v885_v18  ;;  %544 = vmatmul.mubr.f32.gmra.mrb[20].mxu1 %v903_v19 }
  0x74   :  { %1108 = vmatpush1.bf16.msra.mxu0 %v1250_v17  ;;  %1144 = vmatpush1.bf16.msra.mxu1 %v1250_v17  ;;  %v914_v17 = vld [vmem:[%s1708_s0 + $0x188] sm:$0xff] }
  0x75   :  { %894 = vmatprep.mubr.msk.f32.mxu0 %vm50_vm0, %v888_v14  ;;  %1109 = vmatprep.subr.bf16.mxu0 %v1167_v0 }
  0x76   :  { %912 = vmatprep.mubr.msk.f32.mxu1 %vm50_vm0, %v906_v21  ;;  %1145 = vmatprep.subr.bf16.mxu1 %v1167_v0 }
  0x77   :  { %417 = vmatmul.mubr.f32.gmra.mrb[22].mxu0 %v887_v22  ;;  %549 = vmatmul.mubr.f32.gmra.mrb[22].mxu1 %v905_v24 }
  0x78   :  { %1111 = vmatpush1.bf16.msra.mxu0 %v1262_v20  ;;  %1147 = vmatpush1.bf16.msra.mxu1 %v1262_v20  ;;  %v913_v20 = vld [vmem:[%s1708_s0 + $0x180] sm:$0xff] }
  0x79   :  { %1112 = vmatprep.subr.bf16.mxu0 %v1167_v0  ;;  %1148 = vmatprep.subr.bf16.mxu1 %v1167_v0 }
  0x7a   :  { %925 = vmatprep.mubr.msk.f32.mxu0 %vm50_vm0, %v914_v17  ;;  %943 = vmatprep.mubr.msk.f32.mxu1 %vm50_vm0, %v932_v25 }
  0x7c   :  { %1114 = vmatpush1.bf16.msra.mxu0 %v1274_v23  ;;  %1150 = vmatpush1.bf16.msra.mxu1 %v1274_v23  ;;  %v931_v23 = vld [vmem:[%s1708_s0 + $0x1e0] sm:$0xff] }
  0x7d   :  { %1115 = vmatprep.subr.bf16.mxu0 %v1167_v0  ;;  %1151 = vmatprep.subr.bf16.mxu1 %v1167_v0 }
  0x80   :  { %1117 = vmatpush1.bf16.msra.mxu0 %v1286_v26  ;;  %1153 = vmatpush1.bf16.msra.mxu1 %v1286_v26  ;;  %v916_v26 = vld [vmem:[%s1708_s0 + $0x198] sm:$0xff] }
  0x81   :  { %1118 = vmatprep.subr.bf16.mxu0 %v1167_v0  ;;  %1154 = vmatprep.subr.bf16.mxu1 %v1167_v0 }
  0x84   :  { %1120 = vmatpush1.bf16.msra.mxu0 %v1298_v29  ;;  %1156 = vmatpush1.bf16.msra.mxu1 %v1298_v29  ;;  %v918_v29 = vld [vmem:[%s1708_s0 + $0x1a8] sm:$0xff] }
  0x85   :  { %1121 = vmatprep.subr.bf16.mxu0 %v1167_v0  ;;  %1157 = vmatprep.subr.bf16.mxu1 %v1167_v0 }
  0x88   :  { %1123 = vmatpush1.bf16.msra.mxu0 %v1310_v32  ;;  %1159 = vmatpush1.bf16.msra.mxu1 %v1310_v32  ;;  %v935_v32 = vld [vmem:[%s1708_s0 + $0x200] sm:$0xff] }
  0x89   :  { %1124 = vmatprep.subr.bf16.mxu0 %v1167_v0  ;;  %1160 = vmatprep.subr.bf16.mxu1 %v1167_v0 }
  0x8c   :  { %1126 = vmatpush1.bf16.msra.mxu0 %v1322_v35  ;;  %1162 = vmatpush1.bf16.msra.mxu1 %v1322_v35  ;;  %v919_v35 = vld [vmem:[%s1708_s0 + $0x1b0] sm:$0xff] }
  0x8d   :  { %1127 = vmatprep.subr.bf16.mxu0 %v1167_v0  ;;  %1163 = vmatprep.subr.bf16.mxu1 %v1167_v0  ;;  %v934_v0 = vld [vmem:[%s1708_s0 + $0x1f8] sm:$0xff] }
  0x90   :  { %1129 = vmatpush1.bf16.msra.mxu0 %v1334_v38  ;;  %1165 = vmatpush1.bf16.msra.mxu1 %v1334_v38  ;;  %v940_v38 = vld [vmem:[%s1708_s0 + $0x228] sm:$0xff] }
  0x93   :  { %656 = vmatmul.mubr.f32.vlgmr.msra.gmra.mrb[24].mxu0 %v913_v20  ;;  %788 = vmatmul.mubr.f32.vlgmr.msra.gmra.mrb[24].mxu1 %v931_v23 }
  0x94   :  { %926 = vmatprep.mubr.msk.f32.mxu0 %vm50_vm0, %v916_v26  ;;  %944 = vmatprep.mubr.msk.f32.mxu1 %vm50_vm0, %v934_v0 }
  0x97   :  { %661 = vmatmul.mubr.f32.gmra.mrb[26].mxu0 %v915_v27  ;;  %793 = vmatmul.mubr.f32.gmra.mrb[26].mxu1 %v933_v28 }
  0x98   :  { %927 = vmatprep.mubr.msk.f32.mxu0 %vm50_vm0, %v918_v29  ;;  %945 = vmatprep.mubr.msk.f32.mxu1 %vm50_vm0, %v936_v30 }
  0x9b   :  { %666 = vmatmul.mubr.f32.gmra.mrb[28].mxu0 %v917_v31  ;;  %798 = vmatmul.mubr.f32.gmra.mrb[28].mxu1 %v935_v32 }
  0x9c   :  { %928 = vmatprep.mubr.msk.f32.mxu0 %vm50_vm0, %v920_v33  ;;  %946 = vmatprep.mubr.msk.f32.mxu1 %vm50_vm0, %v938_v34 }
  0x9f   :  { %671 = vmatmul.mubr.f32.gmra.mrb[30].mxu0 %v919_v35  ;;  %803 = vmatmul.mubr.f32.gmra.mrb[30].mxu1 %v937_v36 }
  0xa0   :  { %929 = vmatprep.mubr.msk.f32.mxu0 %vm50_vm0, %v922_v37  ;;  %947 = vmatprep.mubr.msk.f32.mxu1 %vm50_vm0, %v940_v38 }
  0xa3   :  { %676 = vmatmul.mubr.f32.gmra.mrb[32].mxu0 %v921_v39  ;;  %808 = vmatmul.mubr.f32.gmra.mrb[32].mxu1 %v939_v40 }
  0xa4   :  { %930 = vmatprep.mubr.msk.f32.mxu0 %vm50_vm0, %v924_v41  ;;  %948 = vmatprep.mubr.msk.f32.mxu1 %vm50_vm0, %v942_v42 }
  0xa7   :  { %681 = vmatmul.mubr.f32.gmra.mrb[34].mxu0 %v923_v43  ;;  %813 = vmatmul.mubr.f32.gmra.mrb[34].mxu1 %v941_v44 }
 0x106   :  { %v135_v45 = vpop.f32.mrb[0].mxu0  ;;  %v261_v46 = vpop.f32.mrb[0].mxu1 }
 0x107   :  { %v137_v47 = vpop.f32.mrb[1].mxu0  ;;  %v290_v48 = vmax.f32 %v135_v45, %v261_v46  ;;  %v263_v49 = vpop.f32.mrb[1].mxu1 }
 0x10a   :  { %v140_v50 = vpop.f32.mrb[2].mxu0  ;;  %v266_v51 = vpop.f32.mrb[2].mxu1 }
 0x10b   :  { %v142_v52 = vpop.f32.mrb[3].mxu0  ;;  %v291_v53 = vmax.f32 %v140_v50, %v266_v51  ;;  %v268_v54 = vpop.f32.mrb[3].mxu1 }
 0x10c   :  { %v949_v52 = vld [vmem:[%s1709_s2] ss:$0 sm:$0xff] }
 0x10e   :  { %v145_v55 = vpop.f32.mrb[4].mxu0  ;;  %v271_v56 = vpop.f32.mrb[4].mxu1 }
 0x10f   :  { %v147_v57 = vpop.f32.mrb[5].mxu0  ;;  %v292_v58 = vmax.f32 %v145_v55, %v271_v56  ;;  %v273_v59 = vpop.f32.mrb[5].mxu1 }
 0x112   :  { %v150_v60 = vpop.f32.mrb[6].mxu0  ;;  %v276_v61 = vpop.f32.mrb[6].mxu1 }
 0x113   :  { %v152_v62 = vpop.f32.mrb[7].mxu0  ;;  %v293_v63 = vmax.f32 %v150_v60, %v276_v61  ;;  %v278_v1 = vpop.f32.mrb[7].mxu1 }
 0x116   :  { %v155_v2 = vpop.f32.mrb[8].mxu0  ;;  %v281_v3 = vpop.f32.mrb[8].mxu1 }
 0x117   :  { %v157_v5 = vpop.f32.mrb[9].mxu0  ;;  %v294_v7 = vmax.f32 %v155_v2, %v281_v3  ;;  %v283_v4 = vpop.f32.mrb[9].mxu1 }
 0x11a   :  { %v160_v8 = vpop.f32.mrb[10].mxu0  ;;  %v286_v10 = vpop.f32.mrb[10].mxu1 }
 0x11b   :  { %v162_v11 = vpop.f32.mrb[11].mxu0  ;;  %v295_v6 = vmax.f32 %v160_v8, %v286_v10  ;;  %v288_v12 = vpop.f32.mrb[11].mxu1 }
 0x136   :  { %v393_v13 = vpop.f32.mrb[12].mxu0  ;;  %v525_v15 = vpop.f32.mrb[12].mxu1 }
 0x137   :  { %v422_v9 = vmax.f32 %v290_v48, %v393_v13  ;;  %v395_v16 = vpop.f32.mrb[13].mxu0  ;;  %v527_v18 = vpop.f32.mrb[13].mxu1 }
 0x139   :  { %v554_v19 = vmax.f32 %v422_v9, %v525_v15 }
 0x13a   :  { %v398_v14 = vpop.f32.mrb[14].mxu0  ;;  %v530_v21 = vpop.f32.mrb[14].mxu1 }
 0x13b   :  { %v423_v22 = vmax.f32 %v291_v53, %v398_v14  ;;  %v400_v24 = vpop.f32.mrb[15].mxu0  ;;  %v532_v17 = vpop.f32.mrb[15].mxu1 }
 0x13d   :  { %v555_v25 = vmax.f32 %v423_v22, %v530_v21 }
 0x13e   :  { %v403_v20 = vpop.f32.mrb[16].mxu0  ;;  %v535_v23 = vpop.f32.mrb[16].mxu1 }
 0x13f   :  { %v424_v26 = vmax.f32 %v292_v58, %v403_v20  ;;  %v405_v0 = vpop.f32.mrb[17].mxu0  ;;  %v537_v27 = vpop.f32.mrb[17].mxu1 }
 0x141   :  { %v556_v28 = vmax.f32 %v424_v26, %v535_v23 }
 0x142   :  { %v408_v29 = vpop.f32.mrb[18].mxu0  ;;  %v540_v30 = vpop.f32.mrb[18].mxu1 }
 0x143   :  { %v425_v31 = vmax.f32 %v293_v63, %v408_v29  ;;  %v410_v32 = vpop.f32.mrb[19].mxu0  ;;  %v542_v33 = vpop.f32.mrb[19].mxu1 }
 0x145   :  { %v557_v34 = vmax.f32 %v425_v31, %v540_v30 }
 0x146   :  { %v413_v35 = vpop.f32.mrb[20].mxu0  ;;  %v545_v36 = vpop.f32.mrb[20].mxu1 }
 0x147   :  { %v426_v37 = vmax.f32 %v294_v7, %v413_v35  ;;  %v415_v38 = vpop.f32.mrb[21].mxu0  ;;  %v547_v39 = vpop.f32.mrb[21].mxu1 }
 0x149   :  { %v558_v40 = vmax.f32 %v426_v37, %v545_v36 }
 0x14a   :  { %v418_v41 = vpop.f32.mrb[22].mxu0  ;;  %v550_v42 = vpop.f32.mrb[22].mxu1 }
 0x14b   :  { %v427_v43 = vmax.f32 %v295_v6, %v418_v41  ;;  %v420_v44 = vpop.f32.mrb[23].mxu0  ;;  %v552_v45 = vpop.f32.mrb[23].mxu1 }
 0x14d   :  { %v559_v46 = vmax.f32 %v427_v43, %v550_v42 }
 0x166   :  { %v657_v47 = vpop.f32.mrb[24].mxu0  ;;  %v789_v48 = vpop.f32.mrb[24].mxu1 }
 0x167   :  { %v686_v49 = vmax.f32 %v554_v19, %v657_v47  ;;  %v659_v50 = vpop.f32.mrb[25].mxu0  ;;  %v791_v51 = vpop.f32.mrb[25].mxu1 }
 0x169   :  { %v818_v53 = vmax.f32 %v686_v49, %v789_v48 }
 0x16a   :  { %v662_v54 = vpop.f32.mrb[26].mxu0  ;;  %v794_v55 = vpop.f32.mrb[26].mxu1 }
 0x16b   :  { %v831_v56 = vadd.f32 %v949_v52, %v818_v53  ;;  %v687_v57 = vmax.f32 %v555_v25, %v662_v54  ;;  %v664_v58 = vpop.f32.mrb[27].mxu0  ;;  %v796_v59 = vpop.f32.mrb[27].mxu1 }
 0x16d   :  { %v837_v60 = vmax.f32 %v831_v56, 0.0  ;;  %v819_v61 = vmax.f32 %v687_v57, %v794_v55 }
 0x16e   :  { %v667_v62 = vpop.f32.mrb[28].mxu0  ;;  %v799_v63 = vpop.f32.mrb[28].mxu1 }
 0x16f   :  { %843 = vst.msk [vmem:[%s1710_s3] sm:$0xff] %vm50_vm0, %v837_v60  ;;  %v832_v1 = vadd.f32 %v949_v52, %v819_v61  ;;  %v688_v2 = vmax.f32 %v556_v28, %v667_v62  ;;  %v669_v3 = vpop.f32.mrb[29].mxu0  ;;  %v801_v5 = vpop.f32.mrb[29].mxu1 }
 0x171   :  { %v838_v7 = vmax.f32 %v832_v1, 0.0  ;;  %v820_v4 = vmax.f32 %v688_v2, %v799_v63 }
 0x172   :  { %v672_v8 = vpop.f32.mrb[30].mxu0  ;;  %v804_v10 = vpop.f32.mrb[30].mxu1 }
 0x173   :  { %844 = vst.msk [vmem:[%s1710_s3 + $0x8] sm:$0xff] %vm50_vm0, %v838_v7  ;;  %v833_v11 = vadd.f32 %v949_v52, %v820_v4  ;;  %v689_v6 = vmax.f32 %v557_v34, %v672_v8  ;;  %v674_v12 = vpop.f32.mrb[31].mxu0  ;;  %v806_v13 = vpop.f32.mrb[31].mxu1 }
 0x175   :  { %v839_v15 = vmax.f32 %v833_v11, 0.0  ;;  %v821_v9 = vmax.f32 %v689_v6, %v804_v10 }
 0x176   :  { %v677_v16 = vpop.f32.mrb[32].mxu0  ;;  %v809_v18 = vpop.f32.mrb[32].mxu1 }
 0x177   :  { %845 = vst.msk [vmem:[%s1710_s3 + $0x10] sm:$0xff] %vm50_vm0, %v839_v15  ;;  %v834_v19 = vadd.f32 %v949_v52, %v821_v9  ;;  %v690_v14 = vmax.f32 %v558_v40, %v677_v16  ;;  %v679_v21 = vpop.f32.mrb[33].mxu0  ;;  %v811_v22 = vpop.f32.mrb[33].mxu1 }
 0x179   :  { %v840_v24 = vmax.f32 %v834_v19, 0.0  ;;  %v822_v17 = vmax.f32 %v690_v14, %v809_v18 }
 0x17a   :  { %v682_v25 = vpop.f32.mrb[34].mxu0  ;;  %v814_v20 = vpop.f32.mrb[34].mxu1 }
 0x17b   :  { %846 = vst.msk [vmem:[%s1710_s3 + $0x18] sm:$0xff] %vm50_vm0, %v840_v24  ;;  %v835_v23 = vadd.f32 %v949_v52, %v822_v17  ;;  %v691_v26 = vmax.f32 %v559_v46, %v682_v25  ;;  %v684_v0 = vpop.f32.mrb[35].mxu0  ;;  %v816_v27 = vpop.f32.mrb[35].mxu1 }
 0x17d   :  { %v841_v28 = vmax.f32 %v835_v23, 0.0  ;;  %v823_v29 = vmax.f32 %v691_v26, %v814_v20 }
 0x17f   :  { %847 = vst.msk [vmem:[%s1710_s3 + $0x20] sm:$0xff] %vm50_vm0, %v841_v28  ;;  %v836_v30 = vadd.f32 %v949_v52, %v823_v29 }
 0x181   :  { %v842_v31 = vmax.f32 %v836_v30, 0.0 }
 0x183   :  { %848 = vst.msk [vmem:[%s1710_s3 + $0x28] sm:$0xff] %vm50_vm0, %v842_v31 }

// kernel: _lambda_.6
= control target key start
LH: loop header
LB: loop body
LE: loop exit
PB: predicated region body
PF: predicated region fallthrough
CT: control target
= control target key end

     0   :  { %v1835_v3 = vmov 0.0|0.0   ;;  %vm1836_vm0 = vmmov 0   ;;  %v1837_v4 = vmov 0.0   ;;  %vm951_vm1 = vcmask 781312   ;;  %s2296_s1 = inlined_call_operand.vmem [shape: f32[384,96], index: 1, kind: input, shape index: {}]   ;;  %s2297_s0 = inlined_call_operand.vmem [shape: f32[6,4,384], index: 0, kind: input, shape index: {}]   ;;  %s2298_s2 = inlined_call_operand.vmem [shape: f32[1,96], index: 2, kind: input, shape index: {}]   ;;  %s2299_s3 = inlined_call_operand.vmem [shape: f32[4,96], index: 3, kind: output, shape index: {}]  }
   0x1   :  { %v30_v0 = vld [vmem:[%s2296_s1 + $0x80] sm:$0xff]  ;;  %v31_v1 = vld [vmem:[%s2296_s1 + $0x88] sm:$0xff]  ;;  %1522 = vmatprep.subr.bf16.mxu1 %v1835_v3  ;;  %1312 = vmatprep.mubr.msk.f32.mxu1 %vm1836_vm0, %v1837_v4  ;;  %v32_v11 = vld [vmem:[%s2296_s1 + $0x90] sm:$0xff] }
   0x2   :  { %v14_v2 = vld [vmem:[%s2296_s1] sm:$0xff]  ;;  %v1870_v5 = vpack.c.bf16 %v31_v1, %v30_v0  ;;  %v15_v6 = vld [vmem:[%s2296_s1 + $0x8] sm:$0xff]  ;;  %v33_v12 = vld [vmem:[%s2296_s1 + $0x98] sm:$0xff] }
   0x3   :  { %v46_v7 = vld [vmem:[%s2296_s1 + $0x100] sm:$0xff]  ;;  %v47_v8 = vld [vmem:[%s2296_s1 + $0x108] sm:$0xff]  ;;  %v1881_v9 = vpack.c.bf16 %v15_v6, %v14_v2  ;;  %v16_v13 = vld [vmem:[%s2296_s1 + $0x10] sm:$0xff]  ;;  %v1895_v14 = vpack.c.bf16 %v33_v12, %v32_v11 }
   0x4   :  { %v1883_v10 = vpack.c.bf16 %v47_v8, %v46_v7  ;;  %1491 = vmatprep.subr.bf16.mxu0 %v1870_v5  ;;  %v17_v15 = vld [vmem:[%s2296_s1 + $0x18] sm:$0xff]  ;;  %v48_v16 = vld [vmem:[%s2296_s1 + $0x110] sm:$0xff]  ;;  %v34_v20 = vld [vmem:[%s2296_s1 + $0xa0] sm:$0xff] }
   0x5   :  { %v49_v17 = vld [vmem:[%s2296_s1 + $0x118] sm:$0xff]  ;;  %1493 = vmatpush3.bf16.msra.mxu0 %v1881_v9  ;;  %v1908_v18 = vpack.c.bf16 %v17_v15, %v16_v13  ;;  %v35_v21 = vld [vmem:[%s2296_s1 + $0xa8] sm:$0xff]  ;;  %v18_v22 = vld [vmem:[%s2296_s1 + $0x20] sm:$0xff] }
   0x6   :  { %1524 = vmatpush3.bf16.msra.mxu1 %v1883_v10  ;;  %v1910_v19 = vpack.c.bf16 %v49_v17, %v48_v16  ;;  %1495 = vmatprep.subr.bf16.mxu0 %v1895_v14  ;;  %v1923_v23 = vpack.c.bf16 %v35_v21, %v34_v20  ;;  %v19_v24 = vld [vmem:[%s2296_s1 + $0x28] sm:$0xff]  ;;  %v50_v25 = vld [vmem:[%s2296_s1 + $0x120] sm:$0xff]  ;;  %v36_v27 = vld [vmem:[%s2296_s1 + $0xb0] sm:$0xff] }
   0x7   :  { %1525 = vmatprep.subr.bf16.mxu1 %v1835_v3  ;;  %v51_v26 = vld [vmem:[%s2296_s1 + $0x128] sm:$0xff]  ;;  %v37_v28 = vld [vmem:[%s2296_s1 + $0xb8] sm:$0xff]  ;;  %v1942_v29 = vpack.c.bf16 %v19_v24, %v18_v22  ;;  %v20_v31 = vld [vmem:[%s2296_s1 + $0x30] sm:$0xff] }
   0x8   :  { %v1944_v30 = vpack.c.bf16 %v51_v26, %v50_v25  ;;  %v1951_v32 = vpack.c.bf16 %v37_v28, %v36_v27  ;;  %v21_v33 = vld [vmem:[%s2296_s1 + $0x38] sm:$0xff]  ;;  %v52_v34 = vld [vmem:[%s2296_s1 + $0x130] sm:$0xff]  ;;  %v38_v36 = vld [vmem:[%s2296_s1 + $0xc0] sm:$0xff] }
   0x9   :  { %1497 = vmatpush3.bf16.msra.mxu0 %v1908_v18  ;;  %v53_v35 = vld [vmem:[%s2296_s1 + $0x138] sm:$0xff]  ;;  %v39_v37 = vld [vmem:[%s2296_s1 + $0xc8] sm:$0xff]  ;;  %v1970_v38 = vpack.c.bf16 %v21_v33, %v20_v31  ;;  %v22_v40 = vld [vmem:[%s2296_s1 + $0x40] sm:$0xff] }
   0xa   :  { %1527 = vmatpush3.bf16.msra.mxu1 %v1910_v19  ;;  %1499 = vmatprep.subr.bf16.mxu0 %v1923_v23  ;;  %v1972_v39 = vpack.c.bf16 %v53_v35, %v52_v34  ;;  %v1979_v41 = vpack.c.bf16 %v39_v37, %v38_v36  ;;  %v23_v42 = vld [vmem:[%s2296_s1 + $0x48] sm:$0xff]  ;;  %v54_v43 = vld [vmem:[%s2296_s1 + $0x140] sm:$0xff]  ;;  %v40_v45 = vld [vmem:[%s2296_s1 + $0xd0] sm:$0xff] }
   0xb   :  { %1528 = vmatprep.subr.bf16.mxu1 %v1835_v3  ;;  %v55_v44 = vld [vmem:[%s2296_s1 + $0x148] sm:$0xff]  ;;  %v41_v46 = vld [vmem:[%s2296_s1 + $0xd8] sm:$0xff]  ;;  %v62_v47 = vld [vmem:[%s2297_s0] sm:$0xff]  ;;  %v2001_v48 = vpack.c.bf16 %v23_v42, %v22_v40 }
   0xc   :  { %v2003_v49 = vpack.c.bf16 %v55_v44, %v54_v43  ;;  %v24_v50 = vld [vmem:[%s2296_s1 + $0x50] sm:$0xff]  ;;  %v65_v51 = vcombine.high %v62_v47, %v62_v47  ;;  %v2010_v52 = vpack.c.bf16 %v41_v46, %v40_v45  ;;  %v25_v53 = vld [vmem:[%s2296_s1 + $0x58] sm:$0xff]  ;;  %v42_v56 = vld [vmem:[%s2296_s1 + $0xe0] sm:$0xff] }
   0xd   :  { %1501 = vmatpush3.bf16.msra.mxu0 %v1942_v29  ;;  %v56_v54 = vld [vmem:[%s2296_s1 + $0x150] sm:$0xff]  ;;  %v57_v55 = vld [vmem:[%s2296_s1 + $0x158] sm:$0xff]  ;;  %v43_v57 = vld [vmem:[%s2296_s1 + $0xe8] sm:$0xff]  ;;  %v2029_v58 = vpack.c.bf16 %v25_v53, %v24_v50 }
   0xe   :  { %1530 = vmatpush3.bf16.msra.mxu1 %v1944_v30  ;;  %1503 = vmatprep.subr.bf16.mxu0 %v1951_v32  ;;  %v2031_v59 = vpack.c.bf16 %v57_v55, %v56_v54  ;;  %v26_v60 = vld [vmem:[%s2296_s1 + $0x60] sm:$0xff]  ;;  %v2038_v61 = vpack.c.bf16 %v43_v57, %v42_v56  ;;  %v27_v62 = vld [vmem:[%s2296_s1 + $0x68] sm:$0xff]  ;;  %v44_v1 = vld [vmem:[%s2296_s1 + $0xf0] sm:$0xff] }
   0xf   :  { %1531 = vmatprep.subr.bf16.mxu1 %v1835_v3  ;;  %131 = vmatprep.mubr.f32.mxu0 %v65_v51  ;;  %v58_v63 = vld [vmem:[%s2296_s1 + $0x160] sm:$0xff]  ;;  %v59_v0 = vld [vmem:[%s2296_s1 + $0x168] sm:$0xff]  ;;  %v45_v2 = vld [vmem:[%s2296_s1 + $0xf8] sm:$0xff]  ;;  %v2057_v6 = vpack.c.bf16 %v27_v62, %v26_v60 }
  0x10   :  { %v2059_v7 = vpack.c.bf16 %v59_v0, %v58_v63  ;;  %v28_v8 = vld [vmem:[%s2296_s1 + $0x70] sm:$0xff]  ;;  %v2066_v11 = vpack.c.bf16 %v45_v2, %v44_v1  ;;  %v29_v12 = vld [vmem:[%s2296_s1 + $0x78] sm:$0xff]  ;;  %v63_v21 = vld [vmem:[%s2297_s0 + $0x8] sm:$0xf] }
  0x11   :  { %1505 = vmatpush3.bf16.msra.mxu0 %v1970_v38  ;;  %v60_v13 = vld [vmem:[%s2296_s1 + $0x170] sm:$0xff]  ;;  %v61_v15 = vld [vmem:[%s2296_s1 + $0x178] sm:$0xff]  ;;  %v2079_v16 = vpack.c.bf16 %v29_v12, %v28_v8  ;;  %v961_v27 = vld [vmem:[%s2297_s0 + $0x24] sm:$0xff] }
  0x12   :  { %1533 = vmatpush3.bf16.msra.mxu1 %v1972_v39  ;;  %1507 = vmatprep.subr.bf16.mxu0 %v1979_v41  ;;  %v2081_v17 = vpack.c.bf16 %v61_v15, %v60_v13  ;;  %v957_v20 = vld [vmem:[%s2297_s0 + $0xc] sm:$0xff]  ;;  %v959_v24 = vld [vmem:[%s2297_s0 + $0x18] sm:$0xff]  ;;  %v958_v25 = vld [vmem:[%s2297_s0 + $0x14] sm:$0xf]  ;;  %v505_v31 = vcombine.high %v961_v27, %v961_v27 }
  0x13   :  { %1534 = vmatprep.subr.bf16.mxu1 %v1835_v3  ;;  %v211_v22 = vcombine.high %v957_v20, %v957_v20  ;;  %v358_v26 = vcombine.high %v959_v24, %v959_v24  ;;  %v960_v28 = vld [vmem:[%s2297_s0 + $0x20] sm:$0xf]  ;;  %v963_v33 = vld [vmem:[%s2297_s0 + $0x30] sm:$0xff]  ;;  %v962_v34 = vld [vmem:[%s2297_s0 + $0x2c] sm:$0xf] }
  0x14   :  { %v652_v35 = vcombine.high %v963_v33, %v963_v33  ;;  %v965_v36 = vld [vmem:[%s2297_s0 + $0x3c] sm:$0xff]  ;;  %v964_v37 = vld [vmem:[%s2297_s0 + $0x38] sm:$0xf] }
  0x15   :  { %1509 = vmatpush3.bf16.msra.mxu0 %v2001_v48  ;;  %v799_v40 = vcombine.high %v965_v36, %v965_v36 }
  0x16   :  { %1536 = vmatpush3.bf16.msra.mxu1 %v2003_v49  ;;  %1511 = vmatprep.subr.bf16.mxu0 %v2010_v52 }
  0x17   :  { %1537 = vmatprep.subr.bf16.mxu1 %v1835_v3 }
  0x19   :  { %1513 = vmatpush3.bf16.msra.mxu0 %v2029_v58 }
  0x1a   :  { %1539 = vmatpush3.bf16.msra.mxu1 %v2031_v59  ;;  %1515 = vmatprep.subr.bf16.mxu0 %v2038_v61 }
  0x1b   :  { %1540 = vmatprep.subr.bf16.mxu1 %v1835_v3 }
  0x1d   :  { %1517 = vmatpush3.bf16.msra.mxu0 %v2057_v6 }
  0x1e   :  { %1542 = vmatpush3.bf16.msra.mxu1 %v2059_v7  ;;  %1519 = vmatprep.subr.bf16.mxu0 %v2066_v11 }
  0x1f   :  { %1543 = vmatprep.subr.bf16.mxu1 %v1835_v3 }
  0x21   :  { %1521 = vmatpush3.bf16.msra.mxu0 %v2079_v16 }
  0x22   :  { %1545 = vmatpush3.bf16.msra.mxu1 %v2081_v17  ;;  %1547 = vmatprep.subr.bf16.mxu0 %v1870_v5 }
  0x23   :  { %1578 = vmatprep.subr.bf16.mxu1 %v1835_v3 }
  0x24   :  { %132 = vmatmul.mubr.f32.vlgmr.msra.gmra.mrb[0].mxu0 %v62_v47 }
  0x25   :  { %1313 = vmatmul.mubr.f32.vlgmr.msra.gmra.mrb[0].mxu1 %v63_v21  ;;  %1549 = vmatpush3.bf16.msra.mxu0 %v1881_v9 }
  0x26   :  { %1580 = vmatpush3.bf16.msra.mxu1 %v1883_v10  ;;  %1551 = vmatprep.subr.bf16.mxu0 %v1895_v14 }
  0x27   :  { %1581 = vmatprep.subr.bf16.mxu1 %v1835_v3  ;;  %277 = vmatprep.mubr.f32.mxu0 %v211_v22 }
  0x28   :  { %1347 = vmatprep.mubr.msk.f32.mxu1 %vm1836_vm0, %v1837_v4 }
  0x29   :  { %1553 = vmatpush3.bf16.msra.mxu0 %v1908_v18 }
  0x2a   :  { %1583 = vmatpush3.bf16.msra.mxu1 %v1910_v19  ;;  %1555 = vmatprep.subr.bf16.mxu0 %v1923_v23 }
  0x2b   :  { %1584 = vmatprep.subr.bf16.mxu1 %v1835_v3 }
  0x2d   :  { %1557 = vmatpush3.bf16.msra.mxu0 %v1942_v29 }
  0x2e   :  { %1586 = vmatpush3.bf16.msra.mxu1 %v1944_v30  ;;  %1559 = vmatprep.subr.bf16.mxu0 %v1951_v32 }
  0x2f   :  { %1587 = vmatprep.subr.bf16.mxu1 %v1835_v3 }
  0x31   :  { %1561 = vmatpush3.bf16.msra.mxu0 %v1970_v38 }
  0x32   :  { %1589 = vmatpush3.bf16.msra.mxu1 %v1972_v39  ;;  %1563 = vmatprep.subr.bf16.mxu0 %v1979_v41 }
  0x33   :  { %1590 = vmatprep.subr.bf16.mxu1 %v1835_v3 }
  0x35   :  { %1565 = vmatpush3.bf16.msra.mxu0 %v2001_v48 }
  0x36   :  { %1592 = vmatpush3.bf16.msra.mxu1 %v2003_v49  ;;  %1567 = vmatprep.subr.bf16.mxu0 %v2010_v52 }
  0x37   :  { %1593 = vmatprep.subr.bf16.mxu1 %v1835_v3 }
  0x39   :  { %1569 = vmatpush3.bf16.msra.mxu0 %v2029_v58 }
  0x3a   :  { %1595 = vmatpush3.bf16.msra.mxu1 %v2031_v59  ;;  %1571 = vmatprep.subr.bf16.mxu0 %v2038_v61 }
  0x3b   :  { %1596 = vmatprep.subr.bf16.mxu1 %v1835_v3 }
  0x3d   :  { %1573 = vmatpush3.bf16.msra.mxu0 %v2057_v6 }
  0x3e   :  { %1598 = vmatpush3.bf16.msra.mxu1 %v2059_v7  ;;  %1575 = vmatprep.subr.bf16.mxu0 %v2066_v11 }
  0x3f   :  { %1599 = vmatprep.subr.bf16.mxu1 %v1835_v3 }
  0x41   :  { %1577 = vmatpush3.bf16.msra.mxu0 %v2079_v16 }
  0x42   :  { %1601 = vmatpush3.bf16.msra.mxu1 %v2081_v17  ;;  %1603 = vmatprep.subr.bf16.mxu0 %v1870_v5 }
  0x43   :  { %1634 = vmatprep.subr.bf16.mxu1 %v1835_v3 }
  0x44   :  { %278 = vmatmul.mubr.f32.vlgmr.msra.gmra.mrb[2].mxu0 %v957_v20 }
  0x45   :  { %1348 = vmatmul.mubr.f32.vlgmr.msra.gmra.mrb[2].mxu1 %v958_v25  ;;  %1605 = vmatpush3.bf16.msra.mxu0 %v1881_v9 }
  0x46   :  { %1636 = vmatpush3.bf16.msra.mxu1 %v1883_v10  ;;  %1607 = vmatprep.subr.bf16.mxu0 %v1895_v14 }
  0x47   :  { %1637 = vmatprep.subr.bf16.mxu1 %v1835_v3  ;;  %424 = vmatprep.mubr.f32.mxu0 %v358_v26 }
  0x48   :  { %1382 = vmatprep.mubr.msk.f32.mxu1 %vm1836_vm0, %v1837_v4 }
  0x49   :  { %1609 = vmatpush3.bf16.msra.mxu0 %v1908_v18 }
  0x4a   :  { %1639 = vmatpush3.bf16.msra.mxu1 %v1910_v19  ;;  %1611 = vmatprep.subr.bf16.mxu0 %v1923_v23 }
  0x4b   :  { %1640 = vmatprep.subr.bf16.mxu1 %v1835_v3 }
  0x4d   :  { %1613 = vmatpush3.bf16.msra.mxu0 %v1942_v29 }
  0x4e   :  { %1642 = vmatpush3.bf16.msra.mxu1 %v1944_v30  ;;  %1615 = vmatprep.subr.bf16.mxu0 %v1951_v32 }
  0x4f   :  { %1643 = vmatprep.subr.bf16.mxu1 %v1835_v3 }
  0x51   :  { %1617 = vmatpush3.bf16.msra.mxu0 %v1970_v38 }
  0x52   :  { %1645 = vmatpush3.bf16.msra.mxu1 %v1972_v39  ;;  %1619 = vmatprep.subr.bf16.mxu0 %v1979_v41 }
  0x53   :  { %1646 = vmatprep.subr.bf16.mxu1 %v1835_v3 }
  0x55   :  { %1621 = vmatpush3.bf16.msra.mxu0 %v2001_v48 }
  0x56   :  { %1648 = vmatpush3.bf16.msra.mxu1 %v2003_v49  ;;  %1623 = vmatprep.subr.bf16.mxu0 %v2010_v52 }
  0x57   :  { %1649 = vmatprep.subr.bf16.mxu1 %v1835_v3 }
  0x59   :  { %1625 = vmatpush3.bf16.msra.mxu0 %v2029_v58 }
  0x5a   :  { %1651 = vmatpush3.bf16.msra.mxu1 %v2031_v59  ;;  %1627 = vmatprep.subr.bf16.mxu0 %v2038_v61 }
  0x5b   :  { %1652 = vmatprep.subr.bf16.mxu1 %v1835_v3 }
  0x5d   :  { %1629 = vmatpush3.bf16.msra.mxu0 %v2057_v6 }
  0x5e   :  { %1654 = vmatpush3.bf16.msra.mxu1 %v2059_v7  ;;  %1631 = vmatprep.subr.bf16.mxu0 %v2066_v11 }
  0x5f   :  { %1655 = vmatprep.subr.bf16.mxu1 %v1835_v3 }
  0x61   :  { %1633 = vmatpush3.bf16.msra.mxu0 %v2079_v16 }
  0x62   :  { %1657 = vmatpush3.bf16.msra.mxu1 %v2081_v17  ;;  %1659 = vmatprep.subr.bf16.mxu0 %v1870_v5 }
  0x63   :  { %1690 = vmatprep.subr.bf16.mxu1 %v1835_v3 }
  0x64   :  { %425 = vmatmul.mubr.f32.vlgmr.msra.gmra.mrb[4].mxu0 %v959_v24 }
  0x65   :  { %1383 = vmatmul.mubr.f32.vlgmr.msra.gmra.mrb[4].mxu1 %v960_v28  ;;  %1661 = vmatpush3.bf16.msra.mxu0 %v1881_v9 }
  0x66   :  { %1692 = vmatpush3.bf16.msra.mxu1 %v1883_v10  ;;  %1663 = vmatprep.subr.bf16.mxu0 %v1895_v14 }
  0x67   :  { %1693 = vmatprep.subr.bf16.mxu1 %v1835_v3  ;;  %571 = vmatprep.mubr.f32.mxu0 %v505_v31 }
  0x68   :  { %1417 = vmatprep.mubr.msk.f32.mxu1 %vm1836_vm0, %v1837_v4 }
  0x69   :  { %1665 = vmatpush3.bf16.msra.mxu0 %v1908_v18 }
  0x6a   :  { %1695 = vmatpush3.bf16.msra.mxu1 %v1910_v19  ;;  %1667 = vmatprep.subr.bf16.mxu0 %v1923_v23 }
  0x6b   :  { %1696 = vmatprep.subr.bf16.mxu1 %v1835_v3 }
  0x6d   :  { %1669 = vmatpush3.bf16.msra.mxu0 %v1942_v29 }
  0x6e   :  { %1698 = vmatpush3.bf16.msra.mxu1 %v1944_v30  ;;  %1671 = vmatprep.subr.bf16.mxu0 %v1951_v32 }
  0x6f   :  { %1699 = vmatprep.subr.bf16.mxu1 %v1835_v3 }
  0x71   :  { %1673 = vmatpush3.bf16.msra.mxu0 %v1970_v38 }
  0x72   :  { %1701 = vmatpush3.bf16.msra.mxu1 %v1972_v39  ;;  %1675 = vmatprep.subr.bf16.mxu0 %v1979_v41 }
  0x73   :  { %1702 = vmatprep.subr.bf16.mxu1 %v1835_v3 }
  0x75   :  { %1677 = vmatpush3.bf16.msra.mxu0 %v2001_v48 }
  0x76   :  { %1704 = vmatpush3.bf16.msra.mxu1 %v2003_v49  ;;  %1679 = vmatprep.subr.bf16.mxu0 %v2010_v52 }
  0x77   :  { %1705 = vmatprep.subr.bf16.mxu1 %v1835_v3 }
  0x79   :  { %1681 = vmatpush3.bf16.msra.mxu0 %v2029_v58 }
  0x7a   :  { %1707 = vmatpush3.bf16.msra.mxu1 %v2031_v59  ;;  %1683 = vmatprep.subr.bf16.mxu0 %v2038_v61 }
  0x7b   :  { %1708 = vmatprep.subr.bf16.mxu1 %v1835_v3 }
  0x7d   :  { %1685 = vmatpush3.bf16.msra.mxu0 %v2057_v6 }
  0x7e   :  { %1710 = vmatpush3.bf16.msra.mxu1 %v2059_v7  ;;  %1687 = vmatprep.subr.bf16.mxu0 %v2066_v11 }
  0x7f   :  { %1711 = vmatprep.subr.bf16.mxu1 %v1835_v3 }
  0x81   :  { %1689 = vmatpush3.bf16.msra.mxu0 %v2079_v16 }
  0x82   :  { %1713 = vmatpush3.bf16.msra.mxu1 %v2081_v17  ;;  %1715 = vmatprep.subr.bf16.mxu0 %v1870_v5 }
  0x83   :  { %1746 = vmatprep.subr.bf16.mxu1 %v1835_v3 }
  0x84   :  { %572 = vmatmul.mubr.f32.vlgmr.msra.gmra.mrb[6].mxu0 %v961_v27 }
  0x85   :  { %1418 = vmatmul.mubr.f32.vlgmr.msra.gmra.mrb[6].mxu1 %v962_v34  ;;  %1717 = vmatpush3.bf16.msra.mxu0 %v1881_v9 }
  0x86   :  { %1748 = vmatpush3.bf16.msra.mxu1 %v1883_v10  ;;  %1719 = vmatprep.subr.bf16.mxu0 %v1895_v14 }
  0x87   :  { %1749 = vmatprep.subr.bf16.mxu1 %v1835_v3  ;;  %718 = vmatprep.mubr.f32.mxu0 %v652_v35 }
  0x88   :  { %1452 = vmatprep.mubr.msk.f32.mxu1 %vm1836_vm0, %v1837_v4 }
  0x89   :  { %1721 = vmatpush3.bf16.msra.mxu0 %v1908_v18 }
  0x8a   :  { %1751 = vmatpush3.bf16.msra.mxu1 %v1910_v19  ;;  %1723 = vmatprep.subr.bf16.mxu0 %v1923_v23 }
  0x8b   :  { %1752 = vmatprep.subr.bf16.mxu1 %v1835_v3 }
  0x8d   :  { %1725 = vmatpush3.bf16.msra.mxu0 %v1942_v29 }
  0x8e   :  { %1754 = vmatpush3.bf16.msra.mxu1 %v1944_v30  ;;  %1727 = vmatprep.subr.bf16.mxu0 %v1951_v32 }
  0x8f   :  { %1755 = vmatprep.subr.bf16.mxu1 %v1835_v3 }
  0x91   :  { %1729 = vmatpush3.bf16.msra.mxu0 %v1970_v38 }
  0x92   :  { %1757 = vmatpush3.bf16.msra.mxu1 %v1972_v39  ;;  %1731 = vmatprep.subr.bf16.mxu0 %v1979_v41 }
  0x93   :  { %1758 = vmatprep.subr.bf16.mxu1 %v1835_v3 }
  0x95   :  { %1733 = vmatpush3.bf16.msra.mxu0 %v2001_v48 }
  0x96   :  { %1760 = vmatpush3.bf16.msra.mxu1 %v2003_v49  ;;  %1735 = vmatprep.subr.bf16.mxu0 %v2010_v52 }
  0x97   :  { %1761 = vmatprep.subr.bf16.mxu1 %v1835_v3 }
  0x99   :  { %1737 = vmatpush3.bf16.msra.mxu0 %v2029_v58 }
  0x9a   :  { %1763 = vmatpush3.bf16.msra.mxu1 %v2031_v59  ;;  %1739 = vmatprep.subr.bf16.mxu0 %v2038_v61 }
  0x9b   :  { %1764 = vmatprep.subr.bf16.mxu1 %v1835_v3 }
  0x9d   :  { %1741 = vmatpush3.bf16.msra.mxu0 %v2057_v6 }
  0x9e   :  { %1766 = vmatpush3.bf16.msra.mxu1 %v2059_v7  ;;  %1743 = vmatprep.subr.bf16.mxu0 %v2066_v11 }
  0x9f   :  { %1767 = vmatprep.subr.bf16.mxu1 %v1835_v3 }
  0xa1   :  { %1745 = vmatpush3.bf16.msra.mxu0 %v2079_v16 }
  0xa2   :  { %1769 = vmatpush3.bf16.msra.mxu1 %v2081_v17  ;;  %1771 = vmatprep.subr.bf16.mxu0 %v1870_v5 }
  0xa3   :  { %1802 = vmatprep.subr.bf16.mxu1 %v1835_v3 }
  0xa4   :  { %719 = vmatmul.mubr.f32.vlgmr.msra.gmra.mrb[8].mxu0 %v963_v33 }
  0xa5   :  { %1453 = vmatmul.mubr.f32.vlgmr.msra.gmra.mrb[8].mxu1 %v964_v37  ;;  %1773 = vmatpush3.bf16.msra.mxu0 %v1881_v9 }
  0xa6   :  { %1804 = vmatpush3.bf16.msra.mxu1 %v1883_v10  ;;  %1775 = vmatprep.subr.bf16.mxu0 %v1895_v14 }
  0xa7   :  { %1805 = vmatprep.subr.bf16.mxu1 %v1835_v3  ;;  %865 = vmatprep.mubr.f32.mxu0 %v799_v40 }
  0xa8   :  { %1487 = vmatprep.mubr.msk.f32.mxu1 %vm1836_vm0, %v1837_v4  ;;  %v966_v4 = vld [vmem:[%s2297_s0 + $0x44] sm:$0xf] }
  0xa9   :  { %1777 = vmatpush3.bf16.msra.mxu0 %v1908_v18 }
  0xaa   :  { %1807 = vmatpush3.bf16.msra.mxu1 %v1910_v19  ;;  %1779 = vmatprep.subr.bf16.mxu0 %v1923_v23 }
  0xab   :  { %1808 = vmatprep.subr.bf16.mxu1 %v1835_v3 }
  0xad   :  { %1781 = vmatpush3.bf16.msra.mxu0 %v1942_v29 }
  0xae   :  { %1810 = vmatpush3.bf16.msra.mxu1 %v1944_v30  ;;  %1783 = vmatprep.subr.bf16.mxu0 %v1951_v32 }
  0xaf   :  { %1811 = vmatprep.subr.bf16.mxu1 %v1835_v3 }
  0xb1   :  { %1785 = vmatpush3.bf16.msra.mxu0 %v1970_v38 }
  0xb2   :  { %1813 = vmatpush3.bf16.msra.mxu1 %v1972_v39  ;;  %1787 = vmatprep.subr.bf16.mxu0 %v1979_v41 }
  0xb3   :  { %1814 = vmatprep.subr.bf16.mxu1 %v1835_v3 }
  0xb5   :  { %1789 = vmatpush3.bf16.msra.mxu0 %v2001_v48 }
  0xb6   :  { %1816 = vmatpush3.bf16.msra.mxu1 %v2003_v49  ;;  %1791 = vmatprep.subr.bf16.mxu0 %v2010_v52 }
  0xb7   :  { %1817 = vmatprep.subr.bf16.mxu1 %v1835_v3 }
  0xb9   :  { %1793 = vmatpush3.bf16.msra.mxu0 %v2029_v58 }
  0xba   :  { %1819 = vmatpush3.bf16.msra.mxu1 %v2031_v59  ;;  %1795 = vmatprep.subr.bf16.mxu0 %v2038_v61 }
  0xbb   :  { %1820 = vmatprep.subr.bf16.mxu1 %v1835_v3 }
  0xbd   :  { %1797 = vmatpush3.bf16.msra.mxu0 %v2057_v6 }
  0xbe   :  { %1822 = vmatpush3.bf16.msra.mxu1 %v2059_v7  ;;  %1799 = vmatprep.subr.bf16.mxu0 %v2066_v11  ;;  %v967_v7 = vld [vmem:[%s2298_s2] ss:$0 sm:$0xff] }
  0xbf   :  { %1823 = vmatprep.subr.bf16.mxu1 %v1835_v3 }
  0xc1   :  { %1801 = vmatpush3.bf16.msra.mxu0 %v2079_v16 }
  0xc2   :  { %1825 = vmatpush3.bf16.msra.mxu1 %v2081_v17 }
  0xc4   :  { %866 = vmatmul.mubr.f32.vlgmr.msra.gmra.mrb[10].mxu0 %v965_v36 }
  0xc5   :  { %1488 = vmatmul.mubr.f32.vlgmr.msra.gmra.mrb[10].mxu1 %v966_v4 }
  0xf7   :  { %v1000_v5 = vpop.f32.mrb[0].mxu0 }
  0xf8   :  { %v203_v9 = vpop.f32.mrb[0].mxu1  ;;  %v1001_v10 = vpop.f32.mrb[1].mxu0 }
  0xf9   :  { %v1314_v14 = vpop.f32.mrb[1].mxu1  ;;  %v1002_v18 = vadd.f32 %v1001_v10, %v1000_v5 }
  0xfb   :  { %v204_v19 = vadd.f32 %v1002_v18, %v203_v9 }
 0x117   :  { %v1052_v23 = vpop.f32.mrb[2].mxu0 }
 0x118   :  { %v349_v29 = vpop.f32.mrb[2].mxu1  ;;  %v1053_v30 = vpop.f32.mrb[3].mxu0 }
 0x119   :  { %v1349_v3 = vpop.f32.mrb[3].mxu1  ;;  %v1054_v32 = vadd.f32 %v1053_v30, %v1052_v23 }
 0x11b   :  { %v350_v38 = vadd.f32 %v1054_v32, %v349_v29 }
 0x11d   :  { %v353_v39 = vmax.f32 %v204_v19, %v350_v38 }
 0x137   :  { %v1104_v41 = vpop.f32.mrb[4].mxu0 }
 0x138   :  { %v496_v42 = vpop.f32.mrb[4].mxu1  ;;  %v1105_v43 = vpop.f32.mrb[5].mxu0 }
 0x139   :  { %v1384_v44 = vpop.f32.mrb[5].mxu1  ;;  %v1106_v45 = vadd.f32 %v1105_v43, %v1104_v41 }
 0x13b   :  { %v497_v46 = vadd.f32 %v1106_v45, %v496_v42 }
 0x13d   :  { %v500_v47 = vmax.f32 %v353_v39, %v497_v46 }
 0x157   :  { %v1156_v48 = vpop.f32.mrb[6].mxu0 }
 0x158   :  { %v643_v49 = vpop.f32.mrb[6].mxu1  ;;  %v1157_v50 = vpop.f32.mrb[7].mxu0 }
 0x159   :  { %v1419_v51 = vpop.f32.mrb[7].mxu1  ;;  %v1158_v52 = vadd.f32 %v1157_v50, %v1156_v48 }
 0x15b   :  { %v644_v53 = vadd.f32 %v1158_v52, %v643_v49 }
 0x15d   :  { %v647_v54 = vmax.f32 %v500_v47, %v644_v53 }
 0x177   :  { %v1208_v55 = vpop.f32.mrb[8].mxu0 }
 0x178   :  { %v790_v56 = vpop.f32.mrb[8].mxu1  ;;  %v1209_v57 = vpop.f32.mrb[9].mxu0 }
 0x179   :  { %v1454_v58 = vpop.f32.mrb[9].mxu1  ;;  %v1210_v59 = vadd.f32 %v1209_v57, %v1208_v55 }
 0x17b   :  { %v791_v60 = vadd.f32 %v1210_v59, %v790_v56 }
 0x17d   :  { %v794_v61 = vmax.f32 %v647_v54, %v791_v60 }
 0x197   :  { %v1260_v62 = vpop.f32.mrb[10].mxu0 }
 0x198   :  { %v937_v63 = vpop.f32.mrb[10].mxu1  ;;  %v1261_v0 = vpop.f32.mrb[11].mxu0 }
 0x199   :  { %v1489_v1 = vpop.f32.mrb[11].mxu1  ;;  %v1262_v2 = vadd.f32 %v1261_v0, %v1260_v62 }
 0x19b   :  { %v938_v6 = vadd.f32 %v1262_v2, %v937_v63 }
 0x19d   :  { %v941_v8 = vmax.f32 %v794_v61, %v938_v6 }
 0x19f   :  { %v949_v11 = vadd.f32 %v967_v7, %v941_v8 }
 0x1a1   :  { %v950_v12 = vmax.f32 %v949_v11, 0.0 }
 0x1a3   :  { %952 = vst.msk [vmem:[%s2299_s3] sm:$0xf] %vm951_vm1, %v950_v12 }

// kernel: _lambda_.7
= control target key start
LH: loop header
LB: loop body
LE: loop exit
PB: predicated region body
PF: predicated region fallthrough
CT: control target
= control target key end

     0   :  { %v1177_v3 = vmov 0.0|0.0   ;;  %vm1178_vm0 = vmmov 0   ;;  %v1179_v6 = vmov 0.0   ;;  %s1463_s0 = inlined_call_operand.vmem [shape: f32[4,96], index: 0, kind: input, shape index: {}]   ;;  %s1464_s1 = inlined_call_operand.vmem [shape: f32[96,128], index: 1, kind: input, shape index: {}]   ;;  %s1465_s2 = inlined_call_operand.vmem [shape: f32[32,128], index: 2, kind: input, shape index: {}]   ;;  %s1466_s3 = inlined_call_operand.vmem [shape: f32[1,128], index: 3, kind: input, shape index: {}]   ;;  %s1467_s4 = inlined_call_operand.vmem [shape: f32[32,128], index: 4, kind: input, shape index: {}]   ;;  %s1468_s5 = inlined_call_operand.vmem [shape: f32[32,128], index: 5, kind: input, shape index: {}]   ;;  %s1469_s6 = inlined_call_operand.vmem [shape: f32[1,128], index: 6, kind: input, shape index: {}]   ;;  %s1470_s7 = inlined_call_operand.vmem [shape: f32[32,120], index: 7, kind: input, shape index: {}]   ;;  %s1471_s8 = inlined_call_operand.vmem [shape: f32[1,120], index: 8, kind: input, shape index: {}]   ;;  %s1472_s9 = inlined_call_operand.vmem [shape: f32[120,4], index: 9, kind: input, shape index: {}]   ;;  %s1473_s10 = inlined_call_operand.vmem [shape: f32[1,4], index: 10, kind: input, shape index: {}]   ;;  %s1474_s11 = inlined_call_operand.hbm [shape: f32[2,4], index: 11, kind: output, shape index: {}]  }
   0x1   :  { %v40_v0 = vld [vmem:[%s1464_s1] sm:$0xff]  ;;  %v41_v1 = vld [vmem:[%s1464_s1 + $0x8] sm:$0xff]  ;;  %v42_v2 = vld [vmem:[%s1464_s1 + $0x10] sm:$0xff]  ;;  %1040 = vmatprep.subr.bf16.mxu0 %v1177_v3  ;;  %938 = vmatprep.mubr.msk.f32.mxu0 %vm1178_vm0, %v1179_v6 }
   0x2   :  { %v1041_v4 = vpack.c.bf16 %v41_v1, %v40_v0  ;;  %v43_v5 = vld [vmem:[%s1464_s1 + $0x18] sm:$0xff]  ;;  %1064 = vmatprep.subr.bf16.mxu1 %v1177_v3  ;;  %960 = vmatprep.mubr.msk.f32.mxu1 %vm1178_vm0, %v1179_v6  ;;  %v44_v8 = vld [vmem:[%s1464_s1 + $0x20] sm:$0xff]  ;;  %v45_v9 = vld [vmem:[%s1464_s1 + $0x28] sm:$0xff] }
   0x3   :  { %v1044_v7 = vpack.c.bf16 %v43_v5, %v42_v2  ;;  %v133_v10 = vld [vmem:[%s1465_s2] sm:$0xff]  ;;  %v134_v11 = vld [vmem:[%s1465_s2 + $0x8] sm:$0xff]  ;;  %v135_v13 = vld [vmem:[%s1465_s2 + $0x10] sm:$0xff] }
   0x4   :  { %1042 = vmatpush3.bf16.msra.mxu0 %v1041_v4  ;;  %v1059_v12 = vpack.c.bf16 %v134_v11, %v133_v10  ;;  %v136_v14 = vld [vmem:[%s1465_s2 + $0x18] sm:$0xff] }
   0x5   :  { %1043 = vmatprep.subr.bf16.mxu0 %v1177_v3 }
   0x6   :  { %16 = vsyncpa [#allocation4], 0  ;;  %v1047_v15 = vpack.c.bf16 %v45_v9, %v44_v8  ;;  %1066 = vmatpush3.bf16.msra.mxu1 %v1059_v12  ;;  %v46_v16 = vld [vmem:[%s1464_s1 + $0x30] sm:$0xff]  ;;  %v47_v17 = vld [vmem:[%s1464_s1 + $0x38] sm:$0xff]  ;;  %v1062_v18 = vpack.c.bf16 %v136_v14, %v135_v13  ;;  %vm59_vm1 = vcmask 785408   ;;  %s1180_s12 = smov 64  }
   0x7   :  { %1067 = vmatprep.subr.bf16.mxu1 %v1177_v3  ;;  %v1050_v19 = vpack.c.bf16 %v47_v17, %v46_v16  ;;  %v48_v20 = vld [vmem:[%s1464_s1 + $0x40] sm:$0xff]  ;;  %v49_v21 = vld [vmem:[%s1464_s1 + $0x48] sm:$0xff]  ;;  %v50_v23 = vld [vmem:[%s1464_s1 + $0x50] sm:$0xff]  ;;  %s1181_s13 = smov 32   ;;  %vm240_vm2 = vcmask 254976   ;;  %vm137_vm3 = vcmask 261120  }
   0x8   :  { %1045 = vmatpush3.bf16.msra.mxu0 %v1044_v7  ;;  %v1053_v22 = vpack.c.bf16 %v49_v21, %v48_v20  ;;  %v51_v24 = vld [vmem:[%s1464_s1 + $0x58] sm:$0xff]  ;;  %v39_v26 = vld [vmem:[%s1463_s0] sm:$0xf]  ;;  %v353_v1 = vld [vmem:[%s1467_s4 + $0x8] sm:$0xff]  ;;  %vm349_vm4 = vcmask 257026   ;;  %vm751_vm5 = vcmask 982016  }
   0x9   :  { %1046 = vmatprep.subr.bf16.mxu0 %v1177_v3  ;;  %v1056_v25 = vpack.c.bf16 %v51_v24, %v50_v23  ;;  %v841_v29 = vld [vmem:[%s1466_s3] ss:$0 sm:$0xff]  ;;  %v437_v5 = vld [vmem:[%s1468_s5 + $0x8] sm:$0xff]  ;;  %v354_v8 = vld [vmem:[%s1467_s4 + $0x10] sm:$0xff]  ;;  %s1182_s21 = smov [#allocation3]   ;;  %vm825_vm6 = vcmask 25600  }
   0xa   :  { %1069 = vmatpush3.bf16.msra.mxu1 %v1062_v18  ;;  %v352_v0 = vld [vmem:[%s1467_s4] sm:$0xff]  ;;  %v355_v9 = vld [vmem:[%s1467_s4 + $0x18] sm:$0xff]  ;;  %v438_v10 = vld [vmem:[%s1468_s5 + $0x10] sm:$0xff] }
   0xb   :  { %1070 = vmatprep.subr.bf16.mxu1 %v1177_v3  ;;  %v1071_v2 = vpack.c.bf16 %v353_v1, %v352_v0  ;;  %v436_v4 = vld [vmem:[%s1468_s5] sm:$0xff]  ;;  %v1074_v11 = vpack.c.bf16 %v355_v9, %v354_v8  ;;  %v732_v1 = vld [vmem:[%s1472_s9 + $0x18] sm:$0xff]  ;;  %v735_v9 = vld [vmem:[%s1472_s9 + $0x30] sm:$0xff] }
   0xc   :  { %1048 = vmatpush3.bf16.msra.mxu0 %v1047_v15  ;;  %v1077_v7 = vpack.c.bf16 %v437_v5, %v436_v4  ;;  %v846_v20 = vld [vmem:[%s1469_s6] ss:$0 sm:$0xff]  ;;  %v734_v5 = vld [vmem:[%s1472_s9 + $0x28] sm:$0xff] }
   0xd   :  { %1049 = vmatprep.subr.bf16.mxu0 %v1177_v3  ;;  %v733_v4 = vld [vmem:[%s1472_s9 + $0x20] sm:$0xff] }
  0x10   :  { %1051 = vmatpush3.bf16.msra.mxu0 %v1050_v19 }
  0x11   :  { %1052 = vmatprep.subr.bf16.mxu0 %v1177_v3 }
  0x14   :  { %1054 = vmatpush3.bf16.msra.mxu0 %v1053_v22 }
  0x15   :  { %1055 = vmatprep.subr.bf16.mxu0 %v1177_v3 }
  0x18   :  { %1057 = vmatpush3.bf16.msra.mxu0 %v1056_v25 }
  0x19   :  { %1058 = vmatprep.subr.bf16.mxu0 %v1177_v3 }
  0x1b   :  { %939 = vmatmul.mubr.msk.f32.vlgmr.msra.gmra.mrb[0].mxu0 %vm59_vm1, %v39_v26 }
  0x1c   :  { %1060 = vmatpush3.bf16.msra.mxu0 %v1059_v12  ;;  %949 = vmatprep.mubr.msk.f32.mxu0 %vm1178_vm0, %v1179_v6  ;;  %v439_v12 = vld [vmem:[%s1468_s5 + $0x18] sm:$0xff] }
  0x1d   :  { %1061 = vmatprep.subr.bf16.mxu0 %v1177_v3  ;;  %v1080_v13 = vpack.c.bf16 %v439_v12, %v438_v10  ;;  %v736_v10 = vld [vmem:[%s1472_s9 + $0x38] sm:$0xff] }
  0x20   :  { %1063 = vmatpush3.bf16.msra.mxu0 %v1062_v18 }
  0x21   :  { %1076 = vmatprep.subr.bf16.mxu0 %v1177_v3 }
  0x23   :  { %950 = vmatmul.mubr.f32.vlgmr.msra.gmra.mrb[2].mxu0 %v1179_v6 }
  0x24   :  { %982 = vmatprep.mubr.msk.f32.mxu0 %vm1178_vm0, %v1179_v6  ;;  %1078 = vmatpush3.bf16.msra.mxu0 %v1077_v7 }
  0x25   :  { %1079 = vmatprep.subr.bf16.mxu0 %v1177_v3 }
  0x28   :  { %1081 = vmatpush3.bf16.msra.mxu0 %v1080_v13 }
  0x29   :  { %1088 = vmatprep.subr.bf16.mxu0 %v1177_v3 }
  0x2b   :  { %983 = vmatmul.mubr.f32.vlgmr.msra.gmra.mrb[4].mxu0 %v1179_v6 }
  0x2c   :  { %1004 = vmatprep.mubr.msk.f32.mxu0 %vm1178_vm0, %v1179_v6 }
  0xee   :  { %v129_v27 = vpop.f32.mrb[0].mxu0 }
  0xef   :  { %v940_v28 = vpop.f32.mrb[1].mxu0  ;;  %v130_v30 = vadd.f32 %v841_v29, %v129_v27 }
  0xf6   :  { %v207_v31 = vpop.f32.mrb[2].mxu0 }
  0xf7   :  { %v211_v32 = vadd.f32 %v207_v31, %v130_v30  ;;  %v951_v33 = vpop.f32.mrb[3].mxu0 }
  0xf9   :  { %1121 = vtanh.f32 %v211_v32  ;;  %v843_v35 = vmul.f32 -1.442695, %v211_v32 }
  0xfb   :  { %1123 = vpow2.f32 %v843_v35 }
  0xfe   :  { %v506_v18 = vpop.f32.mrb[4].mxu0 }
  0xff   :  { %v984_v19 = vpop.f32.mrb[5].mxu0 }
 0x103   :  { %v1122_v34 = vpop.eup %1121 }
 0x104   :  { %221 = vrot.lane.b32.xlu0 %v1122_v34, %s1180_s12 }
 0x105   :  { %v1124_v36 = vpop.eup %1123 }
 0x106   :  { %v215_v37 = vadd.f32 1.0, %v1124_v36 }
 0x108   :  { %1125 = vrcp.f32 %v215_v37 }
 0x112   :  { %v1126_v38 = vpop.eup %1125 }
 0x113   :  { %v219_v41 = vmul.f32 0.0, %v1126_v38 }
 0x176   :  { %v222_v39 = vpop.permute.xlu0 %221 }
 0x177   :  { %v224_v40 = vmul.f32 %v1126_v38, %v222_v39 }
 0x179   :  { %226 = vrot.lane.b32.xlu0 %v224_v40, %s1181_s13 }
 0x1eb   :  { %v227_v42 = vpop.permute.xlu0 %226 }
 0x1ec   :  { %v229_v43 = vadd.f32 %v227_v42, %v219_v41 }
 0x1ee   :  { %1127 = vtanh.f32 %v229_v43  ;;  %v326_v59 = vrot.slane %v229_v43, 6 }
 0x1f8   :  { %v1128_v44 = vpop.eup %1127 }
 0x1f9   :  { %232 = vrot.lane.b32.xlu1 %v1128_v44, %s1180_s12 }
 0x26b   :  { %v233_v45 = vpop.permute.xlu1 %232 }
 0x26c   :  { %v235_v46 = vmul.f32 %v1126_v38, %v233_v45 }
 0x26e   :  { %237 = vrot.lane.b32.xlu1 %v235_v46, %s1181_s13 }
 0x2e0   :  { %v238_v47 = vpop.permute.xlu1 %237 }
 0x2e1   :  { %241 = vst.msk [vmem:[#allocation2] sm:$0x3] %vm240_vm2, %v238_v47  ;;  %961 = vmatmul.mubr.msk.f32.vlgmr.msra.gmra.mrb[0].mxu1 %vm137_vm3, %v238_v47 }
 0x2e2   :  { %971 = vmatprep.mubr.msk.f32.mxu1 %vm1178_vm0, %v1179_v6  ;;  %1072 = vmatpush3.bf16.msra.mxu1 %v1071_v2 }
 0x2e3   :  { %1073 = vmatprep.subr.bf16.mxu1 %v1177_v3 }
 0x2e6   :  { %1075 = vmatpush3.bf16.msra.mxu1 %v1074_v11 }
 0x2e7   :  { %1082 = vmatprep.subr.bf16.mxu1 %v1177_v3 }
 0x3b4   :  { %v310_v48 = vpop.f32.mrb[0].mxu1 }
 0x3b5   :  { %v315_v49 = vrot.slane %v310_v48, 6  ;;  %v962_v50 = vpop.f32.mrb[1].mxu1 }
 0x3b7   :  { %v317_v51 = vadd.f32 %v315_v49, %v130_v30 }
 0x3b9   :  { %1129 = vtanh.f32 %v317_v51  ;;  %v845_v53 = vmul.f32 -1.442695, %v317_v51 }
 0x3bb   :  { %1131 = vpow2.f32 %v845_v53 }
 0x3c3   :  { %v1130_v52 = vpop.eup %1129 }
 0x3c4   :  { %330 = vrot.lane.b32.xlu0 %v1130_v52, %s1180_s12 }
 0x3c5   :  { %v1132_v54 = vpop.eup %1131 }
 0x3c6   :  { %v321_v55 = vadd.f32 1.0, %v1132_v54  ;;  %v641_v54 = vld [vmem:[%s1470_s7] sm:$0xff] }
 0x3c8   :  { %1133 = vrcp.f32 %v321_v55  ;;  %v642_v55 = vld [vmem:[%s1470_s7 + $0x8] sm:$0xff] }
 0x3d2   :  { %v1134_v56 = vpop.eup %1133 }
 0x3d3   :  { %v328_v60 = vmul.f32 %v1134_v56, %v326_v59 }
 0x436   :  { %v331_v57 = vpop.permute.xlu0 %330 }
 0x437   :  { %v333_v58 = vmul.f32 %v1134_v56, %v331_v57  ;;  %v1089_v57 = vpack.c.bf16 %v642_v55, %v641_v54 }
 0x439   :  { %335 = vrot.lane.b32.xlu1 %v333_v58, %s1181_s13  ;;  %v644_v58 = vld [vmem:[%s1470_s7 + $0x18] sm:$0xff]  ;;  %1090 = vmatpush3.bf16.msra.mxu0 %v1089_v57 }
 0x43a   :  { %1091 = vmatprep.subr.bf16.mxu0 %v1177_v3 }
 0x4ab   :  { %v336_v61 = vpop.permute.xlu1 %335 }
 0x4ac   :  { %v338_v62 = vadd.f32 %v336_v61, %v328_v60  ;;  %v729_v61 = vld [vmem:[%s1472_s9] sm:$0xff] }
 0x4ae   :  { %1135 = vtanh.f32 %v338_v62  ;;  %v730_v62 = vld [vmem:[%s1472_s9 + $0x8] sm:$0xff] }
 0x4af   :  { %v1095_v0 = vpack.c.bf16 %v730_v62, %v729_v61 }
 0x4b8   :  { %v1136_v63 = vpop.eup %1135 }
 0x4b9   :  { %341 = vrot.lane.b32.xlu0 %v1136_v63, %s1180_s12  ;;  %v731_v63 = vld [vmem:[%s1472_s9 + $0x10] sm:$0xff] }
 0x4ba   :  { %v1098_v2 = vpack.c.bf16 %v732_v1, %v731_v63 }
 0x52b   :  { %v342_v14 = vpop.permute.xlu0 %341 }
 0x52c   :  { %v344_v15 = vmul.f32 %v1134_v56, %v342_v14  ;;  %v643_v56 = vld [vmem:[%s1470_s7 + $0x10] sm:$0xff]  ;;  %v737_v14 = vld [vmem:[%s1472_s9 + $0x40] sm:$0xff] }
 0x52d   :  { %v1092_v59 = vpack.c.bf16 %v644_v58, %v643_v56 }
 0x52e   :  { %346 = vrot.lane.b32.xlu1 %v344_v15, %s1181_s13  ;;  %v738_v15 = vld [vmem:[%s1472_s9 + $0x48] sm:$0xff] }
 0x52f   :  { %1093 = vmatpush3.bf16.msra.mxu0 %v1092_v59 }
 0x5a0   :  { %v347_v16 = vpop.permute.xlu1 %346 }
 0x5a1   :  { %350 = vst.msk [vmem:[#allocation2] sm:$0xc] %vm349_vm4, %v347_v16  ;;  %v1107_v16 = vpack.c.bf16 %v738_v15, %v737_v14 }
 0x5a8   :  { %v351_v17 = vld [vmem:[#allocation2] sm:$0xf] }
 0x5a9   :  { %972 = vmatmul.mubr.msk.f32.vlgmr.msra.gmra.mrb[2].mxu1 %vm137_vm3, %v351_v17  ;;  %v739_v17 = vld [vmem:[%s1472_s9 + $0x50] sm:$0xff] }
 0x5aa   :  { %1084 = vmatpush3.bf16.msra.mxu1 %v1077_v7  ;;  %993 = vmatprep.mubr.msk.f32.mxu1 %vm1178_vm0, %v1179_v6  ;;  %v1101_v7 = vpack.c.bf16 %v734_v5, %v733_v4 }
 0x5ab   :  { %1085 = vmatprep.subr.bf16.mxu1 %v1177_v3 }
 0x5ae   :  { %1087 = vmatpush3.bf16.msra.mxu1 %v1080_v13  ;;  %v1104_v13 = vpack.c.bf16 %v736_v10, %v735_v9 }
 0x5af   :  { %1094 = vmatprep.subr.bf16.mxu1 %v1177_v3 }
 0x67c   :  { %v432_v21 = vpop.f32.mrb[2].mxu1 }
 0x67d   :  { %v433_v22 = vadd.f32 %v846_v20, %v432_v21  ;;  %v973_v23 = vpop.f32.mrb[3].mxu1  ;;  %v741_v21 = vld [vmem:[%s1472_s9 + $0x60] sm:$0xff] }
 0x67f   :  { %v510_v24 = vadd.f32 %v506_v18, %v433_v22  ;;  %v740_v18 = vld [vmem:[%s1472_s9 + $0x58] sm:$0xff] }
 0x680   :  { %v1110_v19 = vpack.c.bf16 %v740_v18, %v739_v17 }
 0x681   :  { %1137 = vtanh.f32 %v510_v24  ;;  %v848_v26 = vmul.f32 -1.442695, %v510_v24  ;;  %v743_v24 = vld [vmem:[%s1472_s9 + $0x70] sm:$0xff] }
 0x683   :  { %1139 = vpow2.f32 %v848_v26 }
 0x68b   :  { %v1138_v25 = vpop.eup %1137 }
 0x68c   :  { %520 = vrot.lane.b32.xlu0 %v1138_v25, %s1180_s12 }
 0x68d   :  { %v1140_v27 = vpop.eup %1139 }
 0x68e   :  { %v514_v28 = vadd.f32 1.0, %v1140_v27 }
 0x690   :  { %1141 = vrcp.f32 %v514_v28 }
 0x69a   :  { %v1142_v29 = vpop.eup %1141 }
 0x69b   :  { %v518_v32 = vmul.f32 0.0, %v1142_v29 }
 0x6fe   :  { %v521_v30 = vpop.permute.xlu0 %520 }
 0x6ff   :  { %v523_v31 = vmul.f32 %v1142_v29, %v521_v30 }
 0x701   :  { %525 = vrot.lane.b32.xlu1 %v523_v31, %s1181_s13 }
 0x773   :  { %v526_v33 = vpop.permute.xlu1 %525 }
 0x774   :  { %v528_v34 = vadd.f32 %v526_v33, %v518_v32 }
 0x776   :  { %1143 = vtanh.f32 %v528_v34  ;;  %v622_v50 = vrot.slane %v528_v34, 6 }
 0x780   :  { %v1144_v35 = vpop.eup %1143 }
 0x781   :  { %531 = vrot.lane.b32.xlu0 %v1144_v35, %s1180_s12 }
 0x7f3   :  { %v532_v36 = vpop.permute.xlu0 %531 }
 0x7f4   :  { %v534_v37 = vmul.f32 %v1142_v29, %v532_v36  ;;  %v853_v29 = vld [vmem:[%s1473_s10] ss:$0 sm:$0xff] }
 0x7f6   :  { %536 = vrot.lane.b32.xlu1 %v534_v37, %s1181_s13 }
 0x868   :  { %v537_v38 = vpop.permute.xlu1 %536 }
 0x869   :  { %994 = vmatmul.mubr.msk.f32.vlgmr.msra.gmra.mrb[4].mxu1 %vm137_vm3, %v537_v38 }
 0x86a   :  { %1037 = vmatprep.mubr.msk.f32.mxu1 %vm1178_vm0, %v1179_v6  ;;  %1096 = vmatpush3.bf16.msra.mxu1 %v1095_v0 }
 0x86b   :  { %1097 = vmatprep.subr.bf16.mxu1 %v1177_v3 }
 0x86e   :  { %1099 = vmatpush3.bf16.msra.mxu1 %v1098_v2 }
 0x86f   :  { %1100 = vmatprep.subr.bf16.mxu1 %v1177_v3 }
 0x872   :  { %1102 = vmatpush3.bf16.msra.mxu1 %v1101_v7 }
 0x873   :  { %1103 = vmatprep.subr.bf16.mxu1 %v1177_v3 }
 0x876   :  { %1105 = vmatpush3.bf16.msra.mxu1 %v1104_v13 }
 0x877   :  { %1106 = vmatprep.subr.bf16.mxu1 %v1177_v3 }
 0x87a   :  { %1108 = vmatpush3.bf16.msra.mxu1 %v1107_v16 }
 0x87b   :  { %1109 = vmatprep.subr.bf16.mxu1 %v1177_v3 }
 0x87e   :  { %1111 = vmatpush3.bf16.msra.mxu1 %v1110_v19 }
 0x87f   :  { %1112 = vmatprep.subr.bf16.mxu1 %v1177_v3  ;;  %v851_v3 = vld [vmem:[%s1471_s8] ss:$0 sm:$0xff] }
 0x93c   :  { %v606_v39 = vpop.f32.mrb[4].mxu1 }
 0x93d   :  { %v611_v40 = vrot.slane %v606_v39, 6  ;;  %v995_v41 = vpop.f32.mrb[5].mxu1 }
 0x93f   :  { %v613_v42 = vadd.f32 %v611_v40, %v433_v22  ;;  %v742_v22 = vld [vmem:[%s1472_s9 + $0x68] sm:$0xff] }
 0x940   :  { %v1113_v23 = vpack.c.bf16 %v742_v22, %v741_v21 }
 0x941   :  { %1145 = vtanh.f32 %v613_v42  ;;  %v850_v44 = vmul.f32 -1.442695, %v613_v42 }
 0x942   :  { %1114 = vmatpush3.bf16.msra.mxu1 %v1113_v23 }
 0x943   :  { %1147 = vpow2.f32 %v850_v44  ;;  %1035 = vmatprep.subr.mxu1 %v1179_v6 }
 0x946   :  { %1036 = vmatpush3.msra.mxu1 %v743_v24 }
 0x94b   :  { %v1146_v43 = vpop.eup %1145 }
 0x94c   :  { %626 = vrot.lane.b32.xlu0 %v1146_v43, %s1180_s12 }
 0x94d   :  { %v1148_v45 = vpop.eup %1147 }
 0x94e   :  { %v617_v46 = vadd.f32 1.0, %v1148_v45 }
 0x950   :  { %1149 = vrcp.f32 %v617_v46 }
 0x95a   :  { %v1150_v47 = vpop.eup %1149 }
 0x95b   :  { %v624_v51 = vmul.f32 %v1150_v47, %v622_v50 }
 0x9be   :  { %v627_v48 = vpop.permute.xlu0 %626 }
 0x9bf   :  { %v629_v49 = vmul.f32 %v1150_v47, %v627_v48 }
 0x9c1   :  { %631 = vrot.lane.b32.xlu1 %v629_v49, %s1181_s13 }
 0xa33   :  { %v632_v52 = vpop.permute.xlu1 %631 }
 0xa34   :  { %v634_v53 = vadd.f32 %v632_v52, %v624_v51 }
 0xa36   :  { %1151 = vtanh.f32 %v634_v53 }
 0xa40   :  { %v1152_v60 = vpop.eup %1151 }
 0xa41   :  { %637 = vrot.lane.b32.xlu0 %v1152_v60, %s1180_s12  ;;  %s833_s12 = sshll.u32 %s1182_s21, 4  ;;  %s834_s12 = int_to_ptr.vmem [resolvable:$true] %s833_s12 }
 0xa42   :  { %s1153_s9 = scalar_lea.vmem %s834_s12, 32  ;;  %p1158_p1 = scmp.lt.s32.totalorder %s834_s12, %s834_s12 }
 0xa43   :  { %p1154_p0 = scmp.ne.s32.totalorder %s834_s12, %s1153_s9  ;;  %p1159_p2 = scmp.lt.s32.totalorder %s1153_s9, %s1153_s9 }
 0xa45   :  { %p1160_p3 = por %p1159_p2, %p1158_p1 }
 0xa47   :  { %p1161_p4 = pnand %p1160_p3, %p1154_p0 }
 0xab3   :  { %v638_v8 = vpop.permute.xlu0 %637 }
 0xab4   :  { %v640_v11 = vmul.f32 %v1150_v47, %v638_v8 }
 0xab6   :  { %v653_v12 = vrot.slane %v640_v11, 2 }
 0xab8   :  { %654 = vrot.lane.b32.xlu1 %v653_v12, %s1181_s13 }
 0xb2a   :  { %v655_v20 = vpop.permute.xlu1 %654 }
 0xb2b   :  { %1005 = vmatmul.mubr.msk.f32.vlgmr.msra.gmra.mrb[6].mxu0 %vm137_vm3, %v655_v20 }
 0xbfe   :  { %v724_v25 = vpop.f32.mrb[6].mxu0 }
 0xbff   :  { %v725_v26 = vadd.f32 %v851_v3, %v724_v25  ;;  %v1006_v27 = vpop.f32.mrb[7].mxu0 }
 0xc01   :  { %v728_v28 = vmax.f32 %v725_v26, 0.0 }
 0xc03   :  { %1038 = vmatmul.mubr.msk.f32.vlgmr.msra.gmra.mrb[6].mxu1 %vm751_vm5, %v728_v28 }
 0xcd6   :  { %v821_v6 = vpop.f32.mrb[6].mxu1 }
 0xcd7   :  { %v822_v30 = vadd.f32 %v853_v29, %v821_v6  ;;  %v1039_v31 = vpop.f32.mrb[7].mxu1 }
 0xcd9   :  { %826 = vst.msk [vmem:[#allocation3] sm:$0x3] %vm825_vm6, %v822_v30 }
 0xcda   :  { %1164 = shalt.err (!%p1161_p4)
}
 0xcdb   :  { %s1165_s22 = scalar_lea.hbm %s1474_s11, 32 }
 0xcdc   :  { %p1166_p5 = scmp.ne.s32.totalorder %s1474_s11, %s1165_s22  ;;  %p1169_p6 = scmp.lt.u32.totalorder %s1165_s22, %s1474_s11 }
 0xcde   :  { %p1171_p7 = pnand %p1169_p6, %p1166_p5 }
 0xce0   :  { %1174 = shalt.err (!%p1171_p7)
}
 0xce1   :  { %836 = dma.vmem_to_hbm [thread:$0]  %s834_s12, 32, %s1474_s11, [#allocation4]  }
 0xce2   :  { %1175 = dma.done.wait [#allocation4], 32  }
 0xce3   :  { %1176 = vsyncadd [#allocation4], 4294967264 }
 0xce4   :  { %840 = vsyncpa [#allocation4], 1 }

</bundles_post_ra>
